<compile_context>
chip_gen: v6e
topology: v6e:2x2x1
jax: 0.10.0
libtpu: 0.0.40
codegen_flags: <defaults>
</compile_context>

<pallas_src>
import functools

import jax
import jax.numpy as jnp
from jax import lax
from jax.experimental import pallas as pl
from jax.experimental.pallas import tpu as pltpu


# ----------------------------------------------------------------------------
# Kernel
# ----------------------------------------------------------------------------
def _nerf_kernel(x_ref, *refs, D, W, in_channels_xyz, skips, sigma_only):
    """NeRF MLP forward on one batch tile.

    refs = [packed params ...] + [out_ref]; param order must match the flat
    list built in nerf_forward().
    """
    f32 = jnp.float32
    bf16 = jnp.bfloat16
    *param_refs, out_ref = refs

    if sigma_only:
        (w_xyz_ref, w_trunk_ref, b_trunk_ref, w_sig_ref, b_sig_ref) = param_refs
    else:
        (w_xyz_ref, w_trunk_ref, b_trunk_ref, w_sig_ref, b_sig_ref,
         w_dx_ref, w_dd_ref, b_dir_ref, w_rgb_ref, b_rgb_ref) = param_refs

    def dotb(a_f32, w_bf16):
        # bf16 operands, f32 accumulation -> full-rate MXU path on v5e/v6e/v7x.
        return jnp.dot(a_f32.astype(bf16), w_bf16, preferred_element_type=f32)

    x = x_ref[...].astype(f32)
    xyz = x[:, :in_channels_xyz]          # static lane slice (offset 0)

    # ---- xyz trunk: D layers, ReLU, skip connection as split matmuls ----
    h = xyz
    for i in range(D):
        bias = b_trunk_ref[:, i * W:(i + 1) * W]            # (1, W) f32
        if i == 0:
            pre = dotb(xyz, w_xyz_ref[:, 0:W])
        elif i in skips:
            s = skips.index(i)
            w_x = w_xyz_ref[:, (1 + s) * W:(2 + s) * W]      # xyz part
            w_h = w_trunk_ref[:, (i - 1) * W:i * W]          # h part
            pre = dotb(xyz, w_x) + dotb(h, w_h)
        else:
            w_h = w_trunk_ref[:, (i - 1) * W:i * W]
            pre = dotb(h, w_h)
        h = jnp.maximum(pre + bias, 0.0)                     # f32 VPU

    # ---- sigma head (N=1): VPU mul + XLU lane-reduce, no MXU pass ----
    sigma = jnp.sum(h * w_sig_ref[...], axis=-1, keepdims=True) + b_sig_ref[...]

    if sigma_only:
        out_ref[...] = sigma.astype(out_ref.dtype)
        return

    # ---- xyz_encoding_final (no ReLU) ----
    w_f = w_trunk_ref[:, (D - 1) * W:D * W]
    b_f = b_trunk_ref[:, D * W:(D + 1) * W]
    xyz_final = dotb(h, w_f) + b_f                           # (tb, W) f32

    # ---- dir encoding: cat([xyz_final, dir]) @ Wd as a split matmul ----
    dirs = x[:, in_channels_xyz:]                            # (tb, in_dir)
    d_enc = jnp.maximum(
        dotb(xyz_final, w_dx_ref[...]) + dotb(dirs, w_dd_ref[...])
        + b_dir_ref[...],
        0.0)                                                 # (tb, W//2)

    # ---- rgb head (N=3, sigmoid): per-channel mul + lane-reduce, no MXU ----
    w_rgb = w_rgb_ref[...]                                   # (3, W//2) f32
    b_rgb = b_rgb_ref[...]                                   # (1, 3)    f32
    for j in range(3):
        logit = (jnp.sum(d_enc * w_rgb[j:j + 1, :], axis=-1, keepdims=True)
                 + b_rgb[:, j:j + 1])
        out_ref[:, j:j + 1] = (1.0 / (1.0 + jnp.exp(-logit))).astype(out_ref.dtype)
    out_ref[:, 3:4] = sigma.astype(out_ref.dtype)


# ----------------------------------------------------------------------------
# Parameters
# ----------------------------------------------------------------------------
def init_nerf_params(key, D=8, W=256, in_channels_xyz=63, in_channels_dir=27,
                     skips=(4,), dtype=jnp.float32):
    """Weights stored as (fan_in, fan_out) == torch weight transposed."""
    def linear(k, fan_in, fan_out):
        kw, kb = jax.random.split(k)
        scale = 1.0 / (fan_in ** 0.5)
        w = jax.random.uniform(kw, (fan_in, fan_out), dtype, -scale, scale)
        b = jax.random.uniform(kb, (fan_out,), dtype, -scale, scale)
        return w, b

    keys = jax.random.split(key, D + 4)
    params = {}
    for i in range(D):
        if i == 0:
            cin = in_channels_xyz
        elif i in skips:
            cin = W + in_channels_xyz
        else:
            cin = W
        params[f"xyz_{i}"] = linear(keys[i], cin, W)
    params["sigma"] = linear(keys[D], W, 1)
    params["final"] = linear(keys[D + 1], W, W)
    params["dir"] = linear(keys[D + 2], W + in_channels_dir, W // 2)
    params["rgb"] = linear(keys[D + 3], W // 2, 3)
    return params


def prepare_params(params, *, D=8, W=256, in_channels_xyz=63, skips=(4,),
                   weight_dtype=jnp.bfloat16):
    """Host-side packing: bf16 matmul-weight slabs + f32 bias/head slabs.

    Slabs are lane-concatenated so the kernel only needs static, W-aligned
    lane slices (no concatenated activation slabs, few BlockSpec operands).
    """
    skips = tuple(sorted(skips))
    xyz_mats, trunk_mats, biases = [], [], []
    for i in range(D):
        w, b = params[f"xyz_{i}"]
        biases.append(jnp.reshape(b, (1, -1)))
        if i == 0:
            xyz_mats.append(w)
        elif i in skips:
            xyz_mats.append(w[:in_channels_xyz])
            trunk_mats.append(w[in_channels_xyz:])
        else:
            trunk_mats.append(w)
    wf, bf_ = params["final"]
    trunk_mats.append(wf)
    biases.append(jnp.reshape(bf_, (1, -1)))

    ws, bs = params["sigma"]
    wd, bd = params["dir"]
    wr, br = params["rgb"]

    f32 = jnp.float32
    return {
        "w_xyz":   jnp.concatenate(xyz_mats, axis=1).astype(weight_dtype),
        "w_trunk": jnp.concatenate(trunk_mats, axis=1).astype(weight_dtype),
        "b_trunk": jnp.concatenate(biases, axis=1).astype(f32),   # (1, (D+1)*W)
        "w_sigma": jnp.reshape(ws, (1, W)).astype(f32),
        "b_sigma": jnp.reshape(bs, (1, 1)).astype(f32),
        "w_dir_x": wd[:W].astype(weight_dtype),
        "w_dir_d": wd[W:].astype(weight_dtype),
        "b_dir":   jnp.reshape(bd, (1, -1)).astype(f32),
        "w_rgb":   jnp.transpose(wr).astype(f32),                 # (3, W//2)
        "b_rgb":   jnp.reshape(br, (1, -1)).astype(f32),
    }


# ----------------------------------------------------------------------------
# Wrapper
# ----------------------------------------------------------------------------
def nerf_forward(params, x, *, D=8, W=256, in_channels_xyz=63,
                 in_channels_dir=27, skips=(4,), sigma_only=False,
                 block_rows=1024, prepared=None):
    """Pallas forward matching NeRF.forward(x, sigma_only)."""
    skips = tuple(sorted(skips))
    x = jnp.asarray(x)
    B, C = x.shape
    if sigma_only:
        assert C == in_channels_xyz
        out_cols = 1
    else:
        assert C == in_channels_xyz + in_channels_dir
        out_cols = 4

    if prepared is None:
        prepared = prepare_params(params, D=D, W=W,
                                  in_channels_xyz=in_channels_xyz, skips=skips)

    if sigma_only:
        names = ("w_xyz", "w_trunk", "b_trunk", "w_sigma", "b_sigma")
    else:
        names = ("w_xyz", "w_trunk", "b_trunk", "w_sigma", "b_sigma",
                 "w_dir_x", "w_dir_d", "b_dir", "w_rgb", "b_rgb")
    flat = [prepared[n] for n in names]

    # Large batch tiles; pad B up to a tile multiple (extra rows sliced off).
    tb = max(8, min(block_rows, pl.cdiv(B, 8) * 8))
    tb = pl.cdiv(tb, 8) * 8
    B_pad = pl.cdiv(B, tb) * tb
    if B_pad != B:
        x = jnp.pad(x, ((0, B_pad - B), (0, 0)))

    kernel = functools.partial(_nerf_kernel, D=D, W=W,
                               in_channels_xyz=in_channels_xyz,
                               skips=skips, sigma_only=sigma_only)

    out = pl.pallas_call(
        kernel,
        out_shape=jax.ShapeDtypeStruct((B_pad, out_cols), x.dtype),
        grid_spec=pltpu.PrefetchScalarGridSpec(
            num_scalar_prefetch=0,
            grid=(B_pad // tb,),
            in_specs=[pl.BlockSpec((tb, C), lambda i: (i, 0))]
                     + [pl.BlockSpec(p.shape, lambda i: (0, 0)) for p in flat],
            out_specs=pl.BlockSpec((tb, out_cols), lambda i: (i, 0)),
        ),
        compiler_params=pltpu.CompilerParams(
            dimension_semantics=("parallel",),
        ),
    )(x, *flat)

    return out[:B]


# ----------------------------------------------------------------------------
# Pure-JAX reference (mirrors the PyTorch forward exactly, f32 HIGHEST)
# ----------------------------------------------------------------------------
def _reference_nerf(params, x, *, D=8, W=256, in_channels_xyz=63,
                    in_channels_dir=27, skips=(4,), sigma_only=False):
    hp = lax.Precision.HIGHEST
    if sigma_only:
        xyz, dirs = x, None
    else:
        xyz = x[:, :in_channels_xyz]
        dirs = x[:, in_channels_xyz:]
    h = xyz
    for i in range(D):
        if i in skips:
            h = jnp.concatenate([xyz, h], axis=-1)
        w, b = params[f"xyz_{i}"]
        h = jax.nn.relu(jnp.dot(h, w, precision=hp) + b)
    ws, bs = params["sigma"]
    sigma = jnp.dot(h, ws, precision=hp) + bs
    if sigma_only:
        return sigma
    wf, bf = params["final"]
    xyz_final = jnp.dot(h, wf, precision=hp) + bf
    wd, bd = params["dir"]
    d_in = jnp.concatenate([xyz_final, dirs], axis=-1)
    d_enc = jax.nn.relu(jnp.dot(d_in, wd, precision=hp) + bd)
    wr, br = params["rgb"]
    rgb = jax.nn.sigmoid(jnp.dot(d_enc, wr, precision=hp) + br)
    return jnp.concatenate([rgb, sigma], axis=-1)


# ----------------------------------------------------------------------------
# Demo / self-test
# ----------------------------------------------------------------------------
if __name__ == "__main__":
    D, W = 8, 256
    in_xyz, in_dir = 63, 27
    skips = (4,)
    B = 200  # small demo batch; block_rows=128 exercises grid + padding

    key = jax.random.PRNGKey(0)
    kp, kx = jax.random.split(key)
    params = init_nerf_params(kp, D=D, W=W, in_channels_xyz=in_xyz,
                              in_channels_dir=in_dir, skips=skips)
    x = jax.random.normal(kx, (B, in_xyz + in_dir), dtype=jnp.float32)

    prepared = prepare_params(params, D=D, W=W, in_channels_xyz=in_xyz,
                              skips=skips)

    # Full forward (rgb + sigma).
    out = nerf_forward(params, x, D=D, W=W, in_channels_xyz=in_xyz,
                       in_channels_dir=in_dir, skips=skips,
                       block_rows=128, prepared=prepared)
    out = jax.block_until_ready(out)
    ref = _reference_nerf(params, x, D=D, W=W, in_channels_xyz=in_xyz,
                          in_channels_dir=in_dir, skips=skips)
    assert out.shape == (B, 4), out.shape
    # bf16 MXU operands vs f32-HIGHEST reference -> relaxed tolerance.
    assert jnp.allclose(out, ref, atol=5e-2, rtol=5e-2), \
        float(jnp.max(jnp.abs(out - ref)))

    # sigma_only path (separate, trimmed kernel variant).
    sig = nerf_forward(params, x[:, :in_xyz], D=D, W=W,
                       in_channels_xyz=in_xyz, in_channels_dir=in_dir,
                       skips=skips, sigma_only=True, block_rows=128,
                       prepared=prepared)
    sig = jax.block_until_ready(sig)
    sig_ref = _reference_nerf(params, x[:, :in_xyz], D=D, W=W,
                              in_channels_xyz=in_xyz, in_channels_dir=in_dir,
                              skips=skips, sigma_only=True)
    assert sig.shape == (B, 1), sig.shape
    assert jnp.allclose(sig, sig_ref, atol=5e-2, rtol=5e-2), \
        float(jnp.max(jnp.abs(sig - sig_ref)))

    print("KERNEL_OK")
</pallas_src>

<mosaic_0001>
module attributes {stable_mosaic.version = 11 : i64} {
  func.func @_nerf_kernel(%arg0: i32, %arg1: memref<128x90xf32, #tpu.memory_space<vmem>>, %arg2: memref<63x512xbf16, #tpu.memory_space<vmem>>, %arg3: memref<256x2048xbf16, #tpu.memory_space<vmem>>, %arg4: memref<1x2304xf32, #tpu.memory_space<vmem>>, %arg5: memref<1x256xf32, #tpu.memory_space<vmem>>, %arg6: memref<1x1xf32, #tpu.memory_space<vmem>>, %arg7: memref<256x128xbf16, #tpu.memory_space<vmem>>, %arg8: memref<27x128xbf16, #tpu.memory_space<vmem>>, %arg9: memref<1x128xf32, #tpu.memory_space<vmem>>, %arg10: memref<3x128xf32, #tpu.memory_space<vmem>>, %arg11: memref<1x3xf32, #tpu.memory_space<vmem>>, %arg12: memref<128x4xf32, #tpu.memory_space<vmem>>) attributes {dimension_semantics = [#tpu.dimension_semantics<parallel>], iteration_bounds = array<i64: 2>, scalar_prefetch = 0 : i64, scratch_operands = 0 : i64, tpu.core_type = #tpu.core_type<tc>, window_params = [{transform_indices = @transform_0, window_bounds = array<i64: 128, 90>}, {pipeline_mode = #tpu.pipeline_mode<synchronous>, transform_indices = @transform_1, window_bounds = array<i64: 63, 512>}, {pipeline_mode = #tpu.pipeline_mode<synchronous>, transform_indices = @transform_2, window_bounds = array<i64: 256, 2048>}, {pipeline_mode = #tpu.pipeline_mode<synchronous>, transform_indices = @transform_3, window_bounds = array<i64: 1, 2304>}, {pipeline_mode = #tpu.pipeline_mode<synchronous>, transform_indices = @transform_4, window_bounds = array<i64: 1, 256>}, {pipeline_mode = #tpu.pipeline_mode<synchronous>, transform_indices = @transform_5, window_bounds = array<i64: 1, 1>}, {pipeline_mode = #tpu.pipeline_mode<synchronous>, transform_indices = @transform_6, window_bounds = array<i64: 256, 128>}, {pipeline_mode = #tpu.pipeline_mode<synchronous>, transform_indices = @transform_7, window_bounds = array<i64: 27, 128>}, {pipeline_mode = #tpu.pipeline_mode<synchronous>, transform_indices = @transform_8, window_bounds = array<i64: 1, 128>}, {pipeline_mode = #tpu.pipeline_mode<synchronous>, transform_indices = @transform_9, window_bounds = array<i64: 3, 128>}, {pipeline_mode = #tpu.pipeline_mode<synchronous>, transform_indices = @transform_10, window_bounds = array<i64: 1, 3>}, {transform_indices = @transform_11, window_bounds = array<i64: 128, 4>}]} {
    %c0 = arith.constant 0 : index
    %c0_0 = arith.constant 0 : index
    %0 = vector.load %arg1[%c0, %c0_0] : memref<128x90xf32, #tpu.memory_space<vmem>>, vector<128x90xf32>
    %1 = vector.extract_strided_slice %0 {offsets = [0, 0], sizes = [128, 63], strides = [1, 1]} : vector<128x90xf32> to vector<128x63xf32>
    %c0_1 = arith.constant 0 : index
    %c0_2 = arith.constant 0 : index
    %2 = vector.load %arg4[%c0_1, %c0_2] : memref<1x2304xf32, #tpu.memory_space<vmem>>, vector<1x256xf32>
    %c0_3 = arith.constant 0 : index
    %c0_4 = arith.constant 0 : index
    %3 = vector.load %arg2[%c0_3, %c0_4] : memref<63x512xbf16, #tpu.memory_space<vmem>>, vector<63x256xbf16>
    %4 = arith.truncf %1 : vector<128x63xf32> to vector<128x63xbf16>
    %cst = arith.constant dense<0.000000e+00> : vector<128x256xf32>
    %5 = tpu.matmul %4, %3, %cst {dimension_numbers = #tpu.dot_dimension_numbers<[1], [0], [0], [1], [0, 0, 1, 1], [], []>} : vector<128x63xbf16>, vector<63x256xbf16>, vector<128x256xf32> -> vector<128x256xf32>
    %6 = vector.broadcast %2 : vector<1x256xf32> to vector<128x256xf32>
    %7 = arith.addf %5, %6 : vector<128x256xf32>
    %cst_5 = arith.constant 0.000000e+00 : f32
    %8 = vector.broadcast %cst_5 : f32 to vector<128x256xf32>
    %9 = arith.maximumf %7, %8 : vector<128x256xf32>
    %c0_6 = arith.constant 0 : index
    %c256 = arith.constant 256 : index
    %10 = vector.load %arg4[%c0_6, %c256] : memref<1x2304xf32, #tpu.memory_space<vmem>>, vector<1x256xf32>
    %c0_7 = arith.constant 0 : index
    %c0_8 = arith.constant 0 : index
    %11 = vector.load %arg3[%c0_7, %c0_8] : memref<256x2048xbf16, #tpu.memory_space<vmem>>, vector<256x256xbf16>
    %12 = arith.truncf %9 : vector<128x256xf32> to vector<128x256xbf16>
    %cst_9 = arith.constant dense<0.000000e+00> : vector<128x256xf32>
    %13 = tpu.matmul %12, %11, %cst_9 {dimension_numbers = #tpu.dot_dimension_numbers<[1], [0], [0], [1], [0, 0, 1, 1], [], []>} : vector<128x256xbf16>, vector<256x256xbf16>, vector<128x256xf32> -> vector<128x256xf32>
    %14 = vector.broadcast %10 : vector<1x256xf32> to vector<128x256xf32>
    %15 = arith.addf %13, %14 : vector<128x256xf32>
    %cst_10 = arith.constant 0.000000e+00 : f32
    %16 = vector.broadcast %cst_10 : f32 to vector<128x256xf32>
    %17 = arith.maximumf %15, %16 : vector<128x256xf32>
    %c0_11 = arith.constant 0 : index
    %c512 = arith.constant 512 : index
    %18 = vector.load %arg4[%c0_11, %c512] : memref<1x2304xf32, #tpu.memory_space<vmem>>, vector<1x256xf32>
    %c0_12 = arith.constant 0 : index
    %c256_13 = arith.constant 256 : index
    %19 = vector.load %arg3[%c0_12, %c256_13] : memref<256x2048xbf16, #tpu.memory_space<vmem>>, vector<256x256xbf16>
    %20 = arith.truncf %17 : vector<128x256xf32> to vector<128x256xbf16>
    %cst_14 = arith.constant dense<0.000000e+00> : vector<128x256xf32>
    %21 = tpu.matmul %20, %19, %cst_14 {dimension_numbers = #tpu.dot_dimension_numbers<[1], [0], [0], [1], [0, 0, 1, 1], [], []>} : vector<128x256xbf16>, vector<256x256xbf16>, vector<128x256xf32> -> vector<128x256xf32>
    %22 = vector.broadcast %18 : vector<1x256xf32> to vector<128x256xf32>
    %23 = arith.addf %21, %22 : vector<128x256xf32>
    %cst_15 = arith.constant 0.000000e+00 : f32
    %24 = vector.broadcast %cst_15 : f32 to vector<128x256xf32>
    %25 = arith.maximumf %23, %24 : vector<128x256xf32>
    %c0_16 = arith.constant 0 : index
    %c768 = arith.constant 768 : index
    %26 = vector.load %arg4[%c0_16, %c768] : memref<1x2304xf32, #tpu.memory_space<vmem>>, vector<1x256xf32>
    %c0_17 = arith.constant 0 : index
    %c512_18 = arith.constant 512 : index
    %27 = vector.load %arg3[%c0_17, %c512_18] : memref<256x2048xbf16, #tpu.memory_space<vmem>>, vector<256x256xbf16>
    %28 = arith.truncf %25 : vector<128x256xf32> to vector<128x256xbf16>
    %cst_19 = arith.constant dense<0.000000e+00> : vector<128x256xf32>
    %29 = tpu.matmul %28, %27, %cst_19 {dimension_numbers = #tpu.dot_dimension_numbers<[1], [0], [0], [1], [0, 0, 1, 1], [], []>} : vector<128x256xbf16>, vector<256x256xbf16>, vector<128x256xf32> -> vector<128x256xf32>
    %30 = vector.broadcast %26 : vector<1x256xf32> to vector<128x256xf32>
    %31 = arith.addf %29, %30 : vector<128x256xf32>
    %cst_20 = arith.constant 0.000000e+00 : f32
    %32 = vector.broadcast %cst_20 : f32 to vector<128x256xf32>
    %33 = arith.maximumf %31, %32 : vector<128x256xf32>
    %c0_21 = arith.constant 0 : index
    %c1024 = arith.constant 1024 : index
    %34 = vector.load %arg4[%c0_21, %c1024] : memref<1x2304xf32, #tpu.memory_space<vmem>>, vector<1x256xf32>
    %c0_22 = arith.constant 0 : index
    %c256_23 = arith.constant 256 : index
    %35 = vector.load %arg2[%c0_22, %c256_23] : memref<63x512xbf16, #tpu.memory_space<vmem>>, vector<63x256xbf16>
    %c0_24 = arith.constant 0 : index
    %c768_25 = arith.constant 768 : index
    %36 = vector.load %arg3[%c0_24, %c768_25] : memref<256x2048xbf16, #tpu.memory_space<vmem>>, vector<256x256xbf16>
    %37 = arith.truncf %1 : vector<128x63xf32> to vector<128x63xbf16>
    %cst_26 = arith.constant dense<0.000000e+00> : vector<128x256xf32>
    %38 = tpu.matmul %37, %35, %cst_26 {dimension_numbers = #tpu.dot_dimension_numbers<[1], [0], [0], [1], [0, 0, 1, 1], [], []>} : vector<128x63xbf16>, vector<63x256xbf16>, vector<128x256xf32> -> vector<128x256xf32>
    %39 = arith.truncf %33 : vector<128x256xf32> to vector<128x256xbf16>
    %cst_27 = arith.constant dense<0.000000e+00> : vector<128x256xf32>
    %40 = tpu.matmul %39, %36, %cst_27 {dimension_numbers = #tpu.dot_dimension_numbers<[1], [0], [0], [1], [0, 0, 1, 1], [], []>} : vector<128x256xbf16>, vector<256x256xbf16>, vector<128x256xf32> -> vector<128x256xf32>
    %41 = arith.addf %38, %40 : vector<128x256xf32>
    %42 = vector.broadcast %34 : vector<1x256xf32> to vector<128x256xf32>
    %43 = arith.addf %41, %42 : vector<128x256xf32>
    %cst_28 = arith.constant 0.000000e+00 : f32
    %44 = vector.broadcast %cst_28 : f32 to vector<128x256xf32>
    %45 = arith.maximumf %43, %44 : vector<128x256xf32>
    %c0_29 = arith.constant 0 : index
    %c1280 = arith.constant 1280 : index
    %46 = vector.load %arg4[%c0_29, %c1280] : memref<1x2304xf32, #tpu.memory_space<vmem>>, vector<1x256xf32>
    %c0_30 = arith.constant 0 : index
    %c1024_31 = arith.constant 1024 : index
    %47 = vector.load %arg3[%c0_30, %c1024_31] : memref<256x2048xbf16, #tpu.memory_space<vmem>>, vector<256x256xbf16>
    %48 = arith.truncf %45 : vector<128x256xf32> to vector<128x256xbf16>
    %cst_32 = arith.constant dense<0.000000e+00> : vector<128x256xf32>
    %49 = tpu.matmul %48, %47, %cst_32 {dimension_numbers = #tpu.dot_dimension_numbers<[1], [0], [0], [1], [0, 0, 1, 1], [], []>} : vector<128x256xbf16>, vector<256x256xbf16>, vector<128x256xf32> -> vector<128x256xf32>
    %50 = vector.broadcast %46 : vector<1x256xf32> to vector<128x256xf32>
    %51 = arith.addf %49, %50 : vector<128x256xf32>
    %cst_33 = arith.constant 0.000000e+00 : f32
    %52 = vector.broadcast %cst_33 : f32 to vector<128x256xf32>
    %53 = arith.maximumf %51, %52 : vector<128x256xf32>
    %c0_34 = arith.constant 0 : index
    %c1536 = arith.constant 1536 : index
    %54 = vector.load %arg4[%c0_34, %c1536] : memref<1x2304xf32, #tpu.memory_space<vmem>>, vector<1x256xf32>
    %c0_35 = arith.constant 0 : index
    %c1280_36 = arith.constant 1280 : index
    %55 = vector.load %arg3[%c0_35, %c1280_36] : memref<256x2048xbf16, #tpu.memory_space<vmem>>, vector<256x256xbf16>
    %56 = arith.truncf %53 : vector<128x256xf32> to vector<128x256xbf16>
    %cst_37 = arith.constant dense<0.000000e+00> : vector<128x256xf32>
    %57 = tpu.matmul %56, %55, %cst_37 {dimension_numbers = #tpu.dot_dimension_numbers<[1], [0], [0], [1], [0, 0, 1, 1], [], []>} : vector<128x256xbf16>, vector<256x256xbf16>, vector<128x256xf32> -> vector<128x256xf32>
    %58 = vector.broadcast %54 : vector<1x256xf32> to vector<128x256xf32>
    %59 = arith.addf %57, %58 : vector<128x256xf32>
    %cst_38 = arith.constant 0.000000e+00 : f32
    %60 = vector.broadcast %cst_38 : f32 to vector<128x256xf32>
    %61 = arith.maximumf %59, %60 : vector<128x256xf32>
    %c0_39 = arith.constant 0 : index
    %c1792 = arith.constant 1792 : index
    %62 = vector.load %arg4[%c0_39, %c1792] : memref<1x2304xf32, #tpu.memory_space<vmem>>, vector<1x256xf32>
    %c0_40 = arith.constant 0 : index
    %c1536_41 = arith.constant 1536 : index
    %63 = vector.load %arg3[%c0_40, %c1536_41] : memref<256x2048xbf16, #tpu.memory_space<vmem>>, vector<256x256xbf16>
    %64 = arith.truncf %61 : vector<128x256xf32> to vector<128x256xbf16>
    %cst_42 = arith.constant dense<0.000000e+00> : vector<128x256xf32>
    %65 = tpu.matmul %64, %63, %cst_42 {dimension_numbers = #tpu.dot_dimension_numbers<[1], [0], [0], [1], [0, 0, 1, 1], [], []>} : vector<128x256xbf16>, vector<256x256xbf16>, vector<128x256xf32> -> vector<128x256xf32>
    %66 = vector.broadcast %62 : vector<1x256xf32> to vector<128x256xf32>
    %67 = arith.addf %65, %66 : vector<128x256xf32>
    %cst_43 = arith.constant 0.000000e+00 : f32
    %68 = vector.broadcast %cst_43 : f32 to vector<128x256xf32>
    %69 = arith.maximumf %67, %68 : vector<128x256xf32>
    %c0_44 = arith.constant 0 : index
    %c0_45 = arith.constant 0 : index
    %70 = vector.load %arg5[%c0_44, %c0_45] : memref<1x256xf32, #tpu.memory_space<vmem>>, vector<1x256xf32>
    %71 = vector.broadcast %70 : vector<1x256xf32> to vector<128x256xf32>
    %72 = arith.mulf %69, %71 : vector<128x256xf32>
    %cst_46 = arith.constant dense<0.000000e+00> : vector<128xf32>
    %73 = vector.multi_reduction <add>, %72, %cst_46 [1] : vector<128x256xf32> to vector<128xf32>
    %74 = vector.shape_cast %73 : vector<128xf32> to vector<128x1xf32>
    %c0_47 = arith.constant 0 : index
    %c0_48 = arith.constant 0 : index
    %75 = vector.load %arg6[%c0_47, %c0_48] : memref<1x1xf32, #tpu.memory_space<vmem>>, vector<1x1xf32>
    %76 = vector.broadcast %75 : vector<1x1xf32> to vector<128x1xf32>
    %77 = arith.addf %74, %76 : vector<128x1xf32>
    %c0_49 = arith.constant 0 : index
    %c1792_50 = arith.constant 1792 : index
    %78 = vector.load %arg3[%c0_49, %c1792_50] : memref<256x2048xbf16, #tpu.memory_space<vmem>>, vector<256x256xbf16>
    %c0_51 = arith.constant 0 : index
    %c2048 = arith.constant 2048 : index
    %79 = vector.load %arg4[%c0_51, %c2048] : memref<1x2304xf32, #tpu.memory_space<vmem>>, vector<1x256xf32>
    %80 = arith.truncf %69 : vector<128x256xf32> to vector<128x256xbf16>
    %cst_52 = arith.constant dense<0.000000e+00> : vector<128x256xf32>
    %81 = tpu.matmul %80, %78, %cst_52 {dimension_numbers = #tpu.dot_dimension_numbers<[1], [0], [0], [1], [0, 0, 1, 1], [], []>} : vector<128x256xbf16>, vector<256x256xbf16>, vector<128x256xf32> -> vector<128x256xf32>
    %82 = vector.broadcast %79 : vector<1x256xf32> to vector<128x256xf32>
    %83 = arith.addf %81, %82 : vector<128x256xf32>
    %84 = vector.extract_strided_slice %0 {offsets = [0, 63], sizes = [128, 27], strides = [1, 1]} : vector<128x90xf32> to vector<128x27xf32>
    %c0_53 = arith.constant 0 : index
    %c0_54 = arith.constant 0 : index
    %85 = vector.load %arg7[%c0_53, %c0_54] : memref<256x128xbf16, #tpu.memory_space<vmem>>, vector<256x128xbf16>
    %86 = arith.truncf %83 : vector<128x256xf32> to vector<128x256xbf16>
    %cst_55 = arith.constant dense<0.000000e+00> : vector<128x128xf32>
    %87 = tpu.matmul %86, %85, %cst_55 {dimension_numbers = #tpu.dot_dimension_numbers<[1], [0], [0], [1], [0, 0, 1, 1], [], []>} : vector<128x256xbf16>, vector<256x128xbf16>, vector<128x128xf32> -> vector<128x128xf32>
    %c0_56 = arith.constant 0 : index
    %c0_57 = arith.constant 0 : index
    %88 = vector.load %arg8[%c0_56, %c0_57] : memref<27x128xbf16, #tpu.memory_space<vmem>>, vector<27x128xbf16>
    %89 = arith.truncf %84 : vector<128x27xf32> to vector<128x27xbf16>
    %cst_58 = arith.constant dense<0.000000e+00> : vector<128x128xf32>
    %90 = tpu.matmul %89, %88, %cst_58 {dimension_numbers = #tpu.dot_dimension_numbers<[1], [0], [0], [1], [0, 0, 1, 1], [], []>} : vector<128x27xbf16>, vector<27x128xbf16>, vector<128x128xf32> -> vector<128x128xf32>
    %91 = arith.addf %87, %90 : vector<128x128xf32>
    %c0_59 = arith.constant 0 : index
    %c0_60 = arith.constant 0 : index
    %92 = vector.load %arg9[%c0_59, %c0_60] : memref<1x128xf32, #tpu.memory_space<vmem>>, vector<1x128xf32>
    %93 = vector.broadcast %92 : vector<1x128xf32> to vector<128x128xf32>
    %94 = arith.addf %91, %93 : vector<128x128xf32>
    %cst_61 = arith.constant 0.000000e+00 : f32
    %95 = vector.broadcast %cst_61 : f32 to vector<128x128xf32>
    %96 = arith.maximumf %94, %95 : vector<128x128xf32>
    %c0_62 = arith.constant 0 : index
    %c0_63 = arith.constant 0 : index
    %97 = vector.load %arg10[%c0_62, %c0_63] : memref<3x128xf32, #tpu.memory_space<vmem>>, vector<3x128xf32>
    %c0_64 = arith.constant 0 : index
    %c0_65 = arith.constant 0 : index
    %98 = vector.load %arg11[%c0_64, %c0_65] : memref<1x3xf32, #tpu.memory_space<vmem>>, vector<1x3xf32>
    %99 = vector.extract_strided_slice %97 {offsets = [0, 0], sizes = [1, 128], strides = [1, 1]} : vector<3x128xf32> to vector<1x128xf32>
    %100 = vector.broadcast %99 : vector<1x128xf32> to vector<128x128xf32>
    %101 = arith.mulf %96, %100 : vector<128x128xf32>
    %cst_66 = arith.constant dense<0.000000e+00> : vector<128xf32>
    %102 = vector.multi_reduction <add>, %101, %cst_66 [1] : vector<128x128xf32> to vector<128xf32>
    %103 = vector.shape_cast %102 : vector<128xf32> to vector<128x1xf32>
    %104 = vector.extract_strided_slice %98 {offsets = [0, 0], sizes = [1, 1], strides = [1, 1]} : vector<1x3xf32> to vector<1x1xf32>
    %105 = vector.broadcast %104 : vector<1x1xf32> to vector<128x1xf32>
    %106 = arith.addf %103, %105 : vector<128x1xf32>
    %cst_67 = arith.constant 0.000000e+00 : f32
    %107 = vector.broadcast %cst_67 : f32 to vector<128x1xf32>
    %108 = arith.subf %107, %106 : vector<128x1xf32>
    %109 = math.exp %108 : vector<128x1xf32>
    %cst_68 = arith.constant 1.000000e+00 : f32
    %110 = vector.broadcast %cst_68 : f32 to vector<128x1xf32>
    %111 = arith.addf %110, %109 : vector<128x1xf32>
    %cst_69 = arith.constant 1.000000e+00 : f32
    %112 = vector.broadcast %cst_69 : f32 to vector<128x1xf32>
    %113 = arith.divf %112, %111 : vector<128x1xf32>
    %c0_70 = arith.constant 0 : index
    %c0_71 = arith.constant 0 : index
    %114 = vector.load %arg12[%c0_70, %c0_71] : memref<128x4xf32, #tpu.memory_space<vmem>>, vector<128x1xf32>
    tpu.vector_store %arg12[%c0_70, %c0_71], %113 {strides = array<i32>} : memref<128x4xf32, #tpu.memory_space<vmem>>, vector<128x1xf32>,
    %115 = vector.extract_strided_slice %97 {offsets = [1, 0], sizes = [1, 128], strides = [1, 1]} : vector<3x128xf32> to vector<1x128xf32>
    %116 = vector.broadcast %115 : vector<1x128xf32> to vector<128x128xf32>
    %117 = arith.mulf %96, %116 : vector<128x128xf32>
    %cst_72 = arith.constant dense<0.000000e+00> : vector<128xf32>
    %118 = vector.multi_reduction <add>, %117, %cst_72 [1] : vector<128x128xf32> to vector<128xf32>
    %119 = vector.shape_cast %118 : vector<128xf32> to vector<128x1xf32>
    %120 = vector.extract_strided_slice %98 {offsets = [0, 1], sizes = [1, 1], strides = [1, 1]} : vector<1x3xf32> to vector<1x1xf32>
    %121 = vector.broadcast %120 : vector<1x1xf32> to vector<128x1xf32>
    %122 = arith.addf %119, %121 : vector<128x1xf32>
    %cst_73 = arith.constant 0.000000e+00 : f32
    %123 = vector.broadcast %cst_73 : f32 to vector<128x1xf32>
    %124 = arith.subf %123, %122 : vector<128x1xf32>
    %125 = math.exp %124 : vector<128x1xf32>
    %cst_74 = arith.constant 1.000000e+00 : f32
    %126 = vector.broadcast %cst_74 : f32 to vector<128x1xf32>
    %127 = arith.addf %126, %125 : vector<128x1xf32>
    %cst_75 = arith.constant 1.000000e+00 : f32
    %128 = vector.broadcast %cst_75 : f32 to vector<128x1xf32>
    %129 = arith.divf %128, %127 : vector<128x1xf32>
    %c0_76 = arith.constant 0 : index
    %c1 = arith.constant 1 : index
    %130 = vector.load %arg12[%c0_76, %c1] : memref<128x4xf32, #tpu.memory_space<vmem>>, vector<128x1xf32>
    tpu.vector_store %arg12[%c0_76, %c1], %129 {strides = array<i32>} : memref<128x4xf32, #tpu.memory_space<vmem>>, vector<128x1xf32>,
    %131 = vector.extract_strided_slice %97 {offsets = [2, 0], sizes = [1, 128], strides = [1, 1]} : vector<3x128xf32> to vector<1x128xf32>
    %132 = vector.broadcast %131 : vector<1x128xf32> to vector<128x128xf32>
    %133 = arith.mulf %96, %132 : vector<128x128xf32>
    %cst_77 = arith.constant dense<0.000000e+00> : vector<128xf32>
    %134 = vector.multi_reduction <add>, %133, %cst_77 [1] : vector<128x128xf32> to vector<128xf32>
    %135 = vector.shape_cast %134 : vector<128xf32> to vector<128x1xf32>
    %136 = vector.extract_strided_slice %98 {offsets = [0, 2], sizes = [1, 1], strides = [1, 1]} : vector<1x3xf32> to vector<1x1xf32>
    %137 = vector.broadcast %136 : vector<1x1xf32> to vector<128x1xf32>
    %138 = arith.addf %135, %137 : vector<128x1xf32>
    %cst_78 = arith.constant 0.000000e+00 : f32
    %139 = vector.broadcast %cst_78 : f32 to vector<128x1xf32>
    %140 = arith.subf %139, %138 : vector<128x1xf32>
    %141 = math.exp %140 : vector<128x1xf32>
    %cst_79 = arith.constant 1.000000e+00 : f32
    %142 = vector.broadcast %cst_79 : f32 to vector<128x1xf32>
    %143 = arith.addf %142, %141 : vector<128x1xf32>
    %cst_80 = arith.constant 1.000000e+00 : f32
    %144 = vector.broadcast %cst_80 : f32 to vector<128x1xf32>
    %145 = arith.divf %144, %143 : vector<128x1xf32>
    %c0_81 = arith.constant 0 : index
    %c2 = arith.constant 2 : index
    %146 = vector.load %arg12[%c0_81, %c2] : memref<128x4xf32, #tpu.memory_space<vmem>>, vector<128x1xf32>
    tpu.vector_store %arg12[%c0_81, %c2], %145 {strides = array<i32>} : memref<128x4xf32, #tpu.memory_space<vmem>>, vector<128x1xf32>,
    %c0_82 = arith.constant 0 : index
    %c3 = arith.constant 3 : index
    %147 = vector.load %arg12[%c0_82, %c3] : memref<128x4xf32, #tpu.memory_space<vmem>>, vector<128x1xf32>
    tpu.vector_store %arg12[%c0_82, %c3], %77 {strides = array<i32>} : memref<128x4xf32, #tpu.memory_space<vmem>>, vector<128x1xf32>,
    return
  }
  func.func @transform_0(%arg0: i32) -> (i32, i32) {
    %c0_i32 = arith.constant 0 : i32
    %c0_i32_0 = arith.constant 0 : i32
    return %arg0, %c0_i32 : i32, i32
  }
  func.func @transform_1(%arg0: i32) -> (i32, i32) {
    %c0_i32 = arith.constant 0 : i32
    %c0_i32_0 = arith.constant 0 : i32
    %c0_i32_1 = arith.constant 0 : i32
    return %c0_i32, %c0_i32_0 : i32, i32
  }
  func.func @transform_2(%arg0: i32) -> (i32, i32) {
    %c0_i32 = arith.constant 0 : i32
    %c0_i32_0 = arith.constant 0 : i32
    %c0_i32_1 = arith.constant 0 : i32
    return %c0_i32, %c0_i32_0 : i32, i32
  }
  func.func @transform_3(%arg0: i32) -> (i32, i32) {
    %c0_i32 = arith.constant 0 : i32
    %c0_i32_0 = arith.constant 0 : i32
    %c0_i32_1 = arith.constant 0 : i32
    return %c0_i32, %c0_i32_0 : i32, i32
  }
  func.func @transform_4(%arg0: i32) -> (i32, i32) {
    %c0_i32 = arith.constant 0 : i32
    %c0_i32_0 = arith.constant 0 : i32
    %c0_i32_1 = arith.constant 0 : i32
    return %c0_i32, %c0_i32_0 : i32, i32
  }
  func.func @transform_5(%arg0: i32) -> (i32, i32) {
    %c0_i32 = arith.constant 0 : i32
    %c0_i32_0 = arith.constant 0 : i32
    %c0_i32_1 = arith.constant 0 : i32
    return %c0_i32, %c0_i32_0 : i32, i32
  }
  func.func @transform_6(%arg0: i32) -> (i32, i32) {
    %c0_i32 = arith.constant 0 : i32
    %c0_i32_0 = arith.constant 0 : i32
    %c0_i32_1 = arith.constant 0 : i32
    return %c0_i32, %c0_i32_0 : i32, i32
  }
  func.func @transform_7(%arg0: i32) -> (i32, i32) {
    %c0_i32 = arith.constant 0 : i32
    %c0_i32_0 = arith.constant 0 : i32
    %c0_i32_1 = arith.constant 0 : i32
    return %c0_i32, %c0_i32_0 : i32, i32
  }
  func.func @transform_8(%arg0: i32) -> (i32, i32) {
    %c0_i32 = arith.constant 0 : i32
    %c0_i32_0 = arith.constant 0 : i32
    %c0_i32_1 = arith.constant 0 : i32
    return %c0_i32, %c0_i32_0 : i32, i32
  }
  func.func @transform_9(%arg0: i32) -> (i32, i32) {
    %c0_i32 = arith.constant 0 : i32
    %c0_i32_0 = arith.constant 0 : i32
    %c0_i32_1 = arith.constant 0 : i32
    return %c0_i32, %c0_i32_0 : i32, i32
  }
  func.func @transform_10(%arg0: i32) -> (i32, i32) {
    %c0_i32 = arith.constant 0 : i32
    %c0_i32_0 = arith.constant 0 : i32
    %c0_i32_1 = arith.constant 0 : i32
    return %c0_i32, %c0_i32_0 : i32, i32
  }
  func.func @transform_11(%arg0: i32) -> (i32, i32) {
    %c0_i32 = arith.constant 0 : i32
    %c0_i32_0 = arith.constant 0 : i32
    return %arg0, %c0_i32 : i32, i32
  }
}

</mosaic_0001>

<bundles_post_ra>
// kernel: tpu_custom_call.1
= control target key start
LH: loop header
LB: loop body
LE: loop exit
PB: predicated region body
PF: predicated region fallthrough
CT: control target
= control target key end

     0   :  { %s6902_s0 = inlined_call_operand.vmem [shape: f32[256,90], index: 0, kind: input, shape index: {}]   ;;  %s6903_s1 = inlined_call_operand.vmem [shape: bf16[63,512], index: 1, kind: input, shape index: {}]   ;;  %s6904_s2 = inlined_call_operand.hbm [shape: bf16[256,2048], index: 2, kind: input, shape index: {}]   ;;  %s6905_s3 = inlined_call_operand.vmem [shape: f32[1,2304], index: 3, kind: input, shape index: {}]   ;;  %s6906_s4 = inlined_call_operand.vmem [shape: f32[1,256], index: 4, kind: input, shape index: {}]   ;;  %s6907_s5 = inlined_call_operand.<no memory space> [shape: f32[1,1], index: 5, kind: input, shape index: {}]   ;;  %s6908_s6 = inlined_call_operand.vmem [shape: bf16[256,128], index: 6, kind: input, shape index: {}]   ;;  %s6909_s7 = inlined_call_operand.vmem [shape: bf16[27,128], index: 7, kind: input, shape index: {}]   ;;  %s6910_s8 = inlined_call_operand.vmem [shape: f32[1,128], index: 8, kind: input, shape index: {}]   ;;  %s6911_s9 = inlined_call_operand.vmem [shape: f32[3,128], index: 9, kind: input, shape index: {}]   ;;  %s6912_s10 = inlined_call_operand.vmem [shape: f32[1,3], index: 10, kind: input, shape index: {}]   ;;  %s6913_s11 = inlined_call_operand.vmem [shape: f32[256,4], index: 11, kind: output, shape index: {}]  }
   0x1   :  { %v16_v0 = vstv %s6907_s5 }
   0x2   :  { %17 = vst [vmem:[#allocation2] sm:$0x1] %v16_v0 }
   0x3   :  { %18 = vsyncpa [#allocation4], 0  ;;  %s5825_s19 = smov 0  }
   0x4 LB: > { %s5018_s20 = sadd.s32 4294967295, %s5753_s19   ;;  %p5020_p0 = scmp.ge.s32.totalorder %s5753_s19, 1  ;;  %s5753_s19 = sphi %s5825_s19, %s24_s19  }
   0x5   : > { %p291_p1 = scmp.lt.s32.totalorder %s5753_s19, 3  ;;  %s5755_s21 = smov [#allocation3]  }
   0x6   : > { %s306_s22 = sshll.u32 %s5755_s21, 4  ;;  %p5837_p3 = scmp.eq.s32.totalorder %s5018_s20, 0  ;;  %s307_s22 = int_to_ptr.vmem [resolvable:$true] %s306_s22 }
   0x7   : > { %p5833_p2 = pnand %p5020_p0, %p291_p1  ;;  %s5728_s24 = scalar_lea.vmem %s307_s22, 32768 }
   0x8   : > { %p5729_p7 = scmp.ne.s32.totalorder %s307_s22, %s5728_s24  ;;  %p5736_p10 = scmp.lt.s32.totalorder %s307_s22, %s307_s22 }
   0x9   : > { %p5462_p4 = pneg %p5833_p2  ;;  %p5737_p11 = scmp.lt.s32.totalorder %s5728_s24, %s5728_s24 }
   0xb   : > { %p5463_p5 = pnand %p5837_p3, %p5462_p4  ;;  %p5738_p12 = por %p5737_p11, %p5736_p10 }
   0xd   : > { %p5719_p6 = pneg %p5463_p5 }
   0xf   : > { %p5731_p8 = pnand %p5729_p7, %p5719_p6 }
  0x11   : > { %p5732_p9 = pneg %p5731_p8 }
  0x13   : > { %p5739_p13 = pnand %p5738_p12, %p5732_p9 }
  0x15   : > { %5742 = shalt.err (!%p5739_p13)
}
  0x16   : > { %s5756_s25 = smov 1024   ;;  %s5757_s26 = smov 64  }
  0x17   : > { %5465 = dma.hbm_to_vmem [thread:$0]  (!%p5463_p5), %s6904_s2, 32768, %s307_s22, [#allocation4], %s5756_s25, %s5756_s25, %s5757_s26  }
  0x18   : > { %355 = sbr.rel (%p5833_p2) target bundleno = 2383 (0x94f), region = 64 }
  0x1d   : > { %5748 = dma.done.wait (%p5837_p3), [#allocation4], 32768  }
  0x1e   : > { %5750 = vsyncadd (%p5837_p3), [#allocation4], 4294934528  ;;  %vm515_vm0 = vcmask 1046528   ;;  %v5758_v1 = vmov 0   ;;  %s5025_s29 = sshll.u32 %s5018_s20, 4  ;;  %vm516_vm1 = vcmask 1047552  }
  0x1f   : > { %557 = vmatprep.mubr.bf16.mxu0 %v5758_v1  ;;  %v5759_v2 = vmov 65535   ;;  %p396_p0 = scmp.lt.s32.totalorder %s5025_s29, 31  ;;  %v5483_v5 = vld [vmem:[%s6903_s1 + $0x64] ss:$16 sps:$4 sm:$0xff]   ;;  %v5485_v6 = vld [vmem:[%s6903_s1 + $0x60] ss:$16 sps:$4 sm:$0xff]  }
  0x20   : > { %v517_v3 = vsel %vm515_vm0, 4294967295, %v5759_v2  ;;  %v5486_v8 = vld [vmem:[%s6903_s1 + $0x44] ss:$16 sps:$4 sm:$0xff]   ;;  %v5488_v10 = vld [vmem:[%s6903_s1 + $0x40] ss:$16 sps:$4 sm:$0xff]   ;;  %vm490_vm2 = vcmask 515072  }
  0x21   : > { %v5856_v4 = vsel %vm516_vm1, %v517_v3, 0  ;;  %s6917_s29 = smov (!%p396_p0, %s5025_s29), 31  ;;  %v5489_v11 = vld [vmem:[%s6903_s1 + $0x24] ss:$16 sps:$4 sm:$0xff]   ;;  %v5491_v12 = vld [vmem:[%s6903_s1 + $0x20] ss:$16 sps:$4 sm:$0xff]  }
  0x22   : > { %v523_v7 = vand.u32 %v5483_v5, %v5856_v4  ;;  %v520_v9 = vand.u32 %v5485_v6, %v5856_v4  ;;  %s5026_s22 = sshll.u32 %s6917_s29, 3  ;;  %v5492_v13 = vld [vmem:[%s6903_s1 + $0x4] ss:$16 sps:$4 sm:$0xff]   ;;  %v5494_v18 = vld [vmem:[%s6903_s1] ss:$16 sps:$4 sm:$0xff]   ;;  %s5760_s25 = smov 65  }
  0x23   : > { %s5886_s26 = scalar_lea.vmem %s6902_s0, %s5026_s22  ;;  %v685_v14 = vld [vmem:[#allocation3 + $0x380] sm:$0xff]  ;;  %vm3982_vm3 = vcmask 1044480   ;;  %vm3983_vm4 = vcmask 1045504   ;;  %vm3957_vm5 = vcmask 220160   ;;  %s5761_s16 = smov 3   ;;  %vm4490_vm6 = vcmask 7168  }
  0x24   : > { %533 = vmatprep.subr.bf16.mxu0 %v523_v7  ;;  %v686_v15 = vld [vmem:[#allocation3 + $0x3c0] sm:$0xff]  ;;  %v410_v31 = vld [vmem:[%s5886_s26 + $0x10] sm:$0xff]  ;;  %v411_v32 = vld [vmem:[%s5886_s26 + $0x18] sm:$0xff]  ;;  %s6733_s28 = scalar_lea.vmem %s6913_s11, %s5026_s22  ;;  %vm4671_vm7 = vcmask 15368   ;;  %vm4852_vm8 = vcmask 23568   ;;  %vm4933_vm9 = vcmask 31768  }
  0x25   : > { %534 = vmatpush1.bf16.msra.mxu0 %v520_v9  ;;  %v683_v16 = vld [vmem:[#allocation3 + $0x300] sm:$0xff]  ;;  %v5060_v20 = vcombine.high %v685_v14, %v686_v15  ;;  %v5059_v21 = vcombine.low %v685_v14, %v686_v15  ;;  %v5903_v40 = vpack.c.bf16 %v411_v32, %v410_v31  ;;  %v414_v54 = vld [vmem:[%s5886_s26 + $0x30] sm:$0xff]  ;;  %v415_v56 = vld [vmem:[%s5886_s26 + $0x38] sm:$0xff] }
  0x26   : > { %535 = vmatprep.subr.bf16.mxu0 %v5486_v8  ;;  %v684_v17 = vld [vmem:[#allocation3 + $0x340] sm:$0xff]  ;;  %v5917_v60 = vpack.c.bf16 %v415_v56, %v414_v54  ;;  %v418_v15 = vld [vmem:[%s5886_s26 + $0x50] sm:$0xff] }
  0x27   : > { %v408_v19 = vld [vmem:[%s5886_s26] sm:$0xff]  ;;  %v5058_v22 = vcombine.high %v683_v16, %v684_v17  ;;  %v409_v23 = vld [vmem:[%s5886_s26 + $0x8] sm:$0xff]  ;;  %890 = vmatprep.subr.bf16.mxu1 %v5060_v20  ;;  %v5057_v26 = vcombine.low %v683_v16, %v684_v17  ;;  %v419_v17 = vld [vmem:[%s5886_s26 + $0x58] sm:$0xff] }
  0x28   : > { %v681_v24 = vld [vmem:[#allocation3 + $0x280] sm:$0xff]  ;;  %891 = vmatpush1.bf16.msra.mxu1 %v5059_v21  ;;  %v5896_v27 = vpack.c.bf16 %v409_v23, %v408_v19  ;;  %v5931_v21 = vpack.c.bf16 %v419_v17, %v418_v15  ;;  %v1044_v56 = vld [vmem:[#allocation3 + $0x208] sm:$0xff] }
  0x29   : > { %536 = vmatpush1.bf16.msra.mxu0 %v5488_v10  ;;  %v682_v25 = vld [vmem:[#allocation3 + $0x2c0] sm:$0xff]  ;;  %892 = vmatprep.subr.bf16.mxu1 %v5058_v22  ;;  %v1066_v17 = vld [vmem:[#allocation3 + $0x788] sm:$0xff] }
  0x2a   : > { %537 = vmatprep.subr.bf16.mxu0 %v5489_v11  ;;  %v5056_v28 = vcombine.high %v681_v24, %v682_v25  ;;  %v679_v29 = vld [vmem:[#allocation3 + $0x200] sm:$0xff]  ;;  %v5055_v33 = vcombine.low %v681_v24, %v682_v25  ;;  %3930 = vrot.lane.b32.xlu0 %v5896_v27, %s5760_s25 }
  0x2b   : > { %v680_v30 = vld [vmem:[#allocation3 + $0x240] sm:$0xff] }
  0x2c   : > { %893 = vmatpush1.bf16.msra.mxu1 %v5057_v26  ;;  %v677_v34 = vld [vmem:[#allocation3 + $0x180] sm:$0xff]  ;;  %v5054_v36 = vcombine.high %v679_v29, %v680_v30  ;;  %v5053_v37 = vcombine.low %v679_v29, %v680_v30  ;;  %v423_v29 = vld [vmem:[%s5886_s26 + $0x78] sm:$0xff] }
  0x2d   : > { %538 = vmatpush1.bf16.msra.mxu0 %v5491_v12  ;;  %v678_v35 = vld [vmem:[#allocation3 + $0x1c0] sm:$0xff]  ;;  %894 = vmatprep.subr.bf16.mxu1 %v5056_v28  ;;  %v422_v28 = vld [vmem:[%s5886_s26 + $0x70] sm:$0xff] }
  0x2e   : > { %539 = vmatprep.subr.bf16.mxu0 %v5492_v13  ;;  %v675_v38 = vld [vmem:[#allocation3 + $0x100] sm:$0xff]  ;;  %v5052_v41 = vcombine.high %v677_v34, %v678_v35  ;;  %v5051_v44 = vcombine.low %v677_v34, %v678_v35  ;;  %v5945_v30 = vpack.c.bf16 %v423_v29, %v422_v28  ;;  %v1062_v28 = vld [vmem:[#allocation3 + $0x688] sm:$0xff]  ;;  %3932 = vrot.lane.b32.xlu0 %v5903_v40, %s5760_s25 }
  0x2f   : > { %v676_v39 = vld [vmem:[#allocation3 + $0x140] sm:$0xff]  ;;  %v1063_v29 = vld [vmem:[#allocation3 + $0x6c8] sm:$0xff] }
  0x30   : > { %895 = vmatpush1.bf16.msra.mxu1 %v5055_v33  ;;  %v412_v42 = vld [vmem:[%s5886_s26 + $0x20] sm:$0xff]  ;;  %v413_v43 = vld [vmem:[%s5886_s26 + $0x28] sm:$0xff]  ;;  %v5050_v47 = vcombine.high %v675_v38, %v676_v39  ;;  %v5049_v48 = vcombine.low %v675_v38, %v676_v39 }
  0x31   : > { %540 = vmatpush1.bf16.msra.mxu0 %v5494_v18  ;;  %896 = vmatprep.subr.bf16.mxu1 %v5054_v36  ;;  %v673_v45 = vld [vmem:[#allocation3 + $0x80] sm:$0xff]  ;;  %v5910_v51 = vpack.c.bf16 %v413_v43, %v412_v42 }
  0x32   : > { %v674_v46 = vld [vmem:[#allocation3 + $0xc0] sm:$0xff] }
  0x33   : > { %v671_v49 = vld [vmem:[#allocation3] sm:$0xff]  ;;  %v5048_v52 = vcombine.high %v673_v45, %v674_v46  ;;  %v5047_v53 = vcombine.low %v673_v45, %v674_v46  ;;  %v1051_v45 = vld [vmem:[#allocation3 + $0x3c8] sm:$0xff]  ;;  %3934 = vrot.lane.b32.xlu1 %v5910_v51, %s5760_s25 }
  0x34   : > { %5037 = vmatmul.mubr.msk.bf16.vlgmr.msra.gmra.mxu0 %vm490_vm2, %v5896_v27  ;;  %897 = vmatpush1.bf16.msra.mxu1 %v5053_v37  ;;  %v672_v50 = vld [vmem:[#allocation3 + $0x40] sm:$0xff]  ;;  %v1048_v46 = vld [vmem:[#allocation3 + $0x308] sm:$0xff] }
  0x35   : > { %567 = vmatprep.mubr.bf16.mxu0 %v5758_v1  ;;  %898 = vmatprep.subr.bf16.mxu1 %v5052_v41  ;;  %v5046_v55 = vcombine.high %v671_v49, %v672_v50  ;;  %v701_v57 = vld [vmem:[#allocation3 + $0x780] sm:$0xff]  ;;  %v5045_v59 = vcombine.low %v671_v49, %v672_v50  ;;  %v1049_v49 = vld [vmem:[#allocation3 + $0x348] sm:$0xff] }
  0x36   : > { %v702_v58 = vld [vmem:[#allocation3 + $0x7c0] sm:$0xff]  ;;  %v5090_v50 = vcombine.high %v1048_v46, %v1049_v49  ;;  %v5089_v54 = vcombine.low %v1048_v46, %v1049_v49 }
  0x37   : > { %v5076_v61 = vcombine.high %v701_v57, %v702_v58  ;;  %v699_v62 = vld [vmem:[#allocation3 + $0x700] sm:$0xff]  ;;  %v5075_v0 = vcombine.low %v701_v57, %v702_v58  ;;  %v1045_v57 = vld [vmem:[#allocation3 + $0x248] sm:$0xff]  ;;  %3936 = vrot.lane.b32.xlu1 %v5917_v60, %s5760_s25 }
  0x38   : > { %899 = vmatpush1.bf16.msra.mxu1 %v5051_v44  ;;  %v700_v63 = vld [vmem:[#allocation3 + $0x740] sm:$0xff]  ;;  %v1050_v44 = vld [vmem:[#allocation3 + $0x388] sm:$0xff] }
  0x39   : > { %900 = vmatprep.subr.bf16.mxu1 %v5050_v47  ;;  %v416_v3 = vld [vmem:[%s5886_s26 + $0x40] sm:$0xff]  ;;  %v5074_v5 = vcombine.high %v699_v62, %v700_v63  ;;  %v417_v6 = vld [vmem:[%s5886_s26 + $0x48] sm:$0xff]  ;;  %v5073_v9 = vcombine.low %v699_v62, %v700_v63  ;;  %v5091_v47 = vcombine.low %v1050_v44, %v1051_v45  ;;  %v5085_v63 = vcombine.low %v1044_v56, %v1045_v57 }
  0x3a   : > { %v697_v7 = vld [vmem:[#allocation3 + $0x680] sm:$0xff]  ;;  %v5924_v10 = vpack.c.bf16 %v417_v6, %v416_v3  ;;  %v1043_v62 = vld [vmem:[#allocation3 + $0x1c8] sm:$0xff] }
  0x3b   : > { %v698_v8 = vld [vmem:[#allocation3 + $0x6c0] sm:$0xff]  ;;  %v1040_v3 = vld [vmem:[#allocation3 + $0x108] sm:$0xff]  ;;  %3940 = vrot.lane.b32.xlu1 %v5931_v21, %s5760_s25 }
  0x3c   : > { %5038 = vmatmul.mubr.msk.bf16.gmra.mxu0 %vm490_vm2, %v5903_v40  ;;  %901 = vmatpush1.bf16.msra.mxu1 %v5049_v48  ;;  %v5072_v11 = vcombine.high %v697_v7, %v698_v8  ;;  %v695_v12 = vld [vmem:[#allocation3 + $0x600] sm:$0xff]  ;;  %v5071_v14 = vcombine.low %v697_v7, %v698_v8  ;;  %v5092_v48 = vcombine.high %v1050_v44, %v1051_v45  ;;  %v1038_v8 = vld [vmem:[#allocation3 + $0x88] sm:$0xff] }
  0x3d   : > { %577 = vmatprep.mubr.bf16.mxu0 %v5758_v1  ;;  %902 = vmatprep.subr.bf16.mxu1 %v5048_v52  ;;  %v696_v13 = vld [vmem:[#allocation3 + $0x640] sm:$0xff]  ;;  %v1046_v52 = vld [vmem:[#allocation3 + $0x288] sm:$0xff] }
  0x3e   : > { %v5070_v16 = vcombine.high %v695_v12, %v696_v13  ;;  %v693_v18 = vld [vmem:[#allocation3 + $0x580] sm:$0xff]  ;;  %v5069_v20 = vcombine.low %v695_v12, %v696_v13  ;;  %1255 = vmatprep.subr.bf16.mxu0 %v5092_v48  ;;  %v1036_v13 = vld [vmem:[#allocation3 + $0x8] sm:$0xff]  ;;  %3938 = vrot.lane.b32.xlu0 %v5924_v10, %s5760_s25 }
  0x3f   : > { %v694_v19 = vld [vmem:[#allocation3 + $0x5c0] sm:$0xff]  ;;  %1256 = vmatpush1.bf16.msra.mxu0 %v5091_v47  ;;  %3944 = vrot.lane.b32.xlu1 %v5945_v30, %s5760_s25 }
  0x40   : > { %903 = vmatpush1.bf16.msra.mxu1 %v5047_v53  ;;  %v5068_v22 = vcombine.high %v693_v18, %v694_v19  ;;  %v5067_v23 = vcombine.low %v693_v18, %v694_v19  ;;  %v420_v24 = vld [vmem:[%s5886_s26 + $0x60] sm:$0xff]  ;;  %v421_v25 = vld [vmem:[%s5886_s26 + $0x68] sm:$0xff]  ;;  %1257 = vmatprep.subr.bf16.mxu0 %v5090_v50 }
  0x41   : > { %904 = vmatprep.subr.bf16.mxu1 %v5046_v55  ;;  %v5938_v26 = vpack.c.bf16 %v421_v25, %v420_v24  ;;  %v691_v31 = vld [vmem:[#allocation3 + $0x500] sm:$0xff]  ;;  %v1047_v53 = vld [vmem:[#allocation3 + $0x2c8] sm:$0xff] }
  0x42   : > { %v692_v32 = vld [vmem:[#allocation3 + $0x540] sm:$0xff]  ;;  %v5088_v55 = vcombine.high %v1046_v52, %v1047_v53  ;;  %v5087_v58 = vcombine.low %v1046_v52, %v1047_v53  ;;  %v1067_v18 = vld [vmem:[#allocation3 + $0x7c8] sm:$0xff] }
  0x43   : > { %v5066_v33 = vcombine.high %v691_v31, %v692_v32  ;;  %v5065_v34 = vcombine.low %v691_v31, %v692_v32  ;;  %v689_v35 = vld [vmem:[#allocation3 + $0x480] sm:$0xff]  ;;  %1258 = vmatpush1.bf16.msra.mxu0 %v5089_v54  ;;  %v5107_v24 = vcombine.low %v1066_v17, %v1067_v18  ;;  %v5104_v32 = vcombine.high %v1062_v28, %v1063_v29 }
  0x44   : > { %5039 = vmatmul.mubr.msk.bf16.gmra.mxu0 %vm490_vm2, %v5910_v51  ;;  %905 = vmatpush1.bf16.msra.mxu1 %v5045_v59  ;;  %v690_v36 = vld [vmem:[#allocation3 + $0x4c0] sm:$0xff]  ;;  %v5086_v59 = vcombine.high %v1044_v56, %v1045_v57 }
  0x45   : > { %587 = vmatprep.mubr.bf16.mxu0 %v5758_v1  ;;  %906 = vmatprep.subr.bf16.mxu1 %v5076_v61  ;;  %v5064_v37 = vcombine.high %v689_v35, %v690_v36  ;;  %v5063_v38 = vcombine.low %v689_v35, %v690_v36  ;;  %v687_v39 = vld [vmem:[#allocation3 + $0x400] sm:$0xff]  ;;  %v1042_v61 = vld [vmem:[#allocation3 + $0x188] sm:$0xff]  ;;  %v5103_v35 = vcombine.low %v1062_v28, %v1063_v29 }
  0x46   : > { %v688_v41 = vld [vmem:[#allocation3 + $0x440] sm:$0xff]  ;;  %1259 = vmatprep.subr.bf16.mxu0 %v5088_v55  ;;  %v5083_v6 = vcombine.low %v1042_v61, %v1043_v62  ;;  %3942 = vrot.lane.b32.xlu0 %v5938_v26, %s5760_s25 }
  0x47   : > { %v5062_v42 = vcombine.high %v687_v39, %v688_v41  ;;  %v5061_v43 = vcombine.low %v687_v39, %v688_v41  ;;  %1260 = vmatpush1.bf16.msra.mxu0 %v5087_v58  ;;  %v424_v47 = vld [vmem:[%s6905_s3] sm:$0x3] }
  0x48   : > { %907 = vmatpush2.bf16.msra.mxu1 %v5075_v0  ;;  %1261 = vmatprep.subr.bf16.mxu0 %v5086_v59  ;;  %v5084_v0 = vcombine.high %v1042_v61, %v1043_v62 }
  0x49   : > { %908 = vmatprep.subr.bf16.mxu1 %v5074_v5  ;;  %v1041_v5 = vld [vmem:[#allocation3 + $0x148] sm:$0xff] }
  0x4a   : > { %v5082_v7 = vcombine.high %v1040_v3, %v1041_v5 }
  0x4b   : > { %1262 = vmatpush1.bf16.msra.mxu0 %v5085_v63 }
  0x4c   : > { %5040 = vmatmul.mubr.msk.bf16.gmra.mxu0 %vm490_vm2, %v5917_v60  ;;  %909 = vmatpush2.bf16.msra.mxu1 %v5073_v9  ;;  %v1039_v9 = vld [vmem:[#allocation3 + $0xc8] sm:$0xff] }
  0x4d   : > { %597 = vmatprep.mubr.bf16.mxu0 %v5758_v1  ;;  %910 = vmatprep.subr.bf16.mxu1 %v5072_v11  ;;  %v5081_v11 = vcombine.low %v1040_v3, %v1041_v5  ;;  %v5080_v12 = vcombine.high %v1038_v8, %v1039_v9  ;;  %v5079_v15 = vcombine.low %v1038_v8, %v1039_v9 }
  0x4e   : > { %1263 = vmatprep.subr.bf16.mxu0 %v5084_v0 }
  0x4f   : > { %1264 = vmatpush1.bf16.msra.mxu0 %v5083_v6 }
  0x50   : > { %911 = vmatpush2.bf16.msra.mxu1 %v5071_v14  ;;  %1265 = vmatprep.subr.bf16.mxu0 %v5082_v7  ;;  %v1037_v14 = vld [vmem:[#allocation3 + $0x48] sm:$0xff] }
  0x51   : > { %912 = vmatprep.subr.bf16.mxu1 %v5070_v16  ;;  %v5078_v16 = vcombine.high %v1036_v13, %v1037_v14  ;;  %v5077_v19 = vcombine.low %v1036_v13, %v1037_v14 }
  0x53   : > { %1266 = vmatpush1.bf16.msra.mxu0 %v5081_v11 }
  0x54   : > { %5041 = vmatmul.mubr.msk.bf16.gmra.mxu0 %vm490_vm2, %v5924_v10  ;;  %913 = vmatpush2.bf16.msra.mxu1 %v5069_v20  ;;  %v5108_v20 = vcombine.high %v1066_v17, %v1067_v18 }
  0x55   : > { %607 = vmatprep.mubr.bf16.mxu0 %v5758_v1  ;;  %914 = vmatprep.subr.bf16.mxu1 %v5068_v22  ;;  %v1064_v22 = vld [vmem:[#allocation3 + $0x708] sm:$0xff] }
  0x56   : > { %1267 = vmatprep.subr.bf16.mxu0 %v5080_v12 }
  0x57   : > { %1268 = vmatpush1.bf16.msra.mxu0 %v5079_v15 }
  0x58   : > { %915 = vmatpush2.bf16.msra.mxu1 %v5067_v23  ;;  %1269 = vmatprep.subr.bf16.mxu0 %v5078_v16  ;;  %v1065_v23 = vld [vmem:[#allocation3 + $0x748] sm:$0xff] }
  0x59   : > { %916 = vmatprep.subr.bf16.mxu1 %v5066_v33  ;;  %v5106_v25 = vcombine.high %v1064_v22, %v1065_v23  ;;  %v5105_v31 = vcombine.low %v1064_v22, %v1065_v23  ;;  %v1060_v33 = vld [vmem:[#allocation3 + $0x608] sm:$0xff] }
  0x5b   : > { %1270 = vmatpush1.bf16.msra.mxu0 %v5077_v19 }
  0x5c   : > { %5042 = vmatmul.mubr.msk.bf16.gmra.mxu0 %vm490_vm2, %v5931_v21  ;;  %917 = vmatpush2.bf16.msra.mxu1 %v5065_v34  ;;  %v1061_v34 = vld [vmem:[#allocation3 + $0x648] sm:$0xff] }
  0x5d   : > { %617 = vmatprep.mubr.bf16.mxu0 %v5758_v1  ;;  %918 = vmatprep.subr.bf16.mxu1 %v5064_v37  ;;  %v5102_v36 = vcombine.high %v1060_v33, %v1061_v34  ;;  %v1058_v37 = vld [vmem:[#allocation3 + $0x588] sm:$0xff]  ;;  %v5101_v39 = vcombine.low %v1060_v33, %v1061_v34 }
  0x5e   : > { %1271 = vmatprep.subr.bf16.mxu0 %v5108_v20 }
  0x5f   : > { %1272 = vmatpush2.bf16.msra.mxu0 %v5107_v24 }
  0x60   : > { %919 = vmatpush2.bf16.msra.mxu1 %v5063_v38  ;;  %1273 = vmatprep.subr.bf16.mxu0 %v5106_v25  ;;  %v1059_v38 = vld [vmem:[#allocation3 + $0x5c8] sm:$0xff] }
  0x61   : > { %920 = vmatprep.subr.bf16.mxu1 %v5062_v42  ;;  %v5100_v41 = vcombine.high %v1058_v37, %v1059_v38  ;;  %v442_v42 = vlaneseq }
  0x63   : > { %1274 = vmatpush2.bf16.msra.mxu0 %v5105_v31  ;;  %v5949_v44 = vshrl.u32 %v442_v42, 7 }
  0x64   : > { %5043 = vmatmul.mubr.msk.bf16.gmra.mxu0 %vm490_vm2, %v5938_v26  ;;  %921 = vmatpush2.bf16.msra.mxu1 %v5061_v43  ;;  %v5099_v43 = vcombine.low %v1058_v37, %v1059_v38 }
  0x65   : > { %627 = vmatprep.mubr.bf16.mxu0 %v5758_v1  ;;  %1275 = vmatprep.subr.bf16.mxu0 %v5104_v32  ;;  %v5952_v45 = vsub.s32 1, %v5949_v44  ;;  %v5955_v46 = vsub.s32 0, %v5949_v44 }
  0x67   : > { %1276 = vmatpush2.bf16.msra.mxu0 %v5103_v35  ;;  %v5961_v49 = vrot.slane %v424_v47, %v5952_v45  ;;  %v5964_v50 = vrot.slane %v424_v47, %v5955_v46 }
  0x68   : > { %1277 = vmatprep.subr.bf16.mxu0 %v5102_v36 }
  0x6b   : > { %1278 = vmatpush2.bf16.msra.mxu0 %v5101_v39 }
  0x6c   : > { %5044 = vmatmul.mubr.msk.bf16.gmra.mxu0 %vm490_vm2, %v5945_v30  ;;  %1279 = vmatprep.subr.bf16.mxu0 %v5100_v41 }
  0x6f   : > { %1280 = vmatpush2.bf16.msra.mxu0 %v5099_v43 }
  0xf4   : > { %v559_v48 = vpop.f32.mrf.mxu0 }
  0xf5   : > { %v560_v56 = vadd.f32 %v559_v48, %v5964_v50 }
  0xf6   : > { %v561_v52 = vpop.f32.mrf.mxu0 }
  0xf7   : > { %v562_v54 = vadd.f32 %v561_v52, %v5961_v49  ;;  %v638_v0 = vmax.f32 %v560_v56, 0.0 }
  0xf8   : > { %v563_v53 = vpop.f32.mrf.mxu0 }
  0xf9   : > { %v564_v55 = vadd.f32 %v563_v53, %v5964_v50  ;;  %v639_v62 = vmax.f32 %v562_v54, 0.0 }
  0xfa   : > { %v565_v57 = vpop.f32.mrf.mxu0 }
  0xfb   : > { %v566_v58 = vadd.f32 %v565_v57, %v5961_v49  ;;  %v640_v59 = vmax.f32 %v564_v55, 0.0 }
  0xfc   : > { %v569_v61 = vpop.f32.mrf.mxu0 }
  0xfd   : > { %v641_v63 = vmax.f32 %v566_v58, 0.0  ;;  %v703_v6 = vpack.c.bf16 %v640_v59, %v638_v0  ;;  %v570_v7 = vadd.f32 %v569_v61, %v5964_v50 }
  0xfe   : > { %v571_v3 = vpop.f32.mrf.mxu0 }
  0xff   : > { %v704_v5 = vpack.c.bf16 %v641_v63, %v639_v62  ;;  %v572_v9 = vadd.f32 %v571_v3, %v5961_v49  ;;  %v642_v14 = vmax.f32 %v570_v7, 0.0 }
 0x100   : > { %v573_v8 = vpop.f32.mrf.mxu0 }
 0x101   : > { %v574_v11 = vadd.f32 %v573_v8, %v5964_v50  ;;  %922 = vmatprep.mubr.bf16.mxu1 %v704_v5  ;;  %v643_v17 = vmax.f32 %v572_v9, 0.0 }
 0x102   : > { %v575_v12 = vpop.f32.mrf.mxu0  ;;  %923 = vmatmul.mubr.bf16.vlgmr.msra.gmra.mxu1 %v703_v6 }
 0x103   : > { %v576_v13 = vadd.f32 %v575_v12, %v5961_v49  ;;  %v644_v15 = vmax.f32 %v574_v11, 0.0 }
 0x104   : > { %v579_v16 = vpop.f32.mrf.mxu0 }
 0x105   : > { %v645_v18 = vmax.f32 %v576_v13, 0.0  ;;  %v580_v19 = vadd.f32 %v579_v16, %v5964_v50  ;;  %v705_v24 = vpack.c.bf16 %v644_v15, %v642_v14 }
 0x106   : > { %v581_v20 = vpop.f32.mrf.mxu0 }
 0x107   : > { %v582_v22 = vadd.f32 %v581_v20, %v5961_v49  ;;  %v706_v23 = vpack.c.bf16 %v645_v18, %v643_v17  ;;  %v646_v29 = vmax.f32 %v580_v19, 0.0 }
 0x108   : > { %v583_v25 = vpop.f32.mrf.mxu0 }
 0x109   : > { %v584_v28 = vadd.f32 %v583_v25, %v5964_v50  ;;  %932 = vmatprep.mubr.bf16.mxu1 %v706_v23  ;;  %v647_v32 = vmax.f32 %v582_v22, 0.0 }
 0x10a   : > { %v585_v31 = vpop.f32.mrf.mxu0  ;;  %933 = vmatmul.mubr.bf16.gmra.mxu1 %v705_v24 }
 0x10b   : > { %v648_v33 = vmax.f32 %v584_v28, 0.0  ;;  %v586_v34 = vadd.f32 %v585_v31, %v5961_v49 }
 0x10c   : > { %v589_v35 = vpop.f32.mrf.mxu0 }
 0x10d   : > { %v649_v36 = vmax.f32 %v586_v34, 0.0  ;;  %v707_v37 = vpack.c.bf16 %v648_v33, %v646_v29  ;;  %v590_v38 = vadd.f32 %v589_v35, %v5964_v50 }
 0x10e   : > { %v591_v39 = vpop.f32.mrf.mxu0 }
 0x10f   : > { %v592_v41 = vadd.f32 %v591_v39, %v5961_v49  ;;  %v708_v42 = vpack.c.bf16 %v649_v36, %v647_v32  ;;  %v650_v48 = vmax.f32 %v590_v38, 0.0 }
 0x110   : > { %v593_v43 = vpop.f32.mrf.mxu0 }
 0x111   : > { %v594_v47 = vadd.f32 %v593_v43, %v5964_v50  ;;  %942 = vmatprep.mubr.bf16.mxu1 %v708_v42  ;;  %v651_v53 = vmax.f32 %v592_v41, 0.0 }
 0x112   : > { %v595_v52 = vpop.f32.mrf.mxu0  ;;  %943 = vmatmul.mubr.bf16.gmra.mxu1 %v707_v37 }
 0x113   : > { %v652_v54 = vmax.f32 %v594_v47, 0.0  ;;  %v596_v55 = vadd.f32 %v595_v52, %v5961_v49 }
 0x114   : > { %v599_v56 = vpop.f32.mrf.mxu0 }
 0x115   : > { %v653_v57 = vmax.f32 %v596_v55, 0.0  ;;  %v709_v58 = vpack.c.bf16 %v652_v54, %v650_v48  ;;  %v600_v59 = vadd.f32 %v599_v56, %v5964_v50 }
 0x116   : > { %v601_v61 = vpop.f32.mrf.mxu0 }
 0x117   : > { %v602_v62 = vadd.f32 %v601_v61, %v5961_v49  ;;  %v710_v63 = vpack.c.bf16 %v653_v57, %v651_v53  ;;  %v654_v5 = vmax.f32 %v600_v59, 0.0 }
 0x118   : > { %v603_v0 = vpop.f32.mrf.mxu0 }
 0x119   : > { %v604_v3 = vadd.f32 %v603_v0, %v5964_v50  ;;  %952 = vmatprep.mubr.bf16.mxu1 %v710_v63  ;;  %v655_v7 = vmax.f32 %v602_v62, 0.0 }
 0x11a   : > { %v605_v6 = vpop.f32.mrf.mxu0  ;;  %953 = vmatmul.mubr.bf16.gmra.mxu1 %v709_v58 }
 0x11b   : > { %v656_v8 = vmax.f32 %v604_v3, 0.0  ;;  %v606_v9 = vadd.f32 %v605_v6, %v5961_v49 }
 0x11c   : > { %v609_v11 = vpop.f32.mrf.mxu0 }
 0x11d   : > { %v657_v12 = vmax.f32 %v606_v9, 0.0  ;;  %v711_v13 = vpack.c.bf16 %v656_v8, %v654_v5  ;;  %v610_v14 = vadd.f32 %v609_v11, %v5964_v50  ;;  %v1057_v8 = vld [vmem:[#allocation3 + $0x548] sm:$0xff] }
 0x11e   : > { %v611_v15 = vpop.f32.mrf.mxu0 }
 0x11f   : > { %v612_v16 = vadd.f32 %v611_v15, %v5961_v49  ;;  %v712_v17 = vpack.c.bf16 %v657_v12, %v655_v7  ;;  %v658_v20 = vmax.f32 %v610_v14, 0.0  ;;  %v1056_v7 = vld [vmem:[#allocation3 + $0x508] sm:$0xff] }
 0x120   : > { %v613_v18 = vpop.f32.mrf.mxu0  ;;  %v5098_v9 = vcombine.high %v1056_v7, %v1057_v8  ;;  %v5097_v11 = vcombine.low %v1056_v7, %v1057_v8  ;;  %v1055_v12 = vld [vmem:[#allocation3 + $0x4c8] sm:$0xff]  ;;  %v1427_v8 = vld [vmem:[#allocation3 + $0x690] sm:$0xff] }
 0x121   : > { %v614_v19 = vadd.f32 %v613_v18, %v5964_v50  ;;  %962 = vmatprep.mubr.bf16.mxu1 %v712_v17  ;;  %v659_v23 = vmax.f32 %v612_v16, 0.0  ;;  %v1052_v15 = vld [vmem:[#allocation3 + $0x408] sm:$0xff]  ;;  %v1415_v18 = vld [vmem:[#allocation3 + $0x390] sm:$0xff] }
 0x122   : > { %v615_v22 = vpop.f32.mrf.mxu0  ;;  %963 = vmatmul.mubr.bf16.gmra.mxu1 %v711_v13  ;;  %1281 = vmatprep.subr.bf16.mxu0 %v5098_v9  ;;  %v1053_v16 = vld [vmem:[#allocation3 + $0x448] sm:$0xff]  ;;  %v1428_v9 = vld [vmem:[#allocation3 + $0x6d0] sm:$0xff] }
 0x123   : > { %v660_v24 = vmax.f32 %v614_v19, 0.0  ;;  %v616_v25 = vadd.f32 %v615_v22, %v5961_v49  ;;  %1282 = vmatpush2.bf16.msra.mxu0 %v5097_v11  ;;  %v5093_v17 = vcombine.low %v1052_v15, %v1053_v16  ;;  %v1416_v19 = vld [vmem:[#allocation3 + $0x3d0] sm:$0xff] }
 0x124   : > { %v619_v28 = vpop.f32.mrf.mxu0  ;;  %v5123_v22 = vcombine.low %v1415_v18, %v1416_v19 }
 0x125   : > { %v661_v29 = vmax.f32 %v616_v25, 0.0  ;;  %v713_v31 = vpack.c.bf16 %v660_v24, %v658_v20  ;;  %v620_v32 = vadd.f32 %v619_v28, %v5964_v50  ;;  %v1413_v20 = vld [vmem:[#allocation3 + $0x310] sm:$0xff] }
 0x126   : > { %v621_v33 = vpop.f32.mrf.mxu0  ;;  %v1414_v24 = vld [vmem:[#allocation3 + $0x350] sm:$0xff] }
 0x127   : > { %v622_v34 = vadd.f32 %v621_v33, %v5961_v49  ;;  %v714_v35 = vpack.c.bf16 %v661_v29, %v659_v23  ;;  %v662_v38 = vmax.f32 %v620_v32, 0.0  ;;  %v5124_v23 = vcombine.high %v1415_v18, %v1416_v19  ;;  %v1411_v28 = vld [vmem:[#allocation3 + $0x290] sm:$0xff] }
 0x128   : > { %v623_v36 = vpop.f32.mrf.mxu0  ;;  %v5122_v25 = vcombine.high %v1413_v20, %v1414_v24  ;;  %v1412_v29 = vld [vmem:[#allocation3 + $0x2d0] sm:$0xff] }
 0x129   : > { %v624_v37 = vadd.f32 %v623_v36, %v5964_v50  ;;  %972 = vmatprep.mubr.bf16.mxu1 %v714_v35  ;;  %v663_v41 = vmax.f32 %v622_v34, 0.0  ;;  %1620 = vmatprep.subr.bf16.mxu1 %v5124_v23  ;;  %v5120_v32 = vcombine.high %v1411_v28, %v1412_v29  ;;  %v1409_v33 = vld [vmem:[#allocation3 + $0x210] sm:$0xff]  ;;  %v5119_v35 = vcombine.low %v1411_v28, %v1412_v29 }
 0x12a   : > { %v625_v39 = vpop.f32.mrf.mxu0  ;;  %973 = vmatmul.mubr.bf16.gmra.mxu1 %v713_v31  ;;  %v5121_v31 = vcombine.low %v1413_v20, %v1414_v24  ;;  %v1410_v34 = vld [vmem:[#allocation3 + $0x250] sm:$0xff]  ;;  %v670_v20 = vld [vmem:[%s6905_s3 + $0x2] sm:$0x3] }
 0x12b   : > { %v664_v42 = vmax.f32 %v624_v37, 0.0  ;;  %v626_v43 = vadd.f32 %v625_v39, %v5961_v49  ;;  %1621 = vmatpush1.bf16.msra.mxu1 %v5123_v22  ;;  %v5118_v36 = vcombine.high %v1409_v33, %v1410_v34  ;;  %v1407_v37 = vld [vmem:[#allocation3 + $0x190] sm:$0xff]  ;;  %v5117_v39 = vcombine.low %v1409_v33, %v1410_v34 }
 0x12c   : > { %v629_v47 = vpop.f32.mrf.mxu0  ;;  %1622 = vmatprep.subr.bf16.mxu1 %v5122_v25  ;;  %v6002_v23 = vrot.slane %v670_v20, %v5952_v45  ;;  %v6005_v24 = vrot.slane %v670_v20, %v5955_v46 }
 0x12d   : > { %v665_v48 = vmax.f32 %v626_v43, 0.0  ;;  %v715_v52 = vpack.c.bf16 %v664_v42, %v662_v38  ;;  %v630_v53 = vadd.f32 %v629_v47, %v5964_v50  ;;  %v1408_v38 = vld [vmem:[#allocation3 + $0x1d0] sm:$0xff] }
 0x12e   : > { %v631_v54 = vpop.f32.mrf.mxu0  ;;  %v1405_v42 = vld [vmem:[#allocation3 + $0x110] sm:$0xff]  ;;  %v5115_v47 = vcombine.low %v1407_v37, %v1408_v38 }
 0x12f   : > { %v632_v55 = vadd.f32 %v631_v54, %v5961_v49  ;;  %v716_v56 = vpack.c.bf16 %v665_v48, %v663_v41  ;;  %v666_v59 = vmax.f32 %v630_v53, 0.0  ;;  %1623 = vmatpush1.bf16.msra.mxu1 %v5121_v31  ;;  %v5116_v41 = vcombine.high %v1407_v37, %v1408_v38  ;;  %v1406_v43 = vld [vmem:[#allocation3 + $0x150] sm:$0xff] }
 0x130   : > { %v633_v57 = vpop.f32.mrf.mxu0  ;;  %1624 = vmatprep.subr.bf16.mxu1 %v5120_v32  ;;  %v5114_v48 = vcombine.high %v1405_v42, %v1406_v43  ;;  %v1404_v53 = vld [vmem:[#allocation3 + $0xd0] sm:$0xff]  ;;  %v5113_v54 = vcombine.low %v1405_v42, %v1406_v43 }
 0x131   : > { %v634_v58 = vadd.f32 %v633_v57, %v5964_v50  ;;  %982 = vmatprep.mubr.bf16.mxu1 %v716_v56  ;;  %v667_v62 = vmax.f32 %v632_v55, 0.0  ;;  %v1054_v50 = vld [vmem:[#allocation3 + $0x488] sm:$0xff]  ;;  %v1401_v56 = vld [vmem:[#allocation3 + $0x10] sm:$0xff] }
 0x132   : > { %v635_v61 = vpop.f32.mrf.mxu0  ;;  %983 = vmatmul.mubr.bf16.gmra.mxu1 %v715_v52  ;;  %v5096_v13 = vcombine.high %v1054_v50, %v1055_v12  ;;  %v5095_v14 = vcombine.low %v1054_v50, %v1055_v12  ;;  %v1403_v52 = vld [vmem:[#allocation3 + $0x90] sm:$0xff]  ;;  %v5136_v50 = vcombine.high %v1427_v8, %v1428_v9 }
 0x133   : > { %v668_v63 = vmax.f32 %v634_v58, 0.0  ;;  %v636_v0 = vadd.f32 %v635_v61, %v5961_v49  ;;  %v5094_v49 = vcombine.high %v1052_v15, %v1053_v16  ;;  %1625 = vmatpush1.bf16.msra.mxu1 %v5119_v35  ;;  %v5112_v55 = vcombine.high %v1403_v52, %v1404_v53  ;;  %v1402_v57 = vld [vmem:[#allocation3 + $0x50] sm:$0xff] }
 0x134   : > { %1283 = vmatprep.subr.bf16.mxu0 %v5096_v13  ;;  %1626 = vmatprep.subr.bf16.mxu1 %v5118_v36  ;;  %v5111_v58 = vcombine.low %v1403_v52, %v1404_v53  ;;  %v1431_v61 = vld [vmem:[#allocation3 + $0x790] sm:$0xff] }
 0x135   : > { %v669_v3 = vmax.f32 %v636_v0, 0.0  ;;  %v717_v5 = vpack.c.bf16 %v668_v63, %v666_v59  ;;  %1284 = vmatpush2.bf16.msra.mxu0 %v5095_v14  ;;  %v5110_v59 = vcombine.high %v1401_v56, %v1402_v57  ;;  %v5109_v63 = vcombine.low %v1401_v56, %v1402_v57  ;;  %v1425_v12 = vld [vmem:[#allocation3 + $0x610] sm:$0xff] }
 0x136   : > { %1285 = vmatprep.subr.bf16.mxu0 %v5094_v49  ;;  %v1426_v13 = vld [vmem:[#allocation3 + $0x650] sm:$0xff]  ;;  %v5135_v14 = vcombine.low %v1427_v8, %v1428_v9 }
 0x137   : > { %v718_v6 = vpack.c.bf16 %v669_v3, %v667_v62  ;;  %1627 = vmatpush1.bf16.msra.mxu1 %v5117_v39  ;;  %v1432_v62 = vld [vmem:[#allocation3 + $0x7d0] sm:$0xff]  ;;  %v5134_v15 = vcombine.high %v1425_v12, %v1426_v13 }
 0x138   : > { %1628 = vmatprep.subr.bf16.mxu1 %v5116_v41  ;;  %v5140_v0 = vcombine.high %v1431_v61, %v1432_v62  ;;  %v1429_v3 = vld [vmem:[#allocation3 + $0x710] sm:$0xff] }
 0x139   : > { %992 = vmatprep.mubr.bf16.mxu1 %v718_v6  ;;  %1286 = vmatpush2.bf16.msra.mxu0 %v5093_v17  ;;  %v5139_v6 = vcombine.low %v1431_v61, %v1432_v62  ;;  %v1423_v16 = vld [vmem:[#allocation3 + $0x590] sm:$0xff]  ;;  %v5133_v17 = vcombine.low %v1425_v12, %v1426_v13 }
 0x13a   : > { %993 = vmatmul.mubr.bf16.gmra.mxu1 %v717_v5  ;;  %v1430_v5 = vld [vmem:[#allocation3 + $0x750] sm:$0xff] }
 0x13b   : > { %1629 = vmatpush1.bf16.msra.mxu1 %v5115_v47  ;;  %v5138_v7 = vcombine.high %v1429_v3, %v1430_v5  ;;  %v5137_v11 = vcombine.low %v1429_v3, %v1430_v5  ;;  %v1424_v49 = vld [vmem:[#allocation3 + $0x5d0] sm:$0xff] }
 0x13c   : > { %1630 = vmatprep.subr.bf16.mxu1 %v5114_v48  ;;  %v5132_v18 = vcombine.high %v1423_v16, %v1424_v49  ;;  %v5131_v19 = vcombine.low %v1423_v16, %v1424_v49 }
 0x13f   : > { %1631 = vmatpush1.bf16.msra.mxu1 %v5113_v54 }
 0x140   : > { %1632 = vmatprep.subr.bf16.mxu1 %v5112_v55 }
 0x143   : > { %1633 = vmatpush1.bf16.msra.mxu1 %v5111_v58 }
 0x144   : > { %1634 = vmatprep.subr.bf16.mxu1 %v5110_v59 }
 0x147   : > { %1635 = vmatpush1.bf16.msra.mxu1 %v5109_v63 }
 0x148   : > { %1636 = vmatprep.subr.bf16.mxu1 %v5140_v0 }
 0x14b   : > { %1637 = vmatpush2.bf16.msra.mxu1 %v5139_v6 }
 0x14c   : > { %1638 = vmatprep.subr.bf16.mxu1 %v5138_v7 }
 0x14f   : > { %1639 = vmatpush2.bf16.msra.mxu1 %v5137_v11 }
 0x150   : > { %1640 = vmatprep.subr.bf16.mxu1 %v5136_v50 }
 0x153   : > { %1641 = vmatpush2.bf16.msra.mxu1 %v5135_v14 }
 0x154   : > { %1642 = vmatprep.subr.bf16.mxu1 %v5134_v15 }
 0x157   : > { %1643 = vmatpush2.bf16.msra.mxu1 %v5133_v17 }
 0x158   : > { %1644 = vmatprep.subr.bf16.mxu1 %v5132_v18 }
 0x15b   : > { %1645 = vmatpush2.bf16.msra.mxu1 %v5131_v19 }
 0x1c2   : > { %v924_v22 = vpop.f32.mrf.mxu1 }
 0x1c3   : > { %v925_v32 = vadd.f32 %v924_v22, %v6005_v24 }
 0x1c4   : > { %v926_v25 = vpop.f32.mrf.mxu1 }
 0x1c5   : > { %v927_v29 = vadd.f32 %v926_v25, %v6002_v23  ;;  %v1003_v39 = vmax.f32 %v925_v32, 0.0 }
 0x1c6   : > { %v928_v28 = vpop.f32.mrf.mxu1 }
 0x1c7   : > { %v929_v31 = vadd.f32 %v928_v28, %v6005_v24  ;;  %v1004_v37 = vmax.f32 %v927_v29, 0.0 }
 0x1c8   : > { %v930_v33 = vpop.f32.mrf.mxu1 }
 0x1c9   : > { %v931_v34 = vadd.f32 %v930_v33, %v6002_v23  ;;  %v1005_v35 = vmax.f32 %v929_v31, 0.0 }
 0x1ca   : > { %v934_v36 = vpop.f32.mrf.mxu1 }
 0x1cb   : > { %v1006_v38 = vmax.f32 %v931_v34, 0.0  ;;  %v1068_v43 = vpack.c.bf16 %v1005_v35, %v1003_v39  ;;  %v935_v53 = vadd.f32 %v934_v36, %v6005_v24 }
 0x1cc   : > { %v936_v41 = vpop.f32.mrf.mxu1 }
 0x1cd   : > { %v1069_v42 = vpack.c.bf16 %v1006_v38, %v1004_v37  ;;  %v937_v48 = vadd.f32 %v936_v41, %v6002_v23  ;;  %v1007_v61 = vmax.f32 %v935_v53, 0.0 }
 0x1ce   : > { %v938_v47 = vpop.f32.mrf.mxu1 }
 0x1cf   : > { %v939_v52 = vadd.f32 %v938_v47, %v6005_v24  ;;  %1287 = vmatprep.mubr.bf16.mxu0 %v1069_v42  ;;  %v1008_v58 = vmax.f32 %v937_v48, 0.0 }
 0x1d0   : > { %v940_v54 = vpop.f32.mrf.mxu1  ;;  %1288 = vmatmul.mubr.bf16.vlgmr.msra.gmra.mxu0 %v1068_v43 }
 0x1d1   : > { %v941_v55 = vadd.f32 %v940_v54, %v6002_v23  ;;  %v1009_v56 = vmax.f32 %v939_v52, 0.0 }
 0x1d2   : > { %v944_v57 = vpop.f32.mrf.mxu1 }
 0x1d3   : > { %v1010_v59 = vmax.f32 %v941_v55, 0.0  ;;  %v1070_v0 = vpack.c.bf16 %v1009_v56, %v1007_v61  ;;  %v945_v7 = vadd.f32 %v944_v57, %v6005_v24 }
 0x1d4   : > { %v946_v62 = vpop.f32.mrf.mxu1 }
 0x1d5   : > { %v1071_v63 = vpack.c.bf16 %v1010_v59, %v1008_v58  ;;  %v947_v5 = vadd.f32 %v946_v62, %v6002_v23  ;;  %v1011_v14 = vmax.f32 %v945_v7, 0.0 }
 0x1d6   : > { %v948_v3 = vpop.f32.mrf.mxu1 }
 0x1d7   : > { %v949_v6 = vadd.f32 %v948_v3, %v6005_v24  ;;  %1297 = vmatprep.mubr.bf16.mxu0 %v1071_v63  ;;  %v1012_v12 = vmax.f32 %v947_v5, 0.0 }
 0x1d8   : > { %v950_v8 = vpop.f32.mrf.mxu1  ;;  %1298 = vmatmul.mubr.bf16.gmra.mxu0 %v1070_v0 }
 0x1d9   : > { %v951_v9 = vadd.f32 %v950_v8, %v6002_v23  ;;  %v1013_v11 = vmax.f32 %v949_v6, 0.0 }
 0x1da   : > { %v954_v50 = vpop.f32.mrf.mxu1 }
 0x1db   : > { %v1014_v13 = vmax.f32 %v951_v9, 0.0  ;;  %v1072_v17 = vpack.c.bf16 %v1013_v11, %v1011_v14  ;;  %v955_v18 = vadd.f32 %v954_v50, %v6005_v24 }
 0x1dc   : > { %v956_v15 = vpop.f32.mrf.mxu1 }
 0x1dd   : > { %v957_v16 = vadd.f32 %v956_v15, %v6002_v23  ;;  %v1073_v49 = vpack.c.bf16 %v1014_v13, %v1012_v12  ;;  %v1015_v29 = vmax.f32 %v955_v18, 0.0 }
 0x1de   : > { %v958_v19 = vpop.f32.mrf.mxu1 }
 0x1df   : > { %v959_v20 = vadd.f32 %v958_v19, %v6005_v24  ;;  %1307 = vmatprep.mubr.bf16.mxu0 %v1073_v49  ;;  %v1016_v25 = vmax.f32 %v957_v16, 0.0 }
 0x1e0   : > { %v960_v22 = vpop.f32.mrf.mxu1  ;;  %1308 = vmatmul.mubr.bf16.gmra.mxu0 %v1072_v17 }
 0x1e1   : > { %v961_v28 = vadd.f32 %v960_v22, %v6002_v23  ;;  %v1017_v31 = vmax.f32 %v959_v20, 0.0 }
 0x1e2   : > { %v964_v32 = vpop.f32.mrf.mxu1 }
 0x1e3   : > { %v1018_v33 = vmax.f32 %v961_v28, 0.0  ;;  %v965_v34 = vadd.f32 %v964_v32, %v6005_v24  ;;  %v1074_v38 = vpack.c.bf16 %v1017_v31, %v1015_v29 }
 0x1e4   : > { %v966_v35 = vpop.f32.mrf.mxu1 }
 0x1e5   : > { %v967_v36 = vadd.f32 %v966_v35, %v6002_v23  ;;  %v1075_v37 = vpack.c.bf16 %v1018_v33, %v1016_v25  ;;  %v1019_v42 = vmax.f32 %v965_v34, 0.0 }
 0x1e6   : > { %v968_v39 = vpop.f32.mrf.mxu1 }
 0x1e7   : > { %v969_v41 = vadd.f32 %v968_v39, %v6005_v24  ;;  %1317 = vmatprep.mubr.bf16.mxu0 %v1075_v37  ;;  %v1020_v47 = vmax.f32 %v967_v36, 0.0 }
 0x1e8   : > { %v970_v43 = vpop.f32.mrf.mxu1  ;;  %1318 = vmatmul.mubr.bf16.gmra.mxu0 %v1074_v38 }
 0x1e9   : > { %v1021_v48 = vmax.f32 %v969_v41, 0.0  ;;  %v971_v52 = vadd.f32 %v970_v43, %v6002_v23 }
 0x1ea   : > { %v974_v53 = vpop.f32.mrf.mxu1 }
 0x1eb   : > { %v1022_v54 = vmax.f32 %v971_v52, 0.0  ;;  %v1076_v55 = vpack.c.bf16 %v1021_v48, %v1019_v42  ;;  %v975_v56 = vadd.f32 %v974_v53, %v6005_v24  ;;  %v1422_v48 = vld [vmem:[#allocation3 + $0x550] sm:$0xff] }
 0x1ec   : > { %v976_v57 = vpop.f32.mrf.mxu1 }
 0x1ed   : > { %v977_v58 = vadd.f32 %v976_v57, %v6002_v23  ;;  %v1077_v59 = vpack.c.bf16 %v1022_v54, %v1020_v47  ;;  %v1023_v63 = vmax.f32 %v975_v56, 0.0  ;;  %v1421_v47 = vld [vmem:[#allocation3 + $0x510] sm:$0xff] }
 0x1ee   : > { %v978_v61 = vpop.f32.mrf.mxu1  ;;  %v5130_v52 = vcombine.high %v1421_v47, %v1422_v48  ;;  %v5129_v53 = vcombine.low %v1421_v47, %v1422_v48  ;;  %v1420_v54 = vld [vmem:[#allocation3 + $0x4d0] sm:$0xff]  ;;  %v1803_v47 = vld [vmem:[#allocation3 + $0x758] sm:$0xff] }
 0x1ef   : > { %v979_v62 = vadd.f32 %v978_v61, %v6005_v24  ;;  %1327 = vmatprep.mubr.bf16.mxu0 %v1077_v59  ;;  %v1024_v3 = vmax.f32 %v977_v58, 0.0  ;;  %v1417_v57 = vld [vmem:[#allocation3 + $0x410] sm:$0xff]  ;;  %v1788_v61 = vld [vmem:[#allocation3 + $0x398] sm:$0xff] }
 0x1f0   : > { %v980_v0 = vpop.f32.mrf.mxu1  ;;  %1328 = vmatmul.mubr.bf16.gmra.mxu0 %v1076_v55  ;;  %1646 = vmatprep.subr.bf16.mxu1 %v5130_v52  ;;  %v1418_v58 = vld [vmem:[#allocation3 + $0x450] sm:$0xff] }
 0x1f1   : > { %v1025_v5 = vmax.f32 %v979_v62, 0.0  ;;  %v981_v6 = vadd.f32 %v980_v0, %v6002_v23  ;;  %1647 = vmatpush2.bf16.msra.mxu1 %v5129_v53  ;;  %v5125_v59 = vcombine.low %v1417_v57, %v1418_v58  ;;  %v1789_v62 = vld [vmem:[#allocation3 + $0x3d8] sm:$0xff] }
 0x1f2   : > { %v984_v7 = vpop.f32.mrf.mxu1  ;;  %v5156_v0 = vcombine.high %v1788_v61, %v1789_v62  ;;  %v1800_v53 = vld [vmem:[#allocation3 + $0x698] sm:$0xff] }
 0x1f3   : > { %v1026_v8 = vmax.f32 %v981_v6, 0.0  ;;  %v1078_v9 = vpack.c.bf16 %v1025_v5, %v1023_v63  ;;  %v985_v11 = vadd.f32 %v984_v7, %v6005_v24  ;;  %v5155_v63 = vcombine.low %v1788_v61, %v1789_v62  ;;  %v1786_v5 = vld [vmem:[#allocation3 + $0x318] sm:$0xff] }
 0x1f4   : > { %v986_v50 = vpop.f32.mrf.mxu1  ;;  %v1787_v6 = vld [vmem:[#allocation3 + $0x358] sm:$0xff]  ;;  %1982 = vmatprep.subr.bf16.mxu0 %v5156_v0 }
 0x1f5   : > { %v987_v12 = vadd.f32 %v986_v50, %v6002_v23  ;;  %v1079_v13 = vpack.c.bf16 %v1026_v8, %v1024_v3  ;;  %v1027_v16 = vmax.f32 %v985_v11, 0.0  ;;  %v5497_v3 = vld [vmem:[%s6903_s1 + $0x6c] ss:$16 sps:$4 sm:$0xff]   ;;  %v5154_v7 = vcombine.high %v1786_v5, %v1787_v6  ;;  %1983 = vmatpush1.bf16.msra.mxu0 %v5155_v63 }
 0x1f6   : > { %v988_v14 = vpop.f32.mrf.mxu1  ;;  %v1784_v8 = vld [vmem:[#allocation3 + $0x298] sm:$0xff]  ;;  %v2137_v11 = vand.u32 %v5497_v3, %v5856_v4  ;;  %v5153_v50 = vcombine.low %v1786_v5, %v1787_v6  ;;  %v1035_v3 = vld [vmem:[%s6905_s3 + $0x4] sm:$0x3] }
 0x1f7   : > { %v989_v15 = vadd.f32 %v988_v14, %v6005_v24  ;;  %1337 = vmatprep.mubr.bf16.mxu0 %v1079_v13  ;;  %v1028_v17 = vmax.f32 %v987_v12, 0.0  ;;  %1984 = vmatprep.subr.bf16.mxu0 %v5154_v7  ;;  %v1782_v13 = vld [vmem:[#allocation3 + $0x218] sm:$0xff]  ;;  %v6047_v6 = vrot.slane %v1035_v3, %v5952_v45  ;;  %v6050_v7 = vrot.slane %v1035_v3, %v5955_v46 }
 0x1f8   : > { %v990_v49 = vpop.f32.mrf.mxu1  ;;  %1338 = vmatmul.mubr.bf16.gmra.mxu0 %v1078_v9  ;;  %v1785_v9 = vld [vmem:[#allocation3 + $0x2d8] sm:$0xff] }
 0x1f9   : > { %v1029_v18 = vmax.f32 %v989_v15, 0.0  ;;  %v991_v19 = vadd.f32 %v990_v49, %v6002_v23  ;;  %v5152_v12 = vcombine.high %v1784_v8, %v1785_v9  ;;  %v1783_v14 = vld [vmem:[#allocation3 + $0x258] sm:$0xff]  ;;  %1985 = vmatpush1.bf16.msra.mxu0 %v5153_v50  ;;  %v5151_v15 = vcombine.low %v1784_v8, %v1785_v9 }
 0x1fa   : > { %v994_v20 = vpop.f32.mrf.mxu1  ;;  %v1780_v49 = vld [vmem:[#allocation3 + $0x198] sm:$0xff] }
 0x1fb   : > { %v1030_v22 = vmax.f32 %v991_v19, 0.0  ;;  %v1080_v25 = vpack.c.bf16 %v1029_v18, %v1027_v16  ;;  %v995_v28 = vadd.f32 %v994_v20, %v6005_v24  ;;  %1986 = vmatprep.subr.bf16.mxu0 %v5152_v12  ;;  %v5150_v16 = vcombine.high %v1782_v13, %v1783_v14  ;;  %v1778_v20 = vld [vmem:[#allocation3 + $0x118] sm:$0xff] }
 0x1fc   : > { %v996_v29 = vpop.f32.mrf.mxu1  ;;  %v5149_v18 = vcombine.low %v1782_v13, %v1783_v14  ;;  %v1797_v61 = vld [vmem:[#allocation3 + $0x5d8] sm:$0xff] }
 0x1fd   : > { %v997_v31 = vadd.f32 %v996_v29, %v6002_v23  ;;  %v1081_v32 = vpack.c.bf16 %v1030_v22, %v1028_v17  ;;  %v1031_v35 = vmax.f32 %v995_v28, 0.0  ;;  %v1781_v17 = vld [vmem:[#allocation3 + $0x1d8] sm:$0xff]  ;;  %1987 = vmatpush1.bf16.msra.mxu0 %v5151_v15 }
 0x1fe   : > { %v998_v33 = vpop.f32.mrf.mxu1  ;;  %1988 = vmatprep.subr.bf16.mxu0 %v5150_v16  ;;  %v5148_v19 = vcombine.high %v1780_v49, %v1781_v17  ;;  %v1779_v22 = vld [vmem:[#allocation3 + $0x158] sm:$0xff] }
 0x1ff   : > { %v999_v34 = vadd.f32 %v998_v33, %v6005_v24  ;;  %1347 = vmatprep.mubr.bf16.mxu0 %v1081_v32  ;;  %v1032_v37 = vmax.f32 %v997_v31, 0.0  ;;  %v1419_v24 = vld [vmem:[#allocation3 + $0x490] sm:$0xff]  ;;  %v5146_v28 = vcombine.high %v1778_v20, %v1779_v22  ;;  %v1776_v29 = vld [vmem:[#allocation3 + $0x98] sm:$0xff]  ;;  %v5145_v32 = vcombine.low %v1778_v20, %v1779_v22 }
 0x200   : > { %v1000_v36 = vpop.f32.mrf.mxu1  ;;  %1348 = vmatmul.mubr.bf16.gmra.mxu0 %v1080_v25  ;;  %v5128_v55 = vcombine.high %v1419_v24, %v1420_v54  ;;  %v5127_v56 = vcombine.low %v1419_v24, %v1420_v54  ;;  %v5147_v25 = vcombine.low %v1780_v49, %v1781_v17  ;;  %v1777_v31 = vld [vmem:[#allocation3 + $0xd8] sm:$0xff] }
 0x201   : > { %v1033_v38 = vmax.f32 %v999_v34, 0.0  ;;  %v1001_v39 = vadd.f32 %v1000_v36, %v6002_v23  ;;  %v5126_v23 = vcombine.high %v1417_v57, %v1418_v58  ;;  %1989 = vmatpush1.bf16.msra.mxu0 %v5149_v18  ;;  %v5144_v33 = vcombine.high %v1776_v29, %v1777_v31  ;;  %v1774_v34 = vld [vmem:[#allocation3 + $0x18] sm:$0xff] }
 0x202   : > { %1648 = vmatprep.subr.bf16.mxu1 %v5128_v55  ;;  %1990 = vmatprep.subr.bf16.mxu0 %v5148_v19  ;;  %v5143_v36 = vcombine.low %v1776_v29, %v1777_v31  ;;  %v1801_v24 = vld [vmem:[#allocation3 + $0x6d8] sm:$0xff] }
 0x203   : > { %v1034_v41 = vmax.f32 %v1001_v39, 0.0  ;;  %v1082_v42 = vpack.c.bf16 %v1033_v38, %v1031_v35  ;;  %1649 = vmatpush2.bf16.msra.mxu1 %v5127_v56  ;;  %v1775_v35 = vld [vmem:[#allocation3 + $0x58] sm:$0xff]  ;;  %v5168_v55 = vcombine.high %v1800_v53, %v1801_v24  ;;  %v5167_v58 = vcombine.low %v1800_v53, %v1801_v24 }
 0x204   : > { %1650 = vmatprep.subr.bf16.mxu1 %v5126_v23  ;;  %v1804_v38 = vld [vmem:[#allocation3 + $0x798] sm:$0xff] }
 0x205   : > { %v1083_v43 = vpack.c.bf16 %v1034_v41, %v1032_v37  ;;  %1991 = vmatpush1.bf16.msra.mxu0 %v5147_v25  ;;  %v5142_v37 = vcombine.high %v1774_v34, %v1775_v35  ;;  %v1805_v39 = vld [vmem:[#allocation3 + $0x7d8] sm:$0xff]  ;;  %v5141_v41 = vcombine.low %v1774_v34, %v1775_v35 }
 0x206   : > { %1992 = vmatprep.subr.bf16.mxu0 %v5146_v28  ;;  %v5171_v48 = vcombine.low %v1804_v38, %v1805_v39  ;;  %v1798_v56 = vld [vmem:[#allocation3 + $0x618] sm:$0xff] }
 0x207   : > { %1357 = vmatprep.mubr.bf16.mxu0 %v1083_v43  ;;  %1651 = vmatpush2.bf16.msra.mxu1 %v5125_v59  ;;  %v1802_v43 = vld [vmem:[#allocation3 + $0x718] sm:$0xff] }
 0x208   : > { %1358 = vmatmul.mubr.bf16.gmra.mxu0 %v1082_v42  ;;  %2147 = vmatprep.subr.bf16.mxu1 %v2137_v11  ;;  %v5172_v42 = vcombine.high %v1804_v38, %v1805_v39  ;;  %v5170_v52 = vcombine.high %v1802_v43, %v1803_v47  ;;  %v5169_v54 = vcombine.low %v1802_v43, %v1803_v47  ;;  %v1799_v57 = vld [vmem:[#allocation3 + $0x658] sm:$0xff] }
 0x209   : > { %1993 = vmatpush1.bf16.msra.mxu0 %v5145_v32  ;;  %v5166_v23 = vcombine.high %v1798_v56, %v1799_v57  ;;  %v1796_v59 = vld [vmem:[#allocation3 + $0x598] sm:$0xff]  ;;  %v5165_v62 = vcombine.low %v1798_v56, %v1799_v57 }
 0x20a   : > { %1994 = vmatprep.subr.bf16.mxu0 %v5144_v33  ;;  %v5164_v63 = vcombine.high %v1796_v59, %v1797_v61  ;;  %v5163_v0 = vcombine.low %v1796_v59, %v1797_v61  ;;  %v5495_v15 = vld [vmem:[%s6903_s1 + $0x68] ss:$16 sps:$4 sm:$0xff]   ;;  %v5500_v31 = vld [vmem:[%s6903_s1 + $0x4c] ss:$16 sps:$4 sm:$0xff]  }
 0x20b   : > { %v2134_v25 = vand.u32 %v5495_v15, %v5856_v4  ;;  %v5498_v4 = vld [vmem:[%s6903_s1 + $0x48] ss:$16 sps:$4 sm:$0xff]   ;;  %v5503_v39 = vld [vmem:[%s6903_s1 + $0x2c] ss:$16 sps:$4 sm:$0xff]  }
 0x20c   : > { %v5504_v59 = vld [vmem:[%s6903_s1 + $0x8] ss:$16 sps:$4 sm:$0xff]  }
 0x20d   : > { %1995 = vmatpush1.bf16.msra.mxu0 %v5143_v36 }
 0x20e   : > { %1996 = vmatprep.subr.bf16.mxu0 %v5142_v37 }
 0x211   : > { %1997 = vmatpush1.bf16.msra.mxu0 %v5141_v41 }
 0x212   : > { %1998 = vmatprep.subr.bf16.mxu0 %v5172_v42 }
 0x215   : > { %1999 = vmatpush2.bf16.msra.mxu0 %v5171_v48 }
 0x216   : > { %2000 = vmatprep.subr.bf16.mxu0 %v5170_v52  ;;  %v5501_v52 = vld [vmem:[%s6903_s1 + $0x28] ss:$16 sps:$4 sm:$0xff]  }
 0x219   : > { %2001 = vmatpush2.bf16.msra.mxu0 %v5169_v54  ;;  %v5506_v54 = vld [vmem:[%s6903_s1 + $0xc] ss:$16 sps:$4 sm:$0xff]  }
 0x21a   : > { %2002 = vmatprep.subr.bf16.mxu0 %v5168_v55 }
 0x21d   : > { %2003 = vmatpush2.bf16.msra.mxu0 %v5167_v58 }
 0x21e   : > { %2004 = vmatprep.subr.bf16.mxu0 %v5166_v23 }
 0x221   : > { %2005 = vmatpush2.bf16.msra.mxu0 %v5165_v62 }
 0x222   : > { %2006 = vmatprep.subr.bf16.mxu0 %v5164_v63 }
 0x225   : > { %2007 = vmatpush2.bf16.msra.mxu0 %v5163_v0 }
 0x290   : > { %v1289_v5 = vpop.f32.mrf.mxu0 }
 0x291   : > { %v1290_v12 = vadd.f32 %v1289_v5, %v6050_v7 }
 0x292   : > { %v1291_v8 = vpop.f32.mrf.mxu0 }
 0x293   : > { %v1292_v11 = vadd.f32 %v1291_v8, %v6047_v6  ;;  %v1368_v19 = vmax.f32 %v1290_v12, 0.0 }
 0x294   : > { %v1293_v9 = vpop.f32.mrf.mxu0 }
 0x295   : > { %v1294_v50 = vadd.f32 %v1293_v9, %v6050_v7  ;;  %v1369_v17 = vmax.f32 %v1292_v11, 0.0 }
 0x296   : > { %v1295_v13 = vpop.f32.mrf.mxu0 }
 0x297   : > { %v1296_v14 = vadd.f32 %v1295_v13, %v6047_v6  ;;  %v1370_v16 = vmax.f32 %v1294_v50, 0.0 }
 0x298   : > { %v1299_v49 = vpop.f32.mrf.mxu0 }
 0x299   : > { %v1371_v18 = vmax.f32 %v1296_v14, 0.0  ;;  %v1433_v28 = vpack.c.bf16 %v1370_v16, %v1368_v19  ;;  %v1300_v34 = vadd.f32 %v1299_v49, %v6050_v7 }
 0x29a   : > { %v1301_v20 = vpop.f32.mrf.mxu0 }
 0x29b   : > { %v1434_v22 = vpack.c.bf16 %v1371_v18, %v1369_v17  ;;  %v1302_v32 = vadd.f32 %v1301_v20, %v6047_v6  ;;  %v1372_v43 = vmax.f32 %v1300_v34, 0.0 }
 0x29c   : > { %v1303_v29 = vpop.f32.mrf.mxu0 }
 0x29d   : > { %v1304_v33 = vadd.f32 %v1303_v29, %v6050_v7  ;;  %1652 = vmatprep.mubr.bf16.mxu1 %v1434_v22  ;;  %v1373_v41 = vmax.f32 %v1302_v32, 0.0 }
 0x29e   : > { %v1305_v35 = vpop.f32.mrf.mxu0  ;;  %1653 = vmatmul.mubr.bf16.vlgmr.msra.gmra.mxu1 %v1433_v28 }
 0x29f   : > { %v1306_v36 = vadd.f32 %v1305_v35, %v6047_v6  ;;  %2148 = vmatpush1.bf16.msra.mxu1 %v2134_v25  ;;  %v1374_v37 = vmax.f32 %v1304_v33, 0.0 }
 0x2a0   : > { %v1309_v38 = vpop.f32.mrf.mxu0  ;;  %2149 = vmatprep.subr.bf16.mxu1 %v5500_v31 }
 0x2a1   : > { %v1375_v42 = vmax.f32 %v1306_v36, 0.0  ;;  %v1435_v53 = vpack.c.bf16 %v1374_v37, %v1372_v43  ;;  %v1310_v57 = vadd.f32 %v1309_v38, %v6050_v7 }
 0x2a2   : > { %v1311_v47 = vpop.f32.mrf.mxu0 }
 0x2a3   : > { %v1436_v48 = vpack.c.bf16 %v1375_v42, %v1373_v41  ;;  %2150 = vmatpush1.bf16.msra.mxu1 %v5498_v4  ;;  %v1312_v55 = vadd.f32 %v1311_v47, %v6047_v6  ;;  %v1376_v3 = vmax.f32 %v1310_v57, 0.0 }
 0x2a4   : > { %v1313_v24 = vpop.f32.mrf.mxu0  ;;  %2151 = vmatprep.subr.bf16.mxu1 %v5503_v39 }
 0x2a5   : > { %v1314_v56 = vadd.f32 %v1313_v24, %v6050_v7  ;;  %1662 = vmatprep.mubr.bf16.mxu1 %v1436_v48  ;;  %v1377_v63 = vmax.f32 %v1312_v55, 0.0 }
 0x2a6   : > { %v1315_v58 = vpop.f32.mrf.mxu0  ;;  %1663 = vmatmul.mubr.bf16.gmra.mxu1 %v1435_v53 }
 0x2a7   : > { %v1316_v23 = vadd.f32 %v1315_v58, %v6047_v6  ;;  %2152 = vmatpush1.bf16.msra.mxu1 %v5501_v52  ;;  %v1378_v61 = vmax.f32 %v1314_v56, 0.0 }
 0x2a8   : > { %v1319_v62 = vpop.f32.mrf.mxu0  ;;  %2153 = vmatprep.subr.bf16.mxu1 %v5506_v54 }
 0x2a9   : > { %v1379_v0 = vmax.f32 %v1316_v23, 0.0  ;;  %v1437_v9 = vpack.c.bf16 %v1378_v61, %v1376_v3  ;;  %v1320_v13 = vadd.f32 %v1319_v62, %v6050_v7 }
 0x2aa   : > { %v1321_v5 = vpop.f32.mrf.mxu0 }
 0x2ab   : > { %v1438_v8 = vpack.c.bf16 %v1379_v0, %v1377_v63  ;;  %2154 = vmatpush1.bf16.msra.mxu1 %v5504_v59  ;;  %v1322_v50 = vadd.f32 %v1321_v5, %v6047_v6  ;;  %v1380_v19 = vmax.f32 %v1320_v13, 0.0 }
 0x2ac   : > { %v1323_v11 = vpop.f32.mrf.mxu0 }
 0x2ad   : > { %v1324_v12 = vadd.f32 %v1323_v11, %v6050_v7  ;;  %1672 = vmatprep.mubr.bf16.mxu1 %v1438_v8  ;;  %v1381_v17 = vmax.f32 %v1322_v50, 0.0 }
 0x2ae   : > { %v1325_v14 = vpop.f32.mrf.mxu0  ;;  %1673 = vmatmul.mubr.bf16.gmra.mxu1 %v1437_v9 }
 0x2af   : > { %v1326_v15 = vadd.f32 %v1325_v14, %v6047_v6  ;;  %v1382_v16 = vmax.f32 %v1324_v12, 0.0 }
 0x2b0   : > { %v1329_v49 = vpop.f32.mrf.mxu0 }
 0x2b1   : > { %v1383_v18 = vmax.f32 %v1326_v15, 0.0  ;;  %v1439_v25 = vpack.c.bf16 %v1382_v16, %v1380_v19  ;;  %v1330_v32 = vadd.f32 %v1329_v49, %v6050_v7 }
 0x2b2   : > { %v1331_v20 = vpop.f32.mrf.mxu0 }
 0x2b3   : > { %v1440_v22 = vpack.c.bf16 %v1383_v18, %v1381_v17  ;;  %v1332_v29 = vadd.f32 %v1331_v20, %v6047_v6  ;;  %v1384_v38 = vmax.f32 %v1330_v32, 0.0 }
 0x2b4   : > { %v1333_v28 = vpop.f32.mrf.mxu0 }
 0x2b5   : > { %v1334_v31 = vadd.f32 %v1333_v28, %v6050_v7  ;;  %1682 = vmatprep.mubr.bf16.mxu1 %v1440_v22  ;;  %v1385_v4 = vmax.f32 %v1332_v29, 0.0 }
 0x2b6   : > { %v1335_v33 = vpop.f32.mrf.mxu0  ;;  %1683 = vmatmul.mubr.bf16.gmra.mxu1 %v1439_v25 }
 0x2b7   : > { %v1336_v34 = vadd.f32 %v1335_v33, %v6047_v6  ;;  %v1386_v35 = vmax.f32 %v1334_v31, 0.0 }
 0x2b8   : > { %v1339_v36 = vpop.f32.mrf.mxu0 }
 0x2b9   : > { %v1387_v37 = vmax.f32 %v1336_v34, 0.0  ;;  %v1340_v39 = vadd.f32 %v1339_v36, %v6050_v7  ;;  %v1441_v47 = vpack.c.bf16 %v1386_v35, %v1384_v38  ;;  %v1794_v34 = vld [vmem:[#allocation3 + $0x518] sm:$0xff] }
 0x2ba   : > { %v1341_v41 = vpop.f32.mrf.mxu0  ;;  %v1795_v35 = vld [vmem:[#allocation3 + $0x558] sm:$0xff] }
 0x2bb   : > { %v1342_v42 = vadd.f32 %v1341_v41, %v6047_v6  ;;  %v1442_v43 = vpack.c.bf16 %v1387_v37, %v1385_v4  ;;  %v1388_v53 = vmax.f32 %v1340_v39, 0.0  ;;  %v5162_v36 = vcombine.high %v1794_v34, %v1795_v35  ;;  %v1792_v4 = vld [vmem:[#allocation3 + $0x498] sm:$0xff] }
 0x2bc   : > { %v1343_v48 = vpop.f32.mrf.mxu0  ;;  %v1790_v39 = vld [vmem:[#allocation3 + $0x418] sm:$0xff] }
 0x2bd   : > { %v1344_v52 = vadd.f32 %v1343_v48, %v6050_v7  ;;  %1692 = vmatprep.mubr.bf16.mxu1 %v1442_v43  ;;  %v1389_v54 = vmax.f32 %v1342_v42, 0.0  ;;  %2008 = vmatprep.subr.bf16.mxu0 %v5162_v36  ;;  %v1791_v41 = vld [vmem:[#allocation3 + $0x458] sm:$0xff]  ;;  %v2343_v48 = vld [vmem:[#allocation3 + $0x3e0] sm:$0xff] }
 0x2be   : > { %v1345_v24 = vpop.f32.mrf.mxu0  ;;  %1693 = vmatmul.mubr.bf16.gmra.mxu1 %v1441_v47  ;;  %v5158_v42 = vcombine.high %v1790_v39, %v1791_v41  ;;  %v5157_v43 = vcombine.low %v1790_v39, %v1791_v41  ;;  %v2342_v47 = vld [vmem:[#allocation3 + $0x3a0] sm:$0xff] }
 0x2bf   : > { %v1390_v55 = vmax.f32 %v1344_v52, 0.0  ;;  %v1346_v56 = vadd.f32 %v1345_v24, %v6047_v6  ;;  %v5203_v52 = vcombine.low %v2342_v47, %v2343_v48  ;;  %v1400_v24 = vld [vmem:[%s6905_s3 + $0x6] sm:$0x3] }
 0x2c0   : > { %v1349_v57 = vpop.f32.mrf.mxu0 }
 0x2c1   : > { %v1391_v58 = vmax.f32 %v1346_v56, 0.0  ;;  %v1443_v23 = vpack.c.bf16 %v1390_v55, %v1388_v53  ;;  %v1350_v59 = vadd.f32 %v1349_v57, %v6050_v7  ;;  %v5204_v53 = vcombine.high %v2342_v47, %v2343_v48  ;;  %v2335_v47 = vld [vmem:[#allocation3 + $0x1e0] sm:$0xff] }
 0x2c2   : > { %v1351_v61 = vpop.f32.mrf.mxu0  ;;  %v6134_v55 = vrot.slane %v1400_v24, %v5952_v45  ;;  %v6137_v56 = vrot.slane %v1400_v24, %v5955_v46 }
 0x2c3   : > { %v1352_v62 = vadd.f32 %v1351_v61, %v6047_v6  ;;  %v1444_v63 = vpack.c.bf16 %v1391_v58, %v1389_v54  ;;  %v1392_v5 = vmax.f32 %v1350_v59, 0.0 }
 0x2c4   : > { %v1353_v0 = vpop.f32.mrf.mxu0 }
 0x2c5   : > { %v1354_v3 = vadd.f32 %v1353_v0, %v6050_v7  ;;  %1702 = vmatprep.mubr.bf16.mxu1 %v1444_v63  ;;  %v1393_v9 = vmax.f32 %v1352_v62, 0.0 }
 0x2c6   : > { %v1355_v8 = vpop.f32.mrf.mxu0  ;;  %1703 = vmatmul.mubr.bf16.gmra.mxu1 %v1443_v23 }
 0x2c7   : > { %v1394_v11 = vmax.f32 %v1354_v3, 0.0  ;;  %v1356_v50 = vadd.f32 %v1355_v8, %v6047_v6  ;;  %v2340_v8 = vld [vmem:[#allocation3 + $0x320] sm:$0xff] }
 0x2c8   : > { %v1359_v12 = vpop.f32.mrf.mxu0 }
 0x2c9   : > { %v1395_v13 = vmax.f32 %v1356_v50, 0.0  ;;  %v1445_v14 = vpack.c.bf16 %v1394_v11, %v1392_v5  ;;  %v1360_v15 = vadd.f32 %v1359_v12, %v6050_v7 }
 0x2ca   : > { %v1361_v16 = vpop.f32.mrf.mxu0 }
 0x2cb   : > { %v1362_v49 = vadd.f32 %v1361_v16, %v6047_v6  ;;  %v1446_v17 = vpack.c.bf16 %v1395_v13, %v1393_v9  ;;  %v1396_v20 = vmax.f32 %v1360_v15, 0.0  ;;  %v2341_v9 = vld [vmem:[#allocation3 + $0x360] sm:$0xff] }
 0x2cc   : > { %v1363_v18 = vpop.f32.mrf.mxu0  ;;  %v5202_v15 = vcombine.high %v2340_v8, %v2341_v9 }
 0x2cd   : > { %v1364_v19 = vadd.f32 %v1363_v18, %v6050_v7  ;;  %1712 = vmatprep.mubr.bf16.mxu1 %v1446_v17  ;;  %v1397_v25 = vmax.f32 %v1362_v49, 0.0  ;;  %v5161_v7 = vcombine.low %v1794_v34, %v1795_v35  ;;  %v2338_v17 = vld [vmem:[#allocation3 + $0x2a0] sm:$0xff] }
 0x2ce   : > { %v1365_v22 = vpop.f32.mrf.mxu0  ;;  %1713 = vmatmul.mubr.bf16.gmra.mxu1 %v1445_v14  ;;  %v2339_v18 = vld [vmem:[#allocation3 + $0x2e0] sm:$0xff] }
 0x2cf   : > { %v1398_v28 = vmax.f32 %v1364_v19, 0.0  ;;  %v1366_v29 = vadd.f32 %v1365_v22, %v6047_v6  ;;  %2009 = vmatpush2.bf16.msra.mxu0 %v5161_v7  ;;  %v1793_v6 = vld [vmem:[#allocation3 + $0x4d8] sm:$0xff]  ;;  %v2336_v34 = vld [vmem:[#allocation3 + $0x220] sm:$0xff] }
 0x2d0   : > { %v5160_v37 = vcombine.high %v1792_v4, %v1793_v6  ;;  %v5159_v38 = vcombine.low %v1792_v4, %v1793_v6  ;;  %v2337_v35 = vld [vmem:[#allocation3 + $0x260] sm:$0xff]  ;;  %v5199_v6 = vcombine.low %v2338_v17, %v2339_v18 }
 0x2d1   : > { %v1399_v31 = vmax.f32 %v1366_v29, 0.0  ;;  %v1447_v32 = vpack.c.bf16 %v1398_v28, %v1396_v20  ;;  %v5198_v39 = vcombine.high %v2336_v34, %v2337_v35  ;;  %v5197_v24 = vcombine.low %v2336_v34, %v2337_v35 }
 0x2d2   : > { %2010 = vmatprep.subr.bf16.mxu0 %v5160_v37 }
 0x2d3   : > { %v1448_v33 = vpack.c.bf16 %v1399_v31, %v1397_v25  ;;  %2011 = vmatpush2.bf16.msra.mxu0 %v5159_v38  ;;  %v5201_v25 = vcombine.low %v2340_v8, %v2341_v9  ;;  %v5200_v31 = vcombine.high %v2338_v17, %v2339_v18 }
 0x2d4   : > { %2012 = vmatprep.subr.bf16.mxu0 %v5158_v42 }
 0x2d5   : > { %1722 = vmatprep.mubr.bf16.mxu1 %v1448_v33 }
 0x2d6   : > { %1723 = vmatmul.mubr.bf16.gmra.mxu1 %v1447_v32 }
 0x2d7   : > { %2171 = vmatprep.mubr.bf16.mxu1 %v5758_v1  ;;  %2013 = vmatpush2.bf16.msra.mxu0 %v5157_v43  ;;  %v2334_v43 = vld [vmem:[#allocation3 + $0x1a0] sm:$0xff] }
 0x2d8   : > { %2547 = vmatprep.subr.bf16.mxu0 %v5204_v53 }
 0x2de   : > { %5181 = vmatmul.mubr.msk.bf16.vlgmr.msra.gmra.mxu1 %vm490_vm2, %v5896_v27  ;;  %v3543_v27 = vld [vmem:[#allocation3 + $0x1b8] sm:$0xff] }
 0x2df   : > { %2181 = vmatprep.mubr.bf16.mxu1 %v5758_v1 }
 0x2e6   : > { %5182 = vmatmul.mubr.msk.bf16.gmra.mxu1 %vm490_vm2, %v5903_v40 }
 0x2e7   : > { %2191 = vmatprep.mubr.bf16.mxu1 %v5758_v1 }
 0x2ee   : > { %5183 = vmatmul.mubr.msk.bf16.gmra.mxu1 %vm490_vm2, %v5910_v51 }
 0x2ef   : > { %2201 = vmatprep.mubr.bf16.mxu1 %v5758_v1 }
 0x2f6   : > { %5184 = vmatmul.mubr.msk.bf16.gmra.mxu1 %vm490_vm2, %v5917_v60  ;;  %v3541_v60 = vld [vmem:[#allocation3 + $0x138] sm:$0xff] }
 0x2f7   : > { %2211 = vmatprep.mubr.bf16.mxu1 %v5758_v1 }
 0x2fe   : > { %5185 = vmatmul.mubr.msk.bf16.gmra.mxu1 %vm490_vm2, %v5924_v10 }
 0x2ff   : > { %2221 = vmatprep.mubr.bf16.mxu1 %v5758_v1 }
 0x306   : > { %5186 = vmatmul.mubr.msk.bf16.gmra.mxu1 %vm490_vm2, %v5931_v21  ;;  %v3540_v21 = vld [vmem:[#allocation3 + $0xf8] sm:$0xff] }
 0x307   : > { %2231 = vmatprep.mubr.bf16.mxu1 %v5758_v1 }
 0x30e   : > { %5187 = vmatmul.mubr.msk.bf16.gmra.mxu1 %vm490_vm2, %v5938_v26 }
 0x30f   : > { %2241 = vmatprep.mubr.bf16.mxu1 %v5758_v1 }
 0x316   : > { %5188 = vmatmul.mubr.msk.bf16.gmra.mxu1 %vm490_vm2, %v5945_v30 }
 0x35e   : > { %v1654_v54 = vpop.f32.mrf.mxu1 }
 0x35f   : > { %v1655_v59 = vadd.f32 %v1654_v54, %v6137_v56 }
 0x360   : > { %v1656_v1 = vpop.f32.mrf.mxu1 }
 0x361   : > { %v1657_v58 = vadd.f32 %v1656_v1, %v6134_v55  ;;  %v1733_v11 = vmax.f32 %v1655_v59, 0.0  ;;  %v2332_v59 = vld [vmem:[#allocation3 + $0x120] sm:$0xff] }
 0x362   : > { %v1658_v57 = vpop.f32.mrf.mxu1 }
 0x363   : > { %v1659_v23 = vadd.f32 %v1658_v57, %v6137_v56  ;;  %v1734_v3 = vmax.f32 %v1657_v58, 0.0  ;;  %v5196_v57 = vcombine.high %v2334_v43, %v2335_v47 }
 0x364   : > { %v1660_v61 = vpop.f32.mrf.mxu1 }
 0x365   : > { %v1661_v62 = vadd.f32 %v1660_v61, %v6134_v55  ;;  %v1735_v63 = vmax.f32 %v1659_v23, 0.0  ;;  %v2333_v61 = vld [vmem:[#allocation3 + $0x160] sm:$0xff] }
 0x366   : > { %v1664_v0 = vpop.f32.mrf.mxu1  ;;  %v5194_v9 = vcombine.high %v2332_v59, %v2333_v61 }
 0x367   : > { %v1736_v5 = vmax.f32 %v1661_v62, 0.0  ;;  %v1806_v13 = vpack.c.bf16 %v1735_v63, %v1733_v11  ;;  %v1665_v19 = vadd.f32 %v1664_v0, %v6137_v56 }
 0x368   : > { %v1666_v50 = vpop.f32.mrf.mxu1 }
 0x369   : > { %v1807_v12 = vpack.c.bf16 %v1736_v5, %v1734_v3  ;;  %v1667_v16 = vadd.f32 %v1666_v50, %v6134_v55  ;;  %v1737_v36 = vmax.f32 %v1665_v19, 0.0  ;;  %v5195_v3 = vcombine.low %v2334_v43, %v2335_v47 }
 0x36a   : > { %v1668_v14 = vpop.f32.mrf.mxu1 }
 0x36b   : > { %v1669_v49 = vadd.f32 %v1668_v14, %v6137_v56  ;;  %2014 = vmatprep.mubr.bf16.mxu0 %v1807_v12  ;;  %v1738_v32 = vmax.f32 %v1667_v16, 0.0  ;;  %v2330_v12 = vld [vmem:[#allocation3 + $0xa0] sm:$0xff] }
 0x36c   : > { %v1670_v20 = vpop.f32.mrf.mxu1  ;;  %2015 = vmatmul.mubr.bf16.vlgmr.msra.gmra.mxu0 %v1806_v13  ;;  %v2331_v13 = vld [vmem:[#allocation3 + $0xe0] sm:$0xff] }
 0x36d   : > { %v1671_v22 = vadd.f32 %v1670_v20, %v6134_v55  ;;  %2548 = vmatpush1.bf16.msra.mxu0 %v5203_v52  ;;  %v1739_v28 = vmax.f32 %v1669_v49, 0.0  ;;  %v5193_v49 = vcombine.low %v2332_v59, %v2333_v61  ;;  %v5192_v19 = vcombine.high %v2330_v12, %v2331_v13 }
 0x36e   : > { %v1674_v29 = vpop.f32.mrf.mxu1  ;;  %2549 = vmatprep.subr.bf16.mxu0 %v5202_v15 }
 0x36f   : > { %v1740_v33 = vmax.f32 %v1671_v22, 0.0  ;;  %v1808_v37 = vpack.c.bf16 %v1739_v28, %v1737_v36  ;;  %v1675_v48 = vadd.f32 %v1674_v29, %v6137_v56  ;;  %v2329_v28 = vld [vmem:[#allocation3 + $0x60] sm:$0xff] }
 0x370   : > { %v1676_v7 = vpop.f32.mrf.mxu1 }
 0x371   : > { %v1809_v4 = vpack.c.bf16 %v1740_v33, %v1738_v32  ;;  %2550 = vmatpush1.bf16.msra.mxu0 %v5201_v25  ;;  %v1677_v41 = vadd.f32 %v1676_v7, %v6134_v55  ;;  %v1741_v62 = vmax.f32 %v1675_v48, 0.0  ;;  %v2328_v25 = vld [vmem:[#allocation3 + $0x20] sm:$0xff]  ;;  %v5191_v33 = vcombine.low %v2330_v12, %v2331_v13 }
 0x372   : > { %v1678_v38 = vpop.f32.mrf.mxu1  ;;  %2551 = vmatprep.subr.bf16.mxu0 %v5200_v31  ;;  %v5190_v36 = vcombine.high %v2328_v25, %v2329_v28 }
 0x373   : > { %v1679_v42 = vadd.f32 %v1678_v38, %v6137_v56  ;;  %2024 = vmatprep.mubr.bf16.mxu0 %v1809_v4  ;;  %v1742_v58 = vmax.f32 %v1677_v41, 0.0 }
 0x374   : > { %v1680_v52 = vpop.f32.mrf.mxu1  ;;  %2025 = vmatmul.mubr.bf16.gmra.mxu0 %v1808_v37  ;;  %v2359_v37 = vld [vmem:[#allocation3 + $0x7e0] sm:$0xff] }
 0x375   : > { %v1681_v53 = vadd.f32 %v1680_v52, %v6134_v55  ;;  %2552 = vmatpush1.bf16.msra.mxu0 %v5199_v6  ;;  %v1743_v54 = vmax.f32 %v1679_v42, 0.0  ;;  %v2358_v6 = vld [vmem:[#allocation3 + $0x7a0] sm:$0xff]  ;;  %v5189_v42 = vcombine.low %v2328_v25, %v2329_v28 }
 0x376   : > { %v1684_v1 = vpop.f32.mrf.mxu1  ;;  %2553 = vmatprep.subr.bf16.mxu0 %v5198_v39  ;;  %v5220_v48 = vcombine.high %v2358_v6, %v2359_v37 }
 0x377   : > { %v1744_v23 = vmax.f32 %v1681_v53, 0.0  ;;  %v1810_v5 = vpack.c.bf16 %v1743_v54, %v1741_v62  ;;  %v1685_v14 = vadd.f32 %v1684_v1, %v6137_v56  ;;  %v2357_v54 = vld [vmem:[#allocation3 + $0x760] sm:$0xff] }
 0x378   : > { %v1686_v63 = vpop.f32.mrf.mxu1 }
 0x379   : > { %v1811_v0 = vpack.c.bf16 %v1744_v23, %v1742_v58  ;;  %2554 = vmatpush1.bf16.msra.mxu0 %v5197_v24  ;;  %v1687_v11 = vadd.f32 %v1686_v63, %v6134_v55  ;;  %v1745_v29 = vmax.f32 %v1685_v14, 0.0  ;;  %v2356_v24 = vld [vmem:[#allocation3 + $0x720] sm:$0xff]  ;;  %v5219_v23 = vcombine.low %v2358_v6, %v2359_v37 }
 0x37a   : > { %v1688_v8 = vpop.f32.mrf.mxu1  ;;  %2555 = vmatprep.subr.bf16.mxu0 %v5196_v57  ;;  %v5218_v62 = vcombine.high %v2356_v24, %v2357_v54 }
 0x37b   : > { %v1689_v50 = vadd.f32 %v1688_v8, %v6137_v56  ;;  %2034 = vmatprep.mubr.bf16.mxu0 %v1811_v0  ;;  %v1746_v20 = vmax.f32 %v1687_v11, 0.0 }
 0x37c   : > { %v1690_v15 = vpop.f32.mrf.mxu1  ;;  %2035 = vmatmul.mubr.bf16.gmra.mxu0 %v1810_v5  ;;  %v2355_v5 = vld [vmem:[#allocation3 + $0x6e0] sm:$0xff] }
 0x37d   : > { %v1691_v16 = vadd.f32 %v1690_v15, %v6134_v55  ;;  %2556 = vmatpush1.bf16.msra.mxu0 %v5195_v3  ;;  %v1747_v17 = vmax.f32 %v1689_v50, 0.0  ;;  %v2354_v3 = vld [vmem:[#allocation3 + $0x6a0] sm:$0xff]  ;;  %v5217_v50 = vcombine.low %v2356_v24, %v2357_v54 }
 0x37e   : > { %v1694_v18 = vpop.f32.mrf.mxu1  ;;  %2557 = vmatprep.subr.bf16.mxu0 %v5194_v9  ;;  %v5216_v14 = vcombine.high %v2354_v3, %v2355_v5 }
 0x37f   : > { %v1748_v22 = vmax.f32 %v1691_v16, 0.0  ;;  %v1812_v34 = vpack.c.bf16 %v1747_v17, %v1745_v29  ;;  %v1695_v38 = vadd.f32 %v1694_v18, %v6137_v56  ;;  %v2353_v17 = vld [vmem:[#allocation3 + $0x660] sm:$0xff] }
 0x380   : > { %v1696_v31 = vpop.f32.mrf.mxu1 }
 0x381   : > { %v1813_v32 = vpack.c.bf16 %v1748_v22, %v1746_v20  ;;  %2558 = vmatpush1.bf16.msra.mxu0 %v5193_v49  ;;  %v1697_v7 = vadd.f32 %v1696_v31, %v6134_v55  ;;  %v1749_v1 = vmax.f32 %v1695_v38, 0.0  ;;  %v2352_v49 = vld [vmem:[#allocation3 + $0x620] sm:$0xff]  ;;  %v5215_v22 = vcombine.low %v2354_v3, %v2355_v5 }
 0x382   : > { %v1698_v35 = vpop.f32.mrf.mxu1  ;;  %2559 = vmatprep.subr.bf16.mxu0 %v5192_v19  ;;  %v5214_v31 = vcombine.high %v2352_v49, %v2353_v17  ;;  %v2348_v3 = vld [vmem:[#allocation3 + $0x520] sm:$0xff] }
 0x383   : > { %v1699_v4 = vadd.f32 %v1698_v35, %v6137_v56  ;;  %2044 = vmatprep.mubr.bf16.mxu0 %v1813_v32  ;;  %v1750_v52 = vmax.f32 %v1697_v7, 0.0  ;;  %v2351_v35 = vld [vmem:[#allocation3 + $0x5e0] sm:$0xff] }
 0x384   : > { %v1700_v39 = vpop.f32.mrf.mxu1  ;;  %2045 = vmatmul.mubr.bf16.gmra.mxu0 %v1812_v34  ;;  %v2350_v34 = vld [vmem:[#allocation3 + $0x5a0] sm:$0xff] }
 0x385   : > { %v1701_v41 = vadd.f32 %v1700_v39, %v6134_v55  ;;  %2560 = vmatpush1.bf16.msra.mxu0 %v5191_v33  ;;  %v1751_v43 = vmax.f32 %v1699_v4, 0.0  ;;  %v5213_v4 = vcombine.low %v2352_v49, %v2353_v17  ;;  %v5212_v39 = vcombine.high %v2350_v34, %v2351_v35  ;;  %v2349_v5 = vld [vmem:[#allocation3 + $0x560] sm:$0xff]  ;;  %v2707_v17 = vld [vmem:[#allocation3 + $0x3a8] sm:$0xff] }
 0x386   : > { %v1704_v47 = vpop.f32.mrf.mxu1  ;;  %2561 = vmatprep.subr.bf16.mxu0 %v5190_v36 }
 0x387   : > { %v1752_v53 = vmax.f32 %v1701_v41, 0.0  ;;  %v1814_v59 = vpack.c.bf16 %v1751_v43, %v1749_v1  ;;  %v1705_v8 = vadd.f32 %v1704_v47, %v6137_v56 }
 0x388   : > { %v1706_v57 = vpop.f32.mrf.mxu1 }
 0x389   : > { %v1815_v58 = vpack.c.bf16 %v1752_v53, %v1750_v52  ;;  %2562 = vmatpush1.bf16.msra.mxu0 %v5189_v42  ;;  %v1707_v63 = vadd.f32 %v1706_v57, %v6134_v55  ;;  %v1753_v18 = vmax.f32 %v1705_v8, 0.0  ;;  %v5211_v53 = vcombine.low %v2350_v34, %v2351_v35  ;;  %v2701_v35 = vld [vmem:[#allocation3 + $0x228] sm:$0xff] }
 0x38a   : > { %v1708_v61 = vpop.f32.mrf.mxu1  ;;  %2563 = vmatprep.subr.bf16.mxu0 %v5220_v48  ;;  %v5210_v8 = vcombine.high %v2348_v3, %v2349_v5 }
 0x38b   : > { %v1709_v0 = vadd.f32 %v1708_v61, %v6137_v56  ;;  %2054 = vmatprep.mubr.bf16.mxu0 %v1815_v58  ;;  %v1754_v15 = vmax.f32 %v1707_v63, 0.0 }
 0x38c   : > { %v1710_v9 = vpop.f32.mrf.mxu1  ;;  %2055 = vmatmul.mubr.bf16.gmra.mxu0 %v1814_v59 }
 0x38d   : > { %v1711_v11 = vadd.f32 %v1710_v9, %v6134_v55  ;;  %2564 = vmatpush2.bf16.msra.mxu0 %v5219_v23  ;;  %v1755_v12 = vmax.f32 %v1709_v0, 0.0  ;;  %v5209_v9 = vcombine.low %v2348_v3, %v2349_v5  ;;  %v2723_v3 = vld [vmem:[#allocation3 + $0x7a8] sm:$0xff] }
 0x38e   : > { %v1714_v13 = vpop.f32.mrf.mxu1  ;;  %2565 = vmatprep.subr.bf16.mxu0 %v5218_v62  ;;  %v2724_v5 = vld [vmem:[#allocation3 + $0x7e8] sm:$0xff] }
 0x38f   : > { %v1756_v16 = vmax.f32 %v1711_v11, 0.0  ;;  %v1816_v25 = vpack.c.bf16 %v1755_v12, %v1753_v18  ;;  %v1715_v28 = vadd.f32 %v1714_v13, %v6137_v56  ;;  %v2347_v11 = vld [vmem:[#allocation3 + $0x4e0] sm:$0xff]  ;;  %v2708_v18 = vld [vmem:[#allocation3 + $0x3e8] sm:$0xff] }
 0x390   : > { %v1716_v19 = vpop.f32.mrf.mxu1  ;;  %v2344_v13 = vld [vmem:[#allocation3 + $0x420] sm:$0xff] }
 0x391   : > { %v1817_v20 = vpack.c.bf16 %v1756_v16, %v1754_v15  ;;  %2566 = vmatpush2.bf16.msra.mxu0 %v5217_v50  ;;  %v1717_v32 = vadd.f32 %v1716_v19, %v6134_v55  ;;  %v1757_v6 = vmax.f32 %v1715_v28, 0.0  ;;  %v2705_v19 = vld [vmem:[#allocation3 + $0x328] sm:$0xff] }
 0x392   : > { %v1718_v29 = vpop.f32.mrf.mxu1  ;;  %2567 = vmatprep.subr.bf16.mxu0 %v5216_v14 }
 0x393   : > { %v1719_v33 = vadd.f32 %v1718_v29, %v6137_v56  ;;  %2064 = vmatprep.mubr.bf16.mxu0 %v1817_v20  ;;  %v1758_v41 = vmax.f32 %v1717_v32, 0.0  ;;  %v5235_v20 = vcombine.low %v2707_v17, %v2708_v18  ;;  %v2703_v29 = vld [vmem:[#allocation3 + $0x2a8] sm:$0xff] }
 0x394   : > { %v1720_v36 = vpop.f32.mrf.mxu1  ;;  %2065 = vmatmul.mubr.bf16.gmra.mxu0 %v1816_v25  ;;  %v2706_v25 = vld [vmem:[#allocation3 + $0x368] sm:$0xff] }
 0x395   : > { %v1721_v7 = vadd.f32 %v1720_v36, %v6134_v55  ;;  %2568 = vmatpush2.bf16.msra.mxu0 %v5215_v22  ;;  %v1759_v37 = vmax.f32 %v1719_v33, 0.0  ;;  %v5236_v22 = vcombine.high %v2707_v17, %v2708_v18  ;;  %v5234_v28 = vcombine.high %v2705_v19, %v2706_v25  ;;  %v2702_v36 = vld [vmem:[#allocation3 + $0x268] sm:$0xff] }
 0x396   : > { %v1724_v38 = vpop.f32.mrf.mxu1  ;;  %2569 = vmatprep.subr.bf16.mxu0 %v5214_v31  ;;  %v2704_v31 = vld [vmem:[#allocation3 + $0x2e8] sm:$0xff]  ;;  %v5233_v33 = vcombine.low %v2705_v19, %v2706_v25 }
 0x397   : > { %v1760_v42 = vmax.f32 %v1721_v7, 0.0  ;;  %v1725_v43 = vadd.f32 %v1724_v38, %v6137_v56  ;;  %v1818_v24 = vpack.c.bf16 %v1759_v37, %v1757_v6  ;;  %2912 = vmatprep.subr.bf16.mxu1 %v5236_v22  ;;  %v5232_v34 = vcombine.high %v2703_v29, %v2704_v31  ;;  %v2699_v38 = vld [vmem:[#allocation3 + $0x1a8] sm:$0xff] }
 0x398   : > { %v1726_v47 = vpop.f32.mrf.mxu1  ;;  %2913 = vmatpush1.bf16.msra.mxu1 %v5235_v20  ;;  %v5230_v6 = vcombine.high %v2701_v35, %v2702_v36  ;;  %v2717_v20 = vld [vmem:[#allocation3 + $0x628] sm:$0xff] }
 0x399   : > { %v1727_v48 = vadd.f32 %v1726_v47, %v6134_v55  ;;  %v1819_v52 = vpack.c.bf16 %v1760_v42, %v1758_v41  ;;  %2570 = vmatpush2.bf16.msra.mxu0 %v5213_v4  ;;  %v1761_v57 = vmax.f32 %v1725_v43, 0.0  ;;  %2914 = vmatprep.subr.bf16.mxu1 %v5234_v28  ;;  %v5231_v4 = vcombine.low %v2703_v29, %v2704_v31  ;;  %v2697_v47 = vld [vmem:[#allocation3 + $0x128] sm:$0xff] }
 0x39a   : > { %v1728_v54 = vpop.f32.mrf.mxu1  ;;  %2571 = vmatprep.subr.bf16.mxu0 %v5212_v39  ;;  %v2700_v39 = vld [vmem:[#allocation3 + $0x1e8] sm:$0xff]  ;;  %v5229_v41 = vcombine.low %v2701_v35, %v2702_v36 }
 0x39b   : > { %v1729_v1 = vadd.f32 %v1728_v54, %v6137_v56  ;;  %2074 = vmatprep.mubr.bf16.mxu0 %v1819_v52  ;;  %v1762_v23 = vmax.f32 %v1727_v48, 0.0  ;;  %v2346_v56 = vld [vmem:[#allocation3 + $0x4a0] sm:$0xff]  ;;  %v5228_v42 = vcombine.high %v2699_v38, %v2700_v39  ;;  %v2698_v48 = vld [vmem:[#allocation3 + $0x168] sm:$0xff]  ;;  %v5227_v52 = vcombine.low %v2699_v38, %v2700_v39 }
 0x39c   : > { %v1730_v58 = vpop.f32.mrf.mxu1  ;;  %2075 = vmatmul.mubr.bf16.gmra.mxu0 %v1818_v24  ;;  %v5208_v50 = vcombine.high %v2346_v56, %v2347_v11  ;;  %v5207_v12 = vcombine.low %v2346_v56, %v2347_v11  ;;  %2915 = vmatpush1.bf16.msra.mxu1 %v5233_v33  ;;  %v2695_v54 = vld [vmem:[#allocation3 + $0xa8] sm:$0xff]  ;;  %v5252_v56 = vcombine.high %v2723_v3, %v2724_v5 }
 0x39d   : > { %v1763_v59 = vmax.f32 %v1729_v1, 0.0  ;;  %v1731_v61 = vadd.f32 %v1730_v58, %v6134_v55  ;;  %2572 = vmatpush2.bf16.msra.mxu0 %v5211_v53  ;;  %v2345_v55 = vld [vmem:[#allocation3 + $0x460] sm:$0xff]  ;;  %2916 = vmatprep.subr.bf16.mxu1 %v5232_v34  ;;  %v5226_v53 = vcombine.high %v2697_v47, %v2698_v48  ;;  %v2696_v1 = vld [vmem:[#allocation3 + $0xe8] sm:$0xff] }
 0x39e   : > { %2573 = vmatprep.subr.bf16.mxu0 %v5210_v8  ;;  %v5206_v14 = vcombine.high %v2344_v13, %v2345_v55  ;;  %v5205_v15 = vcombine.low %v2344_v13, %v2345_v55  ;;  %v6171_v16 = vpop.f32.mrf.mxu1  ;;  %v5224_v58 = vcombine.high %v2695_v54, %v2696_v1  ;;  %v2721_v11 = vld [vmem:[#allocation3 + $0x728] sm:$0xff]  ;;  %v5251_v13 = vcombine.low %v2723_v3, %v2724_v5 }
 0x39f   : > { %v1764_v62 = vmax.f32 %v1731_v61, 0.0  ;;  %v1820_v63 = vpack.c.bf16 %v1763_v59, %v1761_v57  ;;  %v5225_v57 = vcombine.low %v2697_v47, %v2698_v48  ;;  %v2693_v59 = vld [vmem:[#allocation3 + $0x28] sm:$0xff] }
 0x3a0   : > { %v6173_v49 = vpop.f32.mrf.mxu1  ;;  %2917 = vmatpush1.bf16.msra.mxu1 %v5231_v4  ;;  %v2694_v61 = vld [vmem:[#allocation3 + $0x68] sm:$0xff] }
 0x3a1   : > { %v1821_v0 = vpack.c.bf16 %v1764_v62, %v1762_v23  ;;  %2574 = vmatpush2.bf16.msra.mxu0 %v5209_v9  ;;  %2918 = vmatprep.subr.bf16.mxu1 %v5230_v6  ;;  %v5221_v9 = vcombine.low %v2693_v59, %v2694_v61  ;;  %v2718_v22 = vld [vmem:[#allocation3 + $0x668] sm:$0xff] }
 0x3a2   : > { %2575 = vmatprep.subr.bf16.mxu0 %v5208_v50  ;;  %v6175_v32 = vpop.f32.mrf.mxu1  ;;  %v2722_v50 = vld [vmem:[#allocation3 + $0x768] sm:$0xff]  ;;  %v5246_v29 = vcombine.high %v2717_v20, %v2718_v22  ;;  %v5245_v35 = vcombine.low %v2717_v20, %v2718_v22 }
 0x3a3   : > { %2084 = vmatprep.mubr.bf16.mxu0 %v1821_v0  ;;  %v5222_v0 = vcombine.high %v2693_v59, %v2694_v61  ;;  %v5250_v55 = vcombine.high %v2721_v11, %v2722_v50  ;;  %v5249_v18 = vcombine.low %v2721_v11, %v2722_v50  ;;  %v2715_v31 = vld [vmem:[#allocation3 + $0x5a8] sm:$0xff] }
 0x3a4   : > { %2085 = vmatmul.mubr.bf16.gmra.mxu0 %v1820_v63  ;;  %v6177_v7 = vpop.f32.mrf.mxu1  ;;  %2919 = vmatpush1.bf16.msra.mxu1 %v5229_v41  ;;  %v5223_v63 = vcombine.low %v2695_v54, %v2696_v1  ;;  %v2716_v33 = vld [vmem:[#allocation3 + $0x5e8] sm:$0xff] }
 0x3a5   : > { %2576 = vmatpush2.bf16.msra.mxu0 %v5207_v12  ;;  %2920 = vmatprep.subr.bf16.mxu1 %v5228_v42  ;;  %v5244_v36 = vcombine.high %v2715_v31, %v2716_v33  ;;  %v5243_v6 = vcombine.low %v2715_v31, %v2716_v33  ;;  %v1765_v42 = vld [vmem:[%s6905_s3 + $0x8] sm:$0x3] }
 0x3a6   : > { %2577 = vmatprep.subr.bf16.mxu0 %v5206_v14  ;;  %v6179_v37 = vpop.f32.mrf.mxu1  ;;  %v2719_v14 = vld [vmem:[#allocation3 + $0x6a8] sm:$0xff]  ;;  %v6214_v54 = vrot.slane %v1765_v42, %v5955_v46 }
 0x3a8   : > { %v6181_v43 = vpop.f32.mrf.mxu1  ;;  %2921 = vmatpush1.bf16.msra.mxu1 %v5227_v52  ;;  %v6210_v52 = vrot.slane %v1765_v42, %v5952_v45 }
 0x3a9   : > { %2578 = vmatpush2.bf16.msra.mxu0 %v5205_v15  ;;  %2922 = vmatprep.subr.bf16.mxu1 %v5226_v53  ;;  %v2720_v15 = vld [vmem:[#allocation3 + $0x6e8] sm:$0xff] }
 0x3aa   : > { %v6183_v24 = vpop.f32.mrf.mxu1  ;;  %v5248_v19 = vcombine.high %v2719_v14, %v2720_v15  ;;  %v5247_v28 = vcombine.low %v2719_v14, %v2720_v15 }
 0x3ac   : > { %v6185_v23 = vpop.f32.mrf.mxu1  ;;  %2923 = vmatpush1.bf16.msra.mxu1 %v5225_v57 }
 0x3ad   : > { %2924 = vmatprep.subr.bf16.mxu1 %v5224_v58 }
 0x3ae   : > { %v6187_v62 = vpop.f32.mrf.mxu1 }
 0x3b0   : > { %v6189_v8 = vpop.f32.mrf.mxu1  ;;  %2925 = vmatpush1.bf16.msra.mxu1 %v5223_v63 }
 0x3b1   : > { %2926 = vmatprep.subr.bf16.mxu1 %v5222_v0 }
 0x3b2   : > { %v6191_v12 = vpop.f32.mrf.mxu1 }
 0x3b4   : > { %2927 = vmatpush1.bf16.msra.mxu1 %v5221_v9  ;;  %v6193_v17 = vpop.f32.mrf.mxu1 }
 0x3b5   : > { %2928 = vmatprep.subr.bf16.mxu1 %v5252_v56 }
 0x3b6   : > { %v6195_v25 = vpop.f32.mrf.mxu1 }
 0x3b8   : > { %2929 = vmatpush2.bf16.msra.mxu1 %v5251_v13  ;;  %v6197_v34 = vpop.f32.mrf.mxu1 }
 0x3b9   : > { %2930 = vmatprep.subr.bf16.mxu1 %v5250_v55 }
 0x3ba   : > { %v6199_v4 = vpop.f32.mrf.mxu1 }
 0x3bc   : > { %2931 = vmatpush2.bf16.msra.mxu1 %v5249_v18  ;;  %v6201_v38 = vpop.f32.mrf.mxu1 }
 0x3bd   : > { %2932 = vmatprep.subr.bf16.mxu1 %v5248_v19 }
 0x3be   : > { %v6203_v41 = vpop.f32.mrf.mxu1 }
 0x3c0   : > { %2933 = vmatpush2.bf16.msra.mxu1 %v5247_v28  ;;  %v6216_v57 = vpop.f32.mrf.mxu1 }
 0x3c1   : > { %2934 = vmatprep.subr.bf16.mxu1 %v5246_v29 }
 0x3c2   : > { %v6223_v5 = vpop.f32.mrf.mxu1 }
 0x3c4   : > { %2935 = vmatpush2.bf16.msra.mxu1 %v5245_v35  ;;  %v6228_v15 = vpop.f32.mrf.mxu1 }
 0x3c5   : > { %2936 = vmatprep.subr.bf16.mxu1 %v5244_v36 }
 0x3c8   : > { %2937 = vmatpush2.bf16.msra.mxu1 %v5243_v6 }
 0x42c   : > { %v2016_v39 = vpop.f32.mrf.mxu0 }
 0x42d   : > { %v2174_v53 = vadd.f32 %v6171_v16, %v2016_v39 }
 0x42e   : > { %v2018_v47 = vpop.f32.mrf.mxu0 }
 0x42f   : > { %v2176_v48 = vadd.f32 %v6173_v49, %v2018_v47  ;;  %v2263_v0 = vadd.f32 %v6214_v54, %v2174_v53 }
 0x430   : > { %v2020_v1 = vpop.f32.mrf.mxu0 }
 0x431   : > { %v2178_v58 = vadd.f32 %v6175_v32, %v2020_v1  ;;  %v2264_v61 = vadd.f32 %v6210_v52, %v2176_v48  ;;  %v2295_v13 = vmax.f32 %v2263_v0, 0.0 }
 0x432   : > { %v2022_v59 = vpop.f32.mrf.mxu0 }
 0x433   : > { %v2265_v63 = vadd.f32 %v6214_v54, %v2178_v58  ;;  %v2180_v49 = vadd.f32 %v6177_v7, %v2022_v59  ;;  %v2296_v11 = vmax.f32 %v2264_v61, 0.0 }
 0x434   : > { %v2026_v3 = vpop.f32.mrf.mxu0 }
 0x435   : > { %v2266_v16 = vadd.f32 %v6210_v52, %v2180_v49  ;;  %v2297_v9 = vmax.f32 %v2265_v63, 0.0  ;;  %v2184_v55 = vadd.f32 %v6179_v37, %v2026_v3  ;;  %v6235_v37 = vpop.f32.mrf.mxu1 }
 0x436   : > { %v2028_v56 = vpop.f32.mrf.mxu0 }
 0x437   : > { %v2298_v50 = vmax.f32 %v2266_v16, 0.0  ;;  %v2186_v32 = vadd.f32 %v6181_v43, %v2028_v56  ;;  %v2360_v19 = vpack.c.bf16 %v2297_v9, %v2295_v13  ;;  %v2267_v43 = vadd.f32 %v6214_v54, %v2184_v55 }
 0x438   : > { %v2030_v14 = vpop.f32.mrf.mxu0 }
 0x439   : > { %v2188_v7 = vadd.f32 %v6183_v24, %v2030_v14  ;;  %v2361_v18 = vpack.c.bf16 %v2298_v50, %v2296_v11  ;;  %v2268_v22 = vadd.f32 %v6210_v52, %v2186_v32  ;;  %v2299_v42 = vmax.f32 %v2267_v43, 0.0 }
 0x43a   : > { %v2032_v20 = vpop.f32.mrf.mxu0 }
 0x43b   : > { %v2269_v28 = vadd.f32 %v6214_v54, %v2188_v7  ;;  %v2190_v29 = vadd.f32 %v6185_v23, %v2032_v20  ;;  %2579 = vmatprep.mubr.bf16.mxu0 %v2361_v18  ;;  %v2300_v36 = vmax.f32 %v2268_v22, 0.0  ;;  %v2225_v23 = vpop.f32.mrf.mxu1 }
 0x43c   : > { %v2036_v31 = vpop.f32.mrf.mxu0  ;;  %2580 = vmatmul.mubr.bf16.vlgmr.msra.gmra.mxu0 %v2360_v19 }
 0x43d   : > { %v2270_v33 = vadd.f32 %v6210_v52, %v2190_v29  ;;  %v2301_v35 = vmax.f32 %v2269_v28, 0.0  ;;  %v2194_v47 = vadd.f32 %v6187_v62, %v2036_v31  ;;  %v2227_v3 = vpop.f32.mrf.mxu1 }
 0x43e   : > { %v2038_v24 = vpop.f32.mrf.mxu0 }
 0x43f   : > { %v2302_v6 = vmax.f32 %v2270_v33, 0.0  ;;  %v2196_v39 = vadd.f32 %v6189_v8, %v2038_v24  ;;  %v2362_v59 = vpack.c.bf16 %v2301_v35, %v2299_v42  ;;  %v2271_v0 = vadd.f32 %v6214_v54, %v2194_v47  ;;  %v2229_v55 = vpop.f32.mrf.mxu1 }
 0x440   : > { %v2040_v48 = vpop.f32.mrf.mxu0 }
 0x441   : > { %v2198_v53 = vadd.f32 %v6191_v12, %v2040_v48  ;;  %v2363_v1 = vpack.c.bf16 %v2302_v6, %v2300_v36  ;;  %v2272_v61 = vadd.f32 %v6210_v52, %v2196_v39  ;;  %v2303_v50 = vmax.f32 %v2271_v0, 0.0  ;;  %v2233_v29 = vpop.f32.mrf.mxu1 }
 0x442   : > { %v2042_v58 = vpop.f32.mrf.mxu0 }
 0x443   : > { %v2273_v63 = vadd.f32 %v6214_v54, %v2198_v53  ;;  %v2200_v49 = vadd.f32 %v6193_v17, %v2042_v58  ;;  %2589 = vmatprep.mubr.bf16.mxu0 %v2363_v1  ;;  %v2304_v12 = vmax.f32 %v2272_v61, 0.0  ;;  %v2235_v39 = vpop.f32.mrf.mxu1 }
 0x444   : > { %v2046_v8 = vpop.f32.mrf.mxu0  ;;  %2590 = vmatmul.mubr.bf16.gmra.mxu0 %v2362_v59 }
 0x445   : > { %v2274_v62 = vadd.f32 %v6210_v52, %v2200_v49  ;;  %v2305_v16 = vmax.f32 %v2273_v63, 0.0  ;;  %v2204_v32 = vadd.f32 %v6195_v25, %v2046_v8  ;;  %v2237_v61 = vpop.f32.mrf.mxu1 }
 0x446   : > { %v2048_v9 = vpop.f32.mrf.mxu0 }
 0x447   : > { %v2306_v56 = vmax.f32 %v2274_v62, 0.0  ;;  %v2206_v11 = vadd.f32 %v6197_v34, %v2048_v9  ;;  %v2364_v18 = vpack.c.bf16 %v2305_v16, %v2303_v50  ;;  %v2275_v28 = vadd.f32 %v6214_v54, %v2204_v32 }
 0x448   : > { %v2050_v13 = vpop.f32.mrf.mxu0 }
 0x449   : > { %v2208_v17 = vadd.f32 %v6199_v4, %v2050_v13  ;;  %v2365_v14 = vpack.c.bf16 %v2306_v56, %v2304_v12  ;;  %v2276_v19 = vadd.f32 %v6210_v52, %v2206_v11  ;;  %v2307_v24 = vmax.f32 %v2275_v28, 0.0  ;;  %v2239_v12 = vpop.f32.mrf.mxu1 }
 0x44a   : > { %v2052_v7 = vpop.f32.mrf.mxu0 }
 0x44b   : > { %v2277_v20 = vadd.f32 %v6214_v54, %v2208_v17  ;;  %v2210_v22 = vadd.f32 %v6201_v38, %v2052_v7  ;;  %2599 = vmatprep.mubr.bf16.mxu0 %v2365_v14  ;;  %v2308_v4 = vmax.f32 %v2276_v19, 0.0 }
 0x44c   : > { %v2056_v34 = vpop.f32.mrf.mxu0  ;;  %2600 = vmatmul.mubr.bf16.gmra.mxu0 %v2364_v18 }
 0x44d   : > { %v2278_v25 = vadd.f32 %v6210_v52, %v2210_v22  ;;  %v2309_v43 = vmax.f32 %v2277_v20, 0.0  ;;  %v2214_v36 = vadd.f32 %v6203_v41, %v2056_v34 }
 0x44e   : > { %v2058_v31 = vpop.f32.mrf.mxu0 }
 0x44f   : > { %v2310_v33 = vmax.f32 %v2278_v25, 0.0  ;;  %v2216_v35 = vadd.f32 %v6216_v57, %v2058_v31  ;;  %v2366_v48 = vpack.c.bf16 %v2309_v43, %v2307_v24  ;;  %v2279_v59 = vadd.f32 %v6214_v54, %v2214_v36 }
 0x450   : > { %v2060_v6 = vpop.f32.mrf.mxu0 }
 0x451   : > { %v2218_v38 = vadd.f32 %v6223_v5, %v2060_v6  ;;  %v2367_v42 = vpack.c.bf16 %v2310_v33, %v2308_v4  ;;  %v2280_v53 = vadd.f32 %v6210_v52, %v2216_v35  ;;  %v2311_v62 = vmax.f32 %v2279_v59, 0.0 }
 0x452   : > { %v2062_v47 = vpop.f32.mrf.mxu0 }
 0x453   : > { %v2281_v1 = vadd.f32 %v6214_v54, %v2218_v38  ;;  %v2220_v58 = vadd.f32 %v6228_v15, %v2062_v47  ;;  %2609 = vmatprep.mubr.bf16.mxu0 %v2367_v42  ;;  %v2312_v5 = vmax.f32 %v2280_v53, 0.0 }
 0x454   : > { %v2066_v57 = vpop.f32.mrf.mxu0  ;;  %2610 = vmatmul.mubr.bf16.gmra.mxu0 %v2366_v48 }
 0x455   : > { %v2282_v41 = vadd.f32 %v6210_v52, %v2220_v58  ;;  %v2313_v63 = vmax.f32 %v2281_v1, 0.0  ;;  %v2224_v16 = vadd.f32 %v6235_v37, %v2066_v57 }
 0x456   : > { %v2068_v49 = vpop.f32.mrf.mxu0 }
 0x457   : > { %v2314_v0 = vmax.f32 %v2282_v41, 0.0  ;;  %v2226_v8 = vadd.f32 %v2225_v23, %v2068_v49  ;;  %v2368_v11 = vpack.c.bf16 %v2313_v63, %v2311_v62  ;;  %v2283_v14 = vadd.f32 %v6214_v54, %v2224_v16  ;;  %v2243_v23 = vpop.f32.mrf.mxu1 }
 0x458   : > { %v2070_v9 = vpop.f32.mrf.mxu0 }
 0x459   : > { %v2228_v56 = vadd.f32 %v2227_v3, %v2070_v9  ;;  %v2369_v15 = vpack.c.bf16 %v2314_v0, %v2312_v5  ;;  %v2284_v32 = vadd.f32 %v6210_v52, %v2226_v8  ;;  %v2315_v28 = vmax.f32 %v2283_v14, 0.0  ;;  %v2245_v43 = vpop.f32.mrf.mxu1 }
 0x45a   : > { %v2072_v50 = vpop.f32.mrf.mxu0 }
 0x45b   : > { %v2285_v13 = vadd.f32 %v6214_v54, %v2228_v56  ;;  %v2230_v17 = vadd.f32 %v2229_v55, %v2072_v50  ;;  %2619 = vmatprep.mubr.bf16.mxu0 %v2369_v15  ;;  %v2316_v20 = vmax.f32 %v2284_v32, 0.0  ;;  %v2247_v42 = vpop.f32.mrf.mxu1 }
 0x45c   : > { %v2076_v7 = vpop.f32.mrf.mxu0  ;;  %2620 = vmatmul.mubr.bf16.gmra.mxu0 %v2368_v11 }
 0x45d   : > { %v2286_v18 = vadd.f32 %v6210_v52, %v2230_v17  ;;  %v2317_v37 = vmax.f32 %v2285_v13, 0.0  ;;  %v2234_v34 = vadd.f32 %v2233_v29, %v2076_v7  ;;  %v2713_v13 = vld [vmem:[#allocation3 + $0x528] sm:$0xff] }
 0x45e   : > { %v2078_v19 = vpop.f32.mrf.mxu0  ;;  %v2714_v17 = vld [vmem:[#allocation3 + $0x568] sm:$0xff] }
 0x45f   : > { %v2318_v3 = vmax.f32 %v2286_v18, 0.0  ;;  %v2236_v22 = vadd.f32 %v2235_v39, %v2078_v19  ;;  %v2370_v55 = vpack.c.bf16 %v2317_v37, %v2315_v28  ;;  %v2287_v6 = vadd.f32 %v6214_v54, %v2234_v34  ;;  %v2712_v18 = vld [vmem:[#allocation3 + $0x4e8] sm:$0xff]  ;;  %v3073_v28 = vld [vmem:[#allocation3 + $0x3f0] sm:$0xff] }
 0x460   : > { %v2080_v25 = vpop.f32.mrf.mxu0  ;;  %v5242_v14 = vcombine.high %v2713_v13, %v2714_v17  ;;  %v5241_v7 = vcombine.low %v2713_v13, %v2714_v17  ;;  %v2710_v19 = vld [vmem:[#allocation3 + $0x468] sm:$0xff]  ;;  %v3070_v34 = vld [vmem:[#allocation3 + $0x330] sm:$0xff] }
 0x461   : > { %v2238_v31 = vadd.f32 %v2237_v61, %v2080_v25  ;;  %v2371_v4 = vpack.c.bf16 %v2318_v3, %v2316_v20  ;;  %v2288_v35 = vadd.f32 %v6210_v52, %v2236_v22  ;;  %v2319_v58 = vmax.f32 %v2287_v6, 0.0  ;;  %v2249_v61 = vpop.f32.mrf.mxu1  ;;  %v3072_v22 = vld [vmem:[#allocation3 + $0x3b0] sm:$0xff] }
 0x462   : > { %v2082_v33 = vpop.f32.mrf.mxu0  ;;  %2938 = vmatprep.subr.bf16.mxu1 %v5242_v14  ;;  %v5267_v25 = vcombine.low %v3072_v22, %v3073_v28  ;;  %v3067_v6 = vld [vmem:[#allocation3 + $0x270] sm:$0xff] }
 0x463   : > { %v2289_v24 = vadd.f32 %v6214_v54, %v2238_v31  ;;  %v2240_v36 = vadd.f32 %v2239_v12, %v2082_v33  ;;  %2629 = vmatprep.mubr.bf16.mxu0 %v2371_v4  ;;  %v2320_v48 = vmax.f32 %v2288_v35, 0.0  ;;  %2939 = vmatpush2.bf16.msra.mxu1 %v5241_v7  ;;  %v3071_v31 = vld [vmem:[#allocation3 + $0x370] sm:$0xff] }
 0x464   : > { %v2086_v38 = vpop.f32.mrf.mxu0  ;;  %2630 = vmatmul.mubr.bf16.gmra.mxu0 %v2370_v55  ;;  %v5266_v4 = vcombine.high %v3070_v34, %v3071_v31  ;;  %v3068_v55 = vld [vmem:[#allocation3 + $0x2b0] sm:$0xff]  ;;  %v5265_v35 = vcombine.low %v3070_v34, %v3071_v31 }
 0x465   : > { %v2290_v39 = vadd.f32 %v6210_v52, %v2240_v36  ;;  %v2321_v29 = vmax.f32 %v2289_v24, 0.0  ;;  %v2244_v59 = vadd.f32 %v2243_v23, %v2086_v38  ;;  %v2711_v23 = vld [vmem:[#allocation3 + $0x4a8] sm:$0xff]  ;;  %v3069_v33 = vld [vmem:[#allocation3 + $0x2f0] sm:$0xff] }
 0x466   : > { %v2088_v47 = vpop.f32.mrf.mxu0  ;;  %v5239_v37 = vcombine.low %v2711_v23, %v2712_v18  ;;  %v5264_v24 = vcombine.high %v3068_v55, %v3069_v33  ;;  %v3066_v36 = vld [vmem:[#allocation3 + $0x230] sm:$0xff]  ;;  %v5263_v38 = vcombine.low %v3068_v55, %v3069_v33 }
 0x467   : > { %v2322_v53 = vmax.f32 %v2290_v39, 0.0  ;;  %v2246_v1 = vadd.f32 %v2245_v43, %v2088_v47  ;;  %v2372_v49 = vpack.c.bf16 %v2321_v29, %v2319_v58  ;;  %v2291_v16 = vadd.f32 %v6214_v54, %v2244_v59  ;;  %v3064_v39 = vld [vmem:[#allocation3 + $0x1b0] sm:$0xff] }
 0x468   : > { %v2090_v57 = vpop.f32.mrf.mxu0  ;;  %v5268_v43 = vcombine.high %v3072_v22, %v3073_v28  ;;  %v3065_v29 = vld [vmem:[#allocation3 + $0x1f0] sm:$0xff]  ;;  %v5261_v47 = vcombine.low %v3066_v36, %v3067_v6  ;;  %v2327_v22 = vld [vmem:[%s6905_s3 + $0xa] sm:$0x3] }
 0x469   : > { %v2248_v41 = vadd.f32 %v2247_v42, %v2090_v57  ;;  %v2373_v63 = vpack.c.bf16 %v2322_v53, %v2320_v48  ;;  %v2292_v0 = vadd.f32 %v6210_v52, %v2246_v1  ;;  %v2323_v11 = vmax.f32 %v2291_v16, 0.0  ;;  %v3062_v53 = vld [vmem:[#allocation3 + $0x130] sm:$0xff] }
 0x46a   : > { %v2092_v5 = vpop.f32.mrf.mxu0  ;;  %3277 = vmatprep.subr.bf16.mxu0 %v5268_v43  ;;  %v5262_v42 = vcombine.high %v3066_v36, %v3067_v6  ;;  %v5260_v48 = vcombine.high %v3064_v39, %v3065_v29  ;;  %v3063_v1 = vld [vmem:[#allocation3 + $0x170] sm:$0xff]  ;;  %v5259_v58 = vcombine.low %v3064_v39, %v3065_v29  ;;  %v6279_v34 = vrot.slane %v2327_v22, %v5952_v45 }
 0x46b   : > { %v2293_v8 = vadd.f32 %v6214_v54, %v2248_v41  ;;  %v2250_v62 = vadd.f32 %v2249_v61, %v2092_v5  ;;  %2639 = vmatprep.mubr.bf16.mxu0 %v2373_v63  ;;  %v2324_v56 = vmax.f32 %v2292_v0, 0.0  ;;  %v5240_v54 = vcombine.high %v2711_v23, %v2712_v18  ;;  %3278 = vmatpush1.bf16.msra.mxu0 %v5267_v25  ;;  %v3060_v57 = vld [vmem:[#allocation3 + $0xb0] sm:$0xff] }
 0x46c   : > { %2640 = vmatmul.mubr.bf16.gmra.mxu0 %v2372_v49  ;;  %3279 = vmatprep.subr.bf16.mxu0 %v5266_v4  ;;  %v5258_v59 = vcombine.high %v3062_v53, %v3063_v1  ;;  %v3061_v61 = vld [vmem:[#allocation3 + $0xf0] sm:$0xff]  ;;  %v5257_v41 = vcombine.low %v3062_v53, %v3063_v1  ;;  %v6282_v25 = vrot.slane %v2327_v22, %v5955_v46 }
 0x46d   : > { %v2294_v9 = vadd.f32 %v6210_v52, %v2250_v62  ;;  %v2325_v12 = vmax.f32 %v2293_v8, 0.0  ;;  %2940 = vmatprep.subr.bf16.mxu1 %v5240_v54  ;;  %v2709_v52 = vld [vmem:[#allocation3 + $0x428] sm:$0xff]  ;;  %v5256_v63 = vcombine.high %v3060_v57, %v3061_v61  ;;  %v3058_v49 = vld [vmem:[#allocation3 + $0x30] sm:$0xff]  ;;  %v5255_v0 = vcombine.low %v3060_v57, %v3061_v61 }
 0x46e   : > { %2941 = vmatpush2.bf16.msra.mxu1 %v5239_v37  ;;  %v5238_v20 = vcombine.high %v2709_v52, %v2710_v19  ;;  %v5237_v3 = vcombine.low %v2709_v52, %v2710_v19  ;;  %v3059_v5 = vld [vmem:[#allocation3 + $0x70] sm:$0xff] }
 0x46f   : > { %v2326_v15 = vmax.f32 %v2294_v9, 0.0  ;;  %v2374_v32 = vpack.c.bf16 %v2325_v12, %v2323_v11  ;;  %3280 = vmatpush1.bf16.msra.mxu0 %v5265_v35  ;;  %v5254_v8 = vcombine.high %v3058_v49, %v3059_v5  ;;  %v3088_v62 = vld [vmem:[#allocation3 + $0x7b0] sm:$0xff]  ;;  %v5253_v9 = vcombine.low %v3058_v49, %v3059_v5 }
 0x470   : > { %2942 = vmatprep.subr.bf16.mxu1 %v5238_v20  ;;  %3281 = vmatprep.subr.bf16.mxu0 %v5264_v24  ;;  %v3089_v16 = vld [vmem:[#allocation3 + $0x7f0] sm:$0xff] }
 0x471   : > { %v2375_v50 = vpack.c.bf16 %v2326_v15, %v2324_v56  ;;  %v5284_v12 = vcombine.high %v3088_v62, %v3089_v16  ;;  %v3086_v56 = vld [vmem:[#allocation3 + $0x730] sm:$0xff]  ;;  %v5283_v11 = vcombine.low %v3088_v62, %v3089_v16 }
 0x472   : > { %2943 = vmatpush2.bf16.msra.mxu1 %v5237_v3  ;;  %v3087_v15 = vld [vmem:[#allocation3 + $0x770] sm:$0xff] }
 0x473   : > { %2649 = vmatprep.mubr.bf16.mxu0 %v2375_v50  ;;  %3282 = vmatpush1.bf16.msra.mxu0 %v5263_v38  ;;  %v5282_v50 = vcombine.high %v3086_v56, %v3087_v15  ;;  %v3085_v13 = vld [vmem:[#allocation3 + $0x6f0] sm:$0xff]  ;;  %v5281_v17 = vcombine.low %v3086_v56, %v3087_v15 }
 0x474   : > { %2650 = vmatmul.mubr.bf16.gmra.mxu0 %v2374_v32  ;;  %3283 = vmatprep.subr.bf16.mxu0 %v5262_v42  ;;  %v3084_v32 = vld [vmem:[#allocation3 + $0x6b0] sm:$0xff] }
 0x475   : > { %v5280_v14 = vcombine.high %v3084_v32, %v3085_v13  ;;  %v3082_v7 = vld [vmem:[#allocation3 + $0x630] sm:$0xff]  ;;  %v5279_v18 = vcombine.low %v3084_v32, %v3085_v13 }
 0x476   : > { %v3083_v23 = vld [vmem:[#allocation3 + $0x670] sm:$0xff] }
 0x477   : > { %3284 = vmatpush1.bf16.msra.mxu0 %v5261_v47  ;;  %v5278_v54 = vcombine.high %v3082_v7, %v3083_v23  ;;  %v3080_v37 = vld [vmem:[#allocation3 + $0x5b0] sm:$0xff]  ;;  %v5277_v19 = vcombine.low %v3082_v7, %v3083_v23 }
 0x478   : > { %3285 = vmatprep.subr.bf16.mxu0 %v5260_v48  ;;  %v3081_v52 = vld [vmem:[#allocation3 + $0x5f0] sm:$0xff] }
 0x479   : > { %v5276_v20 = vcombine.high %v3080_v37, %v3081_v52  ;;  %v5275_v3 = vcombine.low %v3080_v37, %v3081_v52 }
 0x47b   : > { %3286 = vmatpush1.bf16.msra.mxu0 %v5259_v58 }
 0x47c   : > { %3287 = vmatprep.subr.bf16.mxu0 %v5258_v59 }
 0x47f   : > { %3288 = vmatpush1.bf16.msra.mxu0 %v5257_v41 }
 0x480   : > { %3289 = vmatprep.subr.bf16.mxu0 %v5256_v63 }
 0x483   : > { %3290 = vmatpush1.bf16.msra.mxu0 %v5255_v0 }
 0x484   : > { %3291 = vmatprep.subr.bf16.mxu0 %v5254_v8 }
 0x487   : > { %3292 = vmatpush1.bf16.msra.mxu0 %v5253_v9 }
 0x488   : > { %3293 = vmatprep.subr.bf16.mxu0 %v5284_v12 }
 0x48b   : > { %3294 = vmatpush2.bf16.msra.mxu0 %v5283_v11 }
 0x48c   : > { %3295 = vmatprep.subr.bf16.mxu0 %v5282_v50 }
 0x48f   : > { %3296 = vmatpush2.bf16.msra.mxu0 %v5281_v17 }
 0x490   : > { %3297 = vmatprep.subr.bf16.mxu0 %v5280_v14 }
 0x493   : > { %3298 = vmatpush2.bf16.msra.mxu0 %v5279_v18 }
 0x494   : > { %3299 = vmatprep.subr.bf16.mxu0 %v5278_v54 }
 0x497   : > { %3300 = vmatpush2.bf16.msra.mxu0 %v5277_v19 }
 0x498   : > { %3301 = vmatprep.subr.bf16.mxu0 %v5276_v20 }
 0x49b   : > { %3302 = vmatpush2.bf16.msra.mxu0 %v5275_v3 }
 0x4fc   : > { %v2581_v28 = vpop.f32.mrf.mxu0 }
 0x4fd   : > { %v2582_v33 = vadd.f32 %v2581_v28, %v6282_v25 }
 0x4fe   : > { %v2583_v43 = vpop.f32.mrf.mxu0 }
 0x4ff   : > { %v2584_v4 = vadd.f32 %v2583_v43, %v6279_v34  ;;  %v2660_v39 = vmax.f32 %v2582_v33, 0.0 }
 0x500   : > { %v2585_v31 = vpop.f32.mrf.mxu0 }
 0x501   : > { %v2586_v55 = vadd.f32 %v2585_v31, %v6282_v25  ;;  %v2661_v38 = vmax.f32 %v2584_v4, 0.0 }
 0x502   : > { %v2587_v35 = vpop.f32.mrf.mxu0 }
 0x503   : > { %v2588_v24 = vadd.f32 %v2587_v35, %v6279_v34  ;;  %v2662_v36 = vmax.f32 %v2586_v55, 0.0 }
 0x504   : > { %v2591_v6 = vpop.f32.mrf.mxu0 }
 0x505   : > { %v2663_v42 = vmax.f32 %v2588_v24, 0.0  ;;  %v2725_v48 = vpack.c.bf16 %v2662_v36, %v2660_v39  ;;  %v2592_v59 = vadd.f32 %v2591_v6, %v6282_v25 }
 0x506   : > { %v2593_v29 = vpop.f32.mrf.mxu0 }
 0x507   : > { %v2726_v47 = vpack.c.bf16 %v2663_v42, %v2661_v38  ;;  %v2594_v1 = vadd.f32 %v2593_v29, %v6279_v34  ;;  %v2664_v0 = vmax.f32 %v2592_v59, 0.0 }
 0x508   : > { %v2595_v53 = vpop.f32.mrf.mxu0 }
 0x509   : > { %v2596_v58 = vadd.f32 %v2595_v53, %v6282_v25  ;;  %2944 = vmatprep.mubr.bf16.mxu1 %v2726_v47  ;;  %v2665_v49 = vmax.f32 %v2594_v1, 0.0 }
 0x50a   : > { %v2597_v57 = vpop.f32.mrf.mxu0  ;;  %2945 = vmatmul.mubr.bf16.vlgmr.msra.gmra.mxu1 %v2725_v48 }
 0x50b   : > { %v2598_v61 = vadd.f32 %v2597_v57, %v6279_v34  ;;  %v2666_v41 = vmax.f32 %v2596_v58, 0.0 }
 0x50c   : > { %v2601_v63 = vpop.f32.mrf.mxu0 }
 0x50d   : > { %v2667_v5 = vmax.f32 %v2598_v61, 0.0  ;;  %v2727_v16 = vpack.c.bf16 %v2666_v41, %v2664_v0  ;;  %v2602_v15 = vadd.f32 %v2601_v63, %v6282_v25 }
 0x50e   : > { %v2603_v8 = vpop.f32.mrf.mxu0 }
 0x50f   : > { %v2728_v62 = vpack.c.bf16 %v2667_v5, %v2665_v49  ;;  %v2604_v12 = vadd.f32 %v2603_v8, %v6279_v34  ;;  %v2668_v7 = vmax.f32 %v2602_v15, 0.0 }
 0x510   : > { %v2605_v9 = vpop.f32.mrf.mxu0 }
 0x511   : > { %v2606_v56 = vadd.f32 %v2605_v9, %v6282_v25  ;;  %2954 = vmatprep.mubr.bf16.mxu1 %v2728_v62  ;;  %v2669_v17 = vmax.f32 %v2604_v12, 0.0 }
 0x512   : > { %v2607_v11 = vpop.f32.mrf.mxu0  ;;  %2955 = vmatmul.mubr.bf16.gmra.mxu1 %v2727_v16 }
 0x513   : > { %v2608_v50 = vadd.f32 %v2607_v11, %v6279_v34  ;;  %v2670_v32 = vmax.f32 %v2606_v56, 0.0 }
 0x514   : > { %v2611_v13 = vpop.f32.mrf.mxu0 }
 0x515   : > { %v2671_v14 = vmax.f32 %v2608_v50, 0.0  ;;  %v2729_v54 = vpack.c.bf16 %v2670_v32, %v2668_v7  ;;  %v2612_v20 = vadd.f32 %v2611_v13, %v6282_v25 }
 0x516   : > { %v2613_v23 = vpop.f32.mrf.mxu0 }
 0x517   : > { %v2730_v18 = vpack.c.bf16 %v2671_v14, %v2669_v17  ;;  %v2614_v52 = vadd.f32 %v2613_v23, %v6279_v34  ;;  %v2672_v55 = vmax.f32 %v2612_v20, 0.0 }
 0x518   : > { %v2615_v37 = vpop.f32.mrf.mxu0 }
 0x519   : > { %v2616_v19 = vadd.f32 %v2615_v37, %v6282_v25  ;;  %2964 = vmatprep.mubr.bf16.mxu1 %v2730_v18  ;;  %v2673_v31 = vmax.f32 %v2614_v52, 0.0 }
 0x51a   : > { %v2617_v3 = vpop.f32.mrf.mxu0  ;;  %2965 = vmatmul.mubr.bf16.gmra.mxu1 %v2729_v54 }
 0x51b   : > { %v2618_v22 = vadd.f32 %v2617_v3, %v6279_v34  ;;  %v2674_v28 = vmax.f32 %v2616_v19, 0.0 }
 0x51c   : > { %v2621_v43 = vpop.f32.mrf.mxu0 }
 0x51d   : > { %v2675_v4 = vmax.f32 %v2618_v22, 0.0  ;;  %v2731_v24 = vpack.c.bf16 %v2674_v28, %v2672_v55  ;;  %v2622_v42 = vadd.f32 %v2621_v43, %v6282_v25 }
 0x51e   : > { %v2623_v33 = vpop.f32.mrf.mxu0 }
 0x51f   : > { %v2732_v35 = vpack.c.bf16 %v2675_v4, %v2673_v31  ;;  %v2624_v6 = vadd.f32 %v2623_v33, %v6279_v34  ;;  %v2676_v58 = vmax.f32 %v2622_v42, 0.0 }
 0x520   : > { %v2625_v36 = vpop.f32.mrf.mxu0 }
 0x521   : > { %v2626_v38 = vadd.f32 %v2625_v36, %v6282_v25  ;;  %2974 = vmatprep.mubr.bf16.mxu1 %v2732_v35  ;;  %v2677_v53 = vmax.f32 %v2624_v6, 0.0 }
 0x522   : > { %v2627_v39 = vpop.f32.mrf.mxu0  ;;  %2975 = vmatmul.mubr.bf16.gmra.mxu1 %v2731_v24 }
 0x523   : > { %v2628_v29 = vadd.f32 %v2627_v39, %v6279_v34  ;;  %v2678_v47 = vmax.f32 %v2626_v38, 0.0  ;;  %v3078_v39 = vld [vmem:[#allocation3 + $0x530] sm:$0xff] }
 0x524   : > { %v2631_v48 = vpop.f32.mrf.mxu0 }
 0x525   : > { %v2679_v1 = vmax.f32 %v2628_v29, 0.0  ;;  %v2733_v61 = vpack.c.bf16 %v2678_v47, %v2676_v58  ;;  %v2632_v5 = vadd.f32 %v2631_v48, %v6282_v25  ;;  %v3079_v29 = vld [vmem:[#allocation3 + $0x570] sm:$0xff] }
 0x526   : > { %v2633_v59 = vpop.f32.mrf.mxu0  ;;  %v5274_v47 = vcombine.high %v3078_v39, %v3079_v29  ;;  %v5273_v48 = vcombine.low %v3078_v39, %v3079_v29  ;;  %v3560_v39 = vld [vmem:[#allocation3 + $0x5f8] sm:$0xff] }
 0x527   : > { %v2734_v57 = vpack.c.bf16 %v2679_v1, %v2677_v53  ;;  %v2634_v63 = vadd.f32 %v2633_v59, %v6279_v34  ;;  %v2680_v56 = vmax.f32 %v2632_v5, 0.0  ;;  %v3076_v53 = vld [vmem:[#allocation3 + $0x4b0] sm:$0xff] }
 0x528   : > { %v2635_v41 = vpop.f32.mrf.mxu0  ;;  %3303 = vmatprep.subr.bf16.mxu0 %v5274_v47  ;;  %v3075_v59 = vld [vmem:[#allocation3 + $0x470] sm:$0xff] }
 0x529   : > { %v2636_v49 = vadd.f32 %v2635_v41, %v6282_v25  ;;  %2984 = vmatprep.mubr.bf16.mxu1 %v2734_v57  ;;  %v2681_v9 = vmax.f32 %v2634_v63, 0.0  ;;  %3304 = vmatpush2.bf16.msra.mxu0 %v5273_v48  ;;  %v3551_v41 = vld [vmem:[#allocation3 + $0x3b8] sm:$0xff] }
 0x52a   : > { %v2637_v0 = vpop.f32.mrf.mxu0  ;;  %2985 = vmatmul.mubr.bf16.gmra.mxu1 %v2733_v61  ;;  %v3552_v63 = vld [vmem:[#allocation3 + $0x3f8] sm:$0xff] }
 0x52b   : > { %v2638_v8 = vadd.f32 %v2637_v0, %v6279_v34  ;;  %v2682_v62 = vmax.f32 %v2636_v49, 0.0  ;;  %v3549_v49 = vld [vmem:[#allocation3 + $0x338] sm:$0xff]  ;;  %v5300_v5 = vcombine.low %v3551_v41, %v3552_v63  ;;  %v5301_v0 = vcombine.high %v3551_v41, %v3552_v63 }
 0x52c   : > { %v2641_v16 = vpop.f32.mrf.mxu0 }
 0x52d   : > { %v2683_v12 = vmax.f32 %v2638_v8, 0.0  ;;  %v2735_v50 = vpack.c.bf16 %v2682_v62, %v2680_v56  ;;  %v2642_v14 = vadd.f32 %v2641_v16, %v6282_v25  ;;  %v3550_v8 = vld [vmem:[#allocation3 + $0x378] sm:$0xff]  ;;  %3757 = vmatprep.subr.bf16.mxu1 %v5301_v0 }
 0x52e   : > { %v2643_v15 = vpop.f32.mrf.mxu0  ;;  %v5299_v62 = vcombine.high %v3549_v49, %v3550_v8  ;;  %v3547_v16 = vld [vmem:[#allocation3 + $0x2b8] sm:$0xff]  ;;  %3758 = vmatpush1.bf16.msra.mxu1 %v5300_v5 }
 0x52f   : > { %v2736_v11 = vpack.c.bf16 %v2683_v12, %v2681_v9  ;;  %v2644_v13 = vadd.f32 %v2643_v15, %v6279_v34  ;;  %v2684_v19 = vmax.f32 %v2642_v14, 0.0  ;;  %v3548_v9 = vld [vmem:[#allocation3 + $0x2f8] sm:$0xff]  ;;  %v5298_v12 = vcombine.low %v3549_v49, %v3550_v8 }
 0x530   : > { %v2645_v32 = vpop.f32.mrf.mxu0  ;;  %3759 = vmatprep.subr.bf16.mxu1 %v5299_v62  ;;  %v5297_v56 = vcombine.high %v3547_v16, %v3548_v9  ;;  %v3545_v15 = vld [vmem:[#allocation3 + $0x238] sm:$0xff] }
 0x531   : > { %v2646_v17 = vadd.f32 %v2645_v32, %v6282_v25  ;;  %2994 = vmatprep.mubr.bf16.mxu1 %v2736_v11  ;;  %v2685_v37 = vmax.f32 %v2644_v13, 0.0  ;;  %v3546_v11 = vld [vmem:[#allocation3 + $0x278] sm:$0xff] }
 0x532   : > { %v2647_v7 = vpop.f32.mrf.mxu0  ;;  %2995 = vmatmul.mubr.bf16.gmra.mxu1 %v2735_v50  ;;  %v5296_v50 = vcombine.low %v3547_v16, %v3548_v9  ;;  %v5295_v51 = vcombine.high %v3545_v15, %v3546_v11  ;;  %v3544_v32 = vld [vmem:[#allocation3 + $0x1f8] sm:$0xff]  ;;  %v5294_v13 = vcombine.low %v3545_v15, %v3546_v11 }
 0x533   : > { %v2648_v23 = vadd.f32 %v2647_v7, %v6279_v34  ;;  %v2686_v18 = vmax.f32 %v2646_v17, 0.0  ;;  %3760 = vmatpush1.bf16.msra.mxu1 %v5298_v12  ;;  %v5293_v17 = vcombine.high %v3543_v27, %v3544_v32  ;;  %v3542_v14 = vld [vmem:[#allocation3 + $0x178] sm:$0xff]  ;;  %v5292_v40 = vcombine.low %v3543_v27, %v3544_v32 }
 0x534   : > { %v2651_v54 = vpop.f32.mrf.mxu0  ;;  %3761 = vmatprep.subr.bf16.mxu1 %v5297_v56  ;;  %v5291_v7 = vcombine.high %v3541_v60, %v3542_v14 }
 0x535   : > { %v2687_v52 = vmax.f32 %v2648_v23, 0.0  ;;  %v2737_v22 = vpack.c.bf16 %v2686_v18, %v2684_v19  ;;  %v2652_v4 = vadd.f32 %v2651_v54, %v6282_v25  ;;  %v3539_v23 = vld [vmem:[#allocation3 + $0xb8] sm:$0xff]  ;;  %v5290_v18 = vcombine.low %v3541_v60, %v3542_v14 }
 0x536   : > { %v2653_v20 = vpop.f32.mrf.mxu0  ;;  %v5289_v10 = vcombine.high %v3539_v23, %v3540_v21  ;;  %v3537_v54 = vld [vmem:[#allocation3 + $0x38] sm:$0xff] }
 0x537   : > { %v2738_v3 = vpack.c.bf16 %v2687_v52, %v2685_v37  ;;  %v2654_v43 = vadd.f32 %v2653_v20, %v6279_v34  ;;  %v2688_v6 = vmax.f32 %v2652_v4, 0.0  ;;  %3762 = vmatpush1.bf16.msra.mxu1 %v5296_v50  ;;  %v3538_v37 = vld [vmem:[#allocation3 + $0x78] sm:$0xff]  ;;  %v5288_v52 = vcombine.low %v3539_v23, %v3540_v21 }
 0x538   : > { %v2655_v28 = vpop.f32.mrf.mxu0  ;;  %3763 = vmatprep.subr.bf16.mxu1 %v5295_v51  ;;  %v5287_v30 = vcombine.high %v3537_v54, %v3538_v37  ;;  %v3567_v19 = vld [vmem:[#allocation3 + $0x7b8] sm:$0xff]  ;;  %v5286_v26 = vcombine.low %v3537_v54, %v3538_v37 }
 0x539   : > { %v2656_v31 = vadd.f32 %v2655_v28, %v6282_v25  ;;  %3004 = vmatprep.mubr.bf16.mxu1 %v2738_v3  ;;  %v2689_v24 = vmax.f32 %v2654_v43, 0.0  ;;  %v3077_v25 = vld [vmem:[#allocation3 + $0x4f0] sm:$0xff]  ;;  %v3568_v20 = vld [vmem:[#allocation3 + $0x7f8] sm:$0xff] }
 0x53a   : > { %v2657_v55 = vpop.f32.mrf.mxu0  ;;  %3005 = vmatmul.mubr.bf16.gmra.mxu1 %v2737_v22  ;;  %v5272_v1 = vcombine.high %v3076_v53, %v3077_v25  ;;  %v5271_v58 = vcombine.low %v3076_v53, %v3077_v25  ;;  %v5317_v3 = vcombine.high %v3567_v19, %v3568_v20  ;;  %v3565_v22 = vld [vmem:[#allocation3 + $0x738] sm:$0xff]  ;;  %v5316_v43 = vcombine.low %v3567_v19, %v3568_v20  ;;  %v2692_v53 = vld [vmem:[%s6905_s3 + $0xc] sm:$0x3] }
 0x53b   : > { %v2658_v33 = vadd.f32 %v2657_v55, %v6279_v34  ;;  %v2690_v35 = vmax.f32 %v2656_v31, 0.0  ;;  %v3074_v34 = vld [vmem:[#allocation3 + $0x430] sm:$0xff]  ;;  %3764 = vmatpush1.bf16.msra.mxu1 %v5294_v13  ;;  %v3566_v28 = vld [vmem:[#allocation3 + $0x778] sm:$0xff] }
 0x53c   : > { %3305 = vmatprep.subr.bf16.mxu0 %v5272_v1  ;;  %v5270_v57 = vcombine.high %v3074_v34, %v3075_v59  ;;  %v5269_v61 = vcombine.low %v3074_v34, %v3075_v59  ;;  %3765 = vmatprep.subr.bf16.mxu1 %v5293_v17  ;;  %v5315_v31 = vcombine.high %v3565_v22, %v3566_v28  ;;  %v3563_v4 = vld [vmem:[#allocation3 + $0x6b8] sm:$0xff] }
 0x53d   : > { %v2691_v36 = vmax.f32 %v2658_v33, 0.0  ;;  %v2739_v42 = vpack.c.bf16 %v2690_v35, %v2688_v6  ;;  %3306 = vmatpush2.bf16.msra.mxu0 %v5271_v58  ;;  %v3564_v55 = vld [vmem:[#allocation3 + $0x6f8] sm:$0xff]  ;;  %v5314_v33 = vcombine.low %v3565_v22, %v3566_v28  ;;  %v6328_v1 = vrot.slane %v2692_v53, %v5952_v45 }
 0x53e   : > { %3307 = vmatprep.subr.bf16.mxu0 %v5270_v57  ;;  %v5313_v35 = vcombine.high %v3563_v4, %v3564_v55  ;;  %v5312_v6 = vcombine.low %v3563_v4, %v3564_v55  ;;  %v6331_v58 = vrot.slane %v2692_v53, %v5955_v46 }
 0x53f   : > { %v2740_v38 = vpack.c.bf16 %v2691_v36, %v2689_v24  ;;  %3766 = vmatpush1.bf16.msra.mxu1 %v5292_v40  ;;  %v3561_v24 = vld [vmem:[#allocation3 + $0x638] sm:$0xff] }
 0x540   : > { %3767 = vmatprep.subr.bf16.mxu1 %v5291_v7  ;;  %v3562_v36 = vld [vmem:[#allocation3 + $0x678] sm:$0xff] }
 0x541   : > { %3014 = vmatprep.mubr.bf16.mxu1 %v2740_v38  ;;  %3308 = vmatpush2.bf16.msra.mxu0 %v5269_v61  ;;  %v5311_v38 = vcombine.high %v3561_v24, %v3562_v36  ;;  %v5310_v29 = vcombine.low %v3561_v24, %v3562_v36 }
 0x542   : > { %3015 = vmatmul.mubr.bf16.gmra.mxu1 %v2739_v42  ;;  %v3559_v42 = vld [vmem:[#allocation3 + $0x5b8] sm:$0xff] }
 0x543   : > { %3768 = vmatpush1.bf16.msra.mxu1 %v5290_v18  ;;  %v5309_v47 = vcombine.high %v3559_v42, %v3560_v39  ;;  %v5308_v48 = vcombine.low %v3559_v42, %v3560_v39 }
 0x544   : > { %3769 = vmatprep.subr.bf16.mxu1 %v5289_v10 }
 0x547   : > { %3770 = vmatpush1.bf16.msra.mxu1 %v5288_v52 }
 0x548   : > { %3771 = vmatprep.subr.bf16.mxu1 %v5287_v30 }
 0x54b   : > { %3772 = vmatpush1.bf16.msra.mxu1 %v5286_v26 }
 0x54c   : > { %3773 = vmatprep.subr.bf16.mxu1 %v5317_v3 }
 0x54f   : > { %3774 = vmatpush2.bf16.msra.mxu1 %v5316_v43 }
 0x550   : > { %3775 = vmatprep.subr.bf16.mxu1 %v5315_v31 }
 0x553   : > { %3776 = vmatpush2.bf16.msra.mxu1 %v5314_v33 }
 0x554   : > { %3777 = vmatprep.subr.bf16.mxu1 %v5313_v35 }
 0x557   : > { %3778 = vmatpush2.bf16.msra.mxu1 %v5312_v6 }
 0x558   : > { %3779 = vmatprep.subr.bf16.mxu1 %v5311_v38 }
 0x55b   : > { %3780 = vmatpush2.bf16.msra.mxu1 %v5310_v29 }
 0x55c   : > { %3781 = vmatprep.subr.bf16.mxu1 %v5309_v47 }
 0x55f   : > { %3782 = vmatpush2.bf16.msra.mxu1 %v5308_v48 }
 0x5ca   : > { %v2946_v25 = vpop.f32.mrf.mxu1 }
 0x5cb   : > { %v2947_v41 = vadd.f32 %v2946_v25, %v6331_v58 }
 0x5cc   : > { %v2948_v34 = vpop.f32.mrf.mxu1 }
 0x5cd   : > { %v2949_v57 = vadd.f32 %v2948_v34, %v6328_v1  ;;  %v3025_v16 = vmax.f32 %v2947_v41, 0.0 }
 0x5ce   : > { %v2950_v59 = vpop.f32.mrf.mxu1 }
 0x5cf   : > { %v2951_v61 = vadd.f32 %v2950_v59, %v6331_v58  ;;  %v3026_v8 = vmax.f32 %v2949_v57, 0.0 }
 0x5d0   : > { %v2952_v63 = vpop.f32.mrf.mxu1 }
 0x5d1   : > { %v2953_v49 = vadd.f32 %v2952_v63, %v6328_v1  ;;  %v3027_v5 = vmax.f32 %v2951_v61, 0.0 }
 0x5d2   : > { %v2956_v0 = vpop.f32.mrf.mxu1 }
 0x5d3   : > { %v3028_v62 = vmax.f32 %v2953_v49, 0.0  ;;  %v3090_v56 = vpack.c.bf16 %v3027_v5, %v3025_v16  ;;  %v2957_v51 = vadd.f32 %v2956_v0, %v6331_v58 }
 0x5d4   : > { %v2958_v9 = vpop.f32.mrf.mxu1 }
 0x5d5   : > { %v3091_v12 = vpack.c.bf16 %v3028_v62, %v3026_v8  ;;  %v2959_v11 = vadd.f32 %v2958_v9, %v6328_v1  ;;  %v3029_v40 = vmax.f32 %v2957_v51, 0.0 }
 0x5d6   : > { %v2960_v15 = vpop.f32.mrf.mxu1 }
 0x5d7   : > { %v2961_v50 = vadd.f32 %v2960_v15, %v6331_v58  ;;  %3309 = vmatprep.mubr.bf16.mxu0 %v3091_v12  ;;  %v3030_v60 = vmax.f32 %v2959_v11, 0.0 }
 0x5d8   : > { %v2962_v27 = vpop.f32.mrf.mxu1  ;;  %3310 = vmatmul.mubr.bf16.vlgmr.msra.gmra.mxu0 %v3090_v56 }
 0x5d9   : > { %v2963_v32 = vadd.f32 %v2962_v27, %v6328_v1  ;;  %v3031_v13 = vmax.f32 %v2961_v50, 0.0 }
 0x5da   : > { %v2966_v17 = vpop.f32.mrf.mxu1 }
 0x5db   : > { %v3032_v14 = vmax.f32 %v2963_v32, 0.0  ;;  %v3092_v21 = vpack.c.bf16 %v3031_v13, %v3029_v40  ;;  %v2967_v37 = vadd.f32 %v2966_v17, %v6331_v58 }
 0x5dc   : > { %v2968_v7 = vpop.f32.mrf.mxu1 }
 0x5dd   : > { %v3093_v23 = vpack.c.bf16 %v3032_v14, %v3030_v60  ;;  %v2969_v10 = vadd.f32 %v2968_v7, %v6328_v1  ;;  %v3033_v22 = vmax.f32 %v2967_v37, 0.0 }
 0x5de   : > { %v2970_v18 = vpop.f32.mrf.mxu1 }
 0x5df   : > { %v2971_v54 = vadd.f32 %v2970_v18, %v6331_v58  ;;  %3319 = vmatprep.mubr.bf16.mxu0 %v3093_v23  ;;  %v3034_v26 = vmax.f32 %v2969_v10, 0.0 }
 0x5e0   : > { %v2972_v52 = vpop.f32.mrf.mxu1  ;;  %3320 = vmatmul.mubr.bf16.gmra.mxu0 %v3092_v21 }
 0x5e1   : > { %v2973_v30 = vadd.f32 %v2972_v52, %v6328_v1  ;;  %v3035_v19 = vmax.f32 %v2971_v54, 0.0 }
 0x5e2   : > { %v2976_v20 = vpop.f32.mrf.mxu1 }
 0x5e3   : > { %v3036_v3 = vmax.f32 %v2973_v30, 0.0  ;;  %v3094_v31 = vpack.c.bf16 %v3035_v19, %v3033_v22  ;;  %v2977_v35 = vadd.f32 %v2976_v20, %v6331_v58 }
 0x5e4   : > { %v2978_v28 = vpop.f32.mrf.mxu1 }
 0x5e5   : > { %v3095_v43 = vpack.c.bf16 %v3036_v3, %v3034_v26  ;;  %v2979_v55 = vadd.f32 %v2978_v28, %v6328_v1  ;;  %v3037_v29 = vmax.f32 %v2977_v35, 0.0 }
 0x5e6   : > { %v2980_v4 = vpop.f32.mrf.mxu1 }
 0x5e7   : > { %v2981_v33 = vadd.f32 %v2980_v4, %v6331_v58  ;;  %3329 = vmatprep.mubr.bf16.mxu0 %v3095_v43  ;;  %v3038_v42 = vmax.f32 %v2979_v55, 0.0 }
 0x5e8   : > { %v2982_v24 = vpop.f32.mrf.mxu1  ;;  %3330 = vmatmul.mubr.bf16.gmra.mxu0 %v3094_v31 }
 0x5e9   : > { %v2983_v36 = vadd.f32 %v2982_v24, %v6328_v1  ;;  %v3039_v6 = vmax.f32 %v2981_v33, 0.0 }
 0x5ea   : > { %v2986_v38 = vpop.f32.mrf.mxu1 }
 0x5eb   : > { %v3040_v39 = vmax.f32 %v2983_v36, 0.0  ;;  %v3096_v53 = vpack.c.bf16 %v3039_v6, %v3037_v29  ;;  %v2987_v57 = vadd.f32 %v2986_v38, %v6331_v58  ;;  %v3557_v29 = vld [vmem:[#allocation3 + $0x538] sm:$0xff] }
 0x5ec   : > { %v2988_v47 = vpop.f32.mrf.mxu1 }
 0x5ed   : > { %v3097_v48 = vpack.c.bf16 %v3040_v39, %v3038_v42  ;;  %v2989_v34 = vadd.f32 %v2988_v47, %v6328_v1  ;;  %v3041_v8 = vmax.f32 %v2987_v57, 0.0  ;;  %v3558_v47 = vld [vmem:[#allocation3 + $0x578] sm:$0xff] }
 0x5ee   : > { %v2990_v25 = vpop.f32.mrf.mxu1  ;;  %v3554_v57 = vld [vmem:[#allocation3 + $0x478] sm:$0xff] }
 0x5ef   : > { %v2991_v59 = vadd.f32 %v2990_v25, %v6331_v58  ;;  %3339 = vmatprep.mubr.bf16.mxu0 %v3097_v48  ;;  %v3042_v5 = vmax.f32 %v2989_v34, 0.0  ;;  %v5307_v48 = vcombine.high %v3557_v29, %v3558_v47  ;;  %v3555_v25 = vld [vmem:[#allocation3 + $0x4b8] sm:$0xff] }
 0x5f0   : > { %v2992_v61 = vpop.f32.mrf.mxu1  ;;  %3340 = vmatmul.mubr.bf16.gmra.mxu0 %v3096_v53  ;;  %v5306_v53 = vcombine.low %v3557_v29, %v3558_v47 }
 0x5f1   : > { %v2993_v41 = vadd.f32 %v2992_v61, %v6328_v1  ;;  %v3043_v63 = vmax.f32 %v2991_v59, 0.0  ;;  %3783 = vmatprep.subr.bf16.mxu1 %v5307_v48 }
 0x5f2   : > { %v2996_v49 = vpop.f32.mrf.mxu1  ;;  %3784 = vmatpush2.bf16.msra.mxu1 %v5306_v53 }
 0x5f3   : > { %v3044_v0 = vmax.f32 %v2993_v41, 0.0  ;;  %v3098_v9 = vpack.c.bf16 %v3043_v63, %v3041_v8  ;;  %v2997_v11 = vadd.f32 %v2996_v49, %v6331_v58  ;;  %v5507_v63 = vld [vmem:[%s6909_s7 + $0x8] sm:$0x3f]   ;;  %v3984_v49 = vsel %vm3982_vm3, 4294967295, %v5759_v2  ;;  %v3057_v8 = vld [vmem:[%s6905_s3 + $0xe] sm:$0x3] }
 0x5f4   : > { %v2998_v62 = vpop.f32.mrf.mxu1  ;;  %v3422_v2 = vld [vmem:[%s6906_s4] sm:$0x3] }
 0x5f5   : > { %v3099_v16 = vpack.c.bf16 %v3044_v0, %v3042_v5  ;;  %v2999_v56 = vadd.f32 %v2998_v62, %v6328_v1  ;;  %v3045_v60 = vmax.f32 %v2997_v11, 0.0  ;;  %v3985_v5 = vsel %vm3983_vm4, %v3984_v49, 0 }
 0x5f6   : > { %v3000_v12 = vpop.f32.mrf.mxu1  ;;  %v3987_v0 = vand.u32 %v5507_v63, %v3985_v5  ;;  %v6373_v62 = vrot.slane %v3057_v8, %v5955_v46  ;;  %v6384_v11 = vrot.slane %v3422_v2, %v5952_v45 }
 0x5f7   : > { %v3001_v15 = vadd.f32 %v3000_v12, %v6331_v58  ;;  %3349 = vmatprep.mubr.bf16.mxu0 %v3099_v16  ;;  %v3046_v13 = vmax.f32 %v2999_v56, 0.0  ;;  %v6376_v16 = vrot.slane %v3057_v8, %v5952_v45 }
 0x5f8   : > { %v3002_v50 = vpop.f32.mrf.mxu1  ;;  %3350 = vmatmul.mubr.bf16.gmra.mxu0 %v3098_v9  ;;  %5422 = vmatprep.subr.bf16.mxu0 %v3987_v0 }
 0x5f9   : > { %v3003_v51 = vadd.f32 %v3002_v50, %v6328_v1  ;;  %v3047_v27 = vmax.f32 %v3001_v15, 0.0  ;;  %5423 = vmatpush3.bf16.msra.mxu0 %v3987_v0 }
 0x5fa   : > { %v3006_v32 = vpop.f32.mrf.mxu1 }
 0x5fb   : > { %v3048_v17 = vmax.f32 %v3003_v51, 0.0  ;;  %v3100_v7 = vpack.c.bf16 %v3047_v27, %v3045_v60  ;;  %v3007_v10 = vadd.f32 %v3006_v32, %v6331_v58  ;;  %v6387_v51 = vrot.slane %v3422_v2, %v5955_v46 }
 0x5fc   : > { %v3008_v14 = vpop.f32.mrf.mxu1 }
 0x5fd   : > { %v3101_v40 = vpack.c.bf16 %v3048_v17, %v3046_v13  ;;  %v3009_v21 = vadd.f32 %v3008_v14, %v6328_v1  ;;  %v3049_v26 = vmax.f32 %v3007_v10, 0.0 }
 0x5fe   : > { %v3010_v23 = vpop.f32.mrf.mxu1 }
 0x5ff   : > { %v3011_v18 = vadd.f32 %v3010_v23, %v6331_v58  ;;  %3359 = vmatprep.mubr.bf16.mxu0 %v3101_v40  ;;  %v3050_v19 = vmax.f32 %v3009_v21, 0.0 }
 0x600   : > { %v3012_v54 = vpop.f32.mrf.mxu1  ;;  %3360 = vmatmul.mubr.bf16.gmra.mxu0 %v3100_v7 }
 0x601   : > { %v3013_v37 = vadd.f32 %v3012_v54, %v6328_v1  ;;  %v3051_v52 = vmax.f32 %v3011_v18, 0.0 }
 0x602   : > { %v3016_v30 = vpop.f32.mrf.mxu1 }
 0x603   : > { %v3052_v20 = vmax.f32 %v3013_v37, 0.0  ;;  %v3102_v28 = vpack.c.bf16 %v3051_v52, %v3049_v26  ;;  %v3017_v55 = vadd.f32 %v3016_v30, %v6331_v58 }
 0x604   : > { %v3018_v3 = vpop.f32.mrf.mxu1 }
 0x605   : > { %v3103_v22 = vpack.c.bf16 %v3052_v20, %v3050_v19  ;;  %v3019_v31 = vadd.f32 %v3018_v3, %v6328_v1  ;;  %v3053_v38 = vmax.f32 %v3017_v55, 0.0 }
 0x606   : > { %v3020_v43 = vpop.f32.mrf.mxu1 }
 0x607   : > { %v3021_v4 = vadd.f32 %v3020_v43, %v6331_v58  ;;  %3369 = vmatprep.mubr.bf16.mxu0 %v3103_v22  ;;  %v3054_v36 = vmax.f32 %v3019_v31, 0.0  ;;  %v3556_v58 = vld [vmem:[#allocation3 + $0x4f8] sm:$0xff] }
 0x608   : > { %v3022_v33 = vpop.f32.mrf.mxu1  ;;  %3370 = vmatmul.mubr.bf16.gmra.mxu0 %v3102_v28  ;;  %v5305_v34 = vcombine.high %v3555_v25, %v3556_v58  ;;  %v5304_v59 = vcombine.low %v3555_v25, %v3556_v58 }
 0x609   : > { %v3023_v35 = vadd.f32 %v3022_v33, %v6328_v1  ;;  %v3055_v24 = vmax.f32 %v3021_v4, 0.0  ;;  %v3553_v1 = vld [vmem:[#allocation3 + $0x438] sm:$0xff] }
 0x60a   : > { %3785 = vmatprep.subr.bf16.mxu1 %v5305_v34  ;;  %v5303_v61 = vcombine.high %v3553_v1, %v3554_v57  ;;  %v5302_v41 = vcombine.low %v3553_v1, %v3554_v57 }
 0x60b   : > { %v3056_v6 = vmax.f32 %v3023_v35, 0.0  ;;  %v3104_v39 = vpack.c.bf16 %v3055_v24, %v3053_v38  ;;  %3786 = vmatpush2.bf16.msra.mxu1 %v5304_v59 }
 0x60c   : > { %3787 = vmatprep.subr.bf16.mxu1 %v5303_v61 }
 0x60d   : > { %v3105_v42 = vpack.c.bf16 %v3056_v6, %v3054_v36 }
 0x60f   : > { %3379 = vmatprep.mubr.bf16.mxu0 %v3105_v42  ;;  %3788 = vmatpush2.bf16.msra.mxu1 %v5302_v41 }
 0x610   : > { %3380 = vmatmul.mubr.bf16.gmra.mxu0 %v3104_v39 }
 0x698   : > { %v3311_v9 = vpop.f32.mrf.mxu0 }
 0x699   : > { %v3312_v12 = vadd.f32 %v3311_v9, %v6373_v62  ;;  %v5508_v9 = vld [vmem:[%s6909_s7] sm:$0xff]  }
 0x69a   : > { %v3313_v56 = vpop.f32.mrf.mxu0  ;;  %5424 = vmatprep.subr.bf16.mxu0 %v5508_v9 }
 0x69b   : > { %v3314_v15 = vadd.f32 %v3313_v56, %v6376_v16  ;;  %v3390_v50 = vmax.f32 %v3312_v12, 0.0  ;;  %5425 = vmatpush3.bf16.msra.mxu0 %v5508_v9 }
 0x69c   : > { %v3315_v27 = vpop.f32.mrf.mxu0 }
 0x69d   : > { %v3391_v32 = vmax.f32 %v3314_v15, 0.0  ;;  %v3316_v13 = vadd.f32 %v3315_v27, %v6373_v62  ;;  %v3434_v7 = vmul.f32 %v6387_v51, %v3390_v50 }
 0x69e   : > { %v3317_v17 = vpop.f32.mrf.mxu0 }
 0x69f   : > { %v3435_v60 = vmul.f32 %v6384_v11, %v3391_v32  ;;  %v3392_v14 = vmax.f32 %v3316_v13, 0.0  ;;  %v3318_v40 = vadd.f32 %v3317_v17, %v6376_v16 }
 0x6a0   : > { %v3321_v23 = vpop.f32.mrf.mxu0 }
 0x6a1   : > { %v3393_v21 = vmax.f32 %v3318_v40, 0.0  ;;  %v3322_v18 = vadd.f32 %v3321_v23, %v6373_v62  ;;  %v3466_v54 = vadd.f32 %v3435_v60, %v3434_v7  ;;  %v3436_v37 = vmul.f32 %v6387_v51, %v3392_v14 }
 0x6a2   : > { %v3323_v10 = vpop.f32.mrf.mxu0  ;;  %v3570_v20 = vpack.c.bf16 %v3392_v14, %v3390_v50 }
 0x6a3   : > { %v3437_v52 = vmul.f32 %v6384_v11, %v3393_v21  ;;  %v3571_v30 = vpack.c.bf16 %v3393_v21, %v3391_v32  ;;  %v3324_v19 = vadd.f32 %v3323_v10, %v6376_v16  ;;  %v3394_v26 = vmax.f32 %v3322_v18, 0.0  ;;  %3467 = vadd.xlane.f32.xlu0 %v3466_v54 }
 0x6a4   : > { %v3325_v3 = vpop.f32.mrf.mxu0 }
 0x6a5   : > { %v3395_v22 = vmax.f32 %v3324_v19, 0.0  ;;  %v3326_v28 = vadd.f32 %v3325_v3, %v6373_v62  ;;  %3789 = vmatprep.mubr.bf16.mxu1 %v3571_v30  ;;  %v3469_v43 = vadd.f32 %v3437_v52, %v3436_v37  ;;  %v3438_v35 = vmul.f32 %v6387_v51, %v3394_v26 }
 0x6a6   : > { %v3327_v31 = vpop.f32.mrf.mxu0  ;;  %3790 = vmatmul.mubr.bf16.vlgmr.msra.gmra.mxu1 %v3570_v20 }
 0x6a7   : > { %v3439_v4 = vmul.f32 %v6384_v11, %v3395_v22  ;;  %v3396_v55 = vmax.f32 %v3326_v28, 0.0  ;;  %v3328_v33 = vadd.f32 %v3327_v31, %v6376_v16  ;;  %3470 = vadd.xlane.f32.xlu1 %v3469_v43 }
 0x6a8   : > { %v3331_v24 = vpop.f32.mrf.mxu0 }
 0x6a9   : > { %v3397_v36 = vmax.f32 %v3328_v33, 0.0  ;;  %v3332_v6 = vadd.f32 %v3331_v24, %v6373_v62  ;;  %v3472_v42 = vadd.f32 %v3439_v4, %v3438_v35  ;;  %v3440_v39 = vmul.f32 %v6387_v51, %v3396_v55 }
 0x6aa   : > { %v3333_v38 = vpop.f32.mrf.mxu0  ;;  %v3572_v53 = vpack.c.bf16 %v3396_v55, %v3394_v26 }
 0x6ab   : > { %v3441_v29 = vmul.f32 %v6384_v11, %v3397_v36  ;;  %v3573_v47 = vpack.c.bf16 %v3397_v36, %v3395_v22  ;;  %v3334_v48 = vadd.f32 %v3333_v38, %v6376_v16  ;;  %v3398_v25 = vmax.f32 %v3332_v6, 0.0  ;;  %3473 = vadd.xlane.f32.xlu0 %v3472_v42 }
 0x6ac   : > { %v3335_v58 = vpop.f32.mrf.mxu0 }
 0x6ad   : > { %v3399_v34 = vmax.f32 %v3334_v48, 0.0  ;;  %v3336_v59 = vadd.f32 %v3335_v58, %v6373_v62  ;;  %3799 = vmatprep.mubr.bf16.mxu1 %v3573_v47  ;;  %v3475_v1 = vadd.f32 %v3441_v29, %v3440_v39  ;;  %v3442_v49 = vmul.f32 %v6387_v51, %v3398_v25 }
 0x6ae   : > { %v3337_v57 = vpop.f32.mrf.mxu0  ;;  %3800 = vmatmul.mubr.bf16.gmra.mxu1 %v3572_v53 }
 0x6af   : > { %v3443_v61 = vmul.f32 %v6384_v11, %v3399_v34  ;;  %v3400_v41 = vmax.f32 %v3336_v59, 0.0  ;;  %v3338_v63 = vadd.f32 %v3337_v57, %v6376_v16  ;;  %3476 = vadd.xlane.f32.xlu0 %v3475_v1 }
 0x6b0   : > { %v3341_v5 = vpop.f32.mrf.mxu0 }
 0x6b1   : > { %v3401_v0 = vmax.f32 %v3338_v63, 0.0  ;;  %v3342_v8 = vadd.f32 %v3341_v5, %v6373_v62  ;;  %v3478_v2 = vadd.f32 %v3443_v61, %v3442_v49  ;;  %v3444_v56 = vmul.f32 %v6387_v51, %v3400_v41  ;;  %v3931_v49 = vpop.permute.xlu0 %3930 }
 0x6b2   : > { %v3343_v12 = vpop.f32.mrf.mxu0  ;;  %v3574_v32 = vpack.c.bf16 %v3400_v41, %v3398_v25  ;;  %5426 = vmatprep.mubr.msk.bf16.mxu0 %vm3957_vm5, %v3931_v49 }
 0x6b3   : > { %v3445_v15 = vmul.f32 %v6384_v11, %v3401_v0  ;;  %v3575_v50 = vpack.c.bf16 %v3401_v0, %v3399_v34  ;;  %v3344_v27 = vadd.f32 %v3343_v12, %v6376_v16  ;;  %v3402_v13 = vmax.f32 %v3342_v8, 0.0  ;;  %3479 = vadd.xlane.f32.xlu1 %v3478_v2 }
 0x6b4   : > { %v3345_v17 = vpop.f32.mrf.mxu0 }
 0x6b5   : > { %v3403_v60 = vmax.f32 %v3344_v27, 0.0  ;;  %v3346_v14 = vadd.f32 %v3345_v17, %v6373_v62  ;;  %3809 = vmatprep.mubr.bf16.mxu1 %v3575_v50  ;;  %v3481_v40 = vadd.f32 %v3445_v15, %v3444_v56  ;;  %v3446_v10 = vmul.f32 %v6387_v51, %v3402_v13 }
 0x6b6   : > { %v3347_v7 = vpop.f32.mrf.mxu0  ;;  %3810 = vmatmul.mubr.bf16.gmra.mxu1 %v3574_v32 }
 0x6b7   : > { %v3447_v23 = vmul.f32 %v6384_v11, %v3403_v60  ;;  %v3404_v21 = vmax.f32 %v3346_v14, 0.0  ;;  %v3348_v18 = vadd.f32 %v3347_v7, %v6376_v16  ;;  %3482 = vadd.xlane.f32.xlu0 %v3481_v40  ;;  %v3933_v14 = vpop.permute.xlu0 %3932 }
 0x6b8   : > { %v3351_v54 = vpop.f32.mrf.mxu0  ;;  %5427 = vmatmul.mubr.msk.bf16.vlgmr.msra.gmra.mxu0 %vm3957_vm5, %v3933_v14  ;;  %v6510_v14 = vld [vmem:[#allocation2] ss:$0 sm:$0xff] }
 0x6b9   : > { %v3405_v37 = vmax.f32 %v3348_v18, 0.0  ;;  %v3352_v52 = vadd.f32 %v3351_v54, %v6373_v62  ;;  %v3484_v19 = vadd.f32 %v3447_v23, %v3446_v10  ;;  %v3448_v20 = vmul.f32 %v6387_v51, %v3404_v21 }
 0x6ba   : > { %v3353_v30 = vpop.f32.mrf.mxu0  ;;  %v3576_v28 = vpack.c.bf16 %v3404_v21, %v3402_v13  ;;  %v3935_v21 = vpop.permute.xlu1 %3934 }
 0x6bb   : > { %v3449_v26 = vmul.f32 %v6384_v11, %v3405_v37  ;;  %v3577_v3 = vpack.c.bf16 %v3405_v37, %v3403_v60  ;;  %v3354_v22 = vadd.f32 %v3353_v30, %v6376_v16  ;;  %v3406_v43 = vmax.f32 %v3352_v52, 0.0  ;;  %3485 = vadd.xlane.f32.xlu1 %v3484_v19  ;;  %5430 = vmatprep.mubr.msk.bf16.mxu0 %vm3957_vm5, %v3935_v21 }
 0x6bc   : > { %v3355_v31 = vpop.f32.mrf.mxu0 }
 0x6bd   : > { %v3407_v4 = vmax.f32 %v3354_v22, 0.0  ;;  %v3356_v55 = vadd.f32 %v3355_v31, %v6373_v62  ;;  %3819 = vmatprep.mubr.bf16.mxu1 %v3577_v3  ;;  %v3487_v33 = vadd.f32 %v3449_v26, %v3448_v20  ;;  %v3450_v38 = vmul.f32 %v6387_v51, %v3406_v43 }
 0x6be   : > { %v3357_v35 = vpop.f32.mrf.mxu0  ;;  %3820 = vmatmul.mubr.bf16.gmra.mxu1 %v3576_v28  ;;  %v5509_v28 = vld [vmem:[%s6908_s6 + $0x78] sm:$0xff]  }
 0x6bf   : > { %v3451_v24 = vmul.f32 %v6384_v11, %v3407_v4  ;;  %v3408_v36 = vmax.f32 %v3356_v55, 0.0  ;;  %v3358_v6 = vadd.f32 %v3357_v35, %v6376_v16  ;;  %3488 = vadd.xlane.f32.xlu0 %v3487_v33  ;;  %5358 = vmatprep.subr.bf16.mxu0 %v5509_v28 }
 0x6c0   : > { %v3361_v42 = vpop.f32.mrf.mxu0  ;;  %5442 = vmatprep.subr.bf16.mxu1 %v5509_v28 }
 0x6c1   : > { %v3409_v39 = vmax.f32 %v3358_v6, 0.0  ;;  %v3362_v29 = vadd.f32 %v3361_v42, %v6373_v62  ;;  %v3490_v48 = vadd.f32 %v3451_v24, %v3450_v38  ;;  %v3452_v53 = vmul.f32 %v6387_v51, %v3408_v36  ;;  %v3937_v42 = vpop.permute.xlu1 %3936 }
 0x6c2   : > { %v3363_v47 = vpop.f32.mrf.mxu0  ;;  %v3578_v59 = vpack.c.bf16 %v3408_v36, %v3406_v43  ;;  %v5510_v43 = vld [vmem:[%s6908_s6 + $0x38] sm:$0xff]   ;;  %5431 = vmatmul.mubr.msk.bf16.gmra.mxu0 %vm3957_vm5, %v3937_v42 }
 0x6c3   : > { %v3453_v25 = vmul.f32 %v6384_v11, %v3409_v39  ;;  %v3579_v58 = vpack.c.bf16 %v3409_v39, %v3407_v4  ;;  %v3364_v34 = vadd.f32 %v3363_v47, %v6376_v16  ;;  %v3410_v1 = vmax.f32 %v3362_v29, 0.0  ;;  %3491 = vadd.xlane.f32.xlu1 %v3490_v48  ;;  %5359 = vmatpush3.bf16.msra.mxu0 %v5510_v43  ;;  %v3939_v48 = vpop.permute.xlu0 %3938 }
 0x6c4   : > { %v3365_v57 = vpop.f32.mrf.mxu0  ;;  %5434 = vmatprep.mubr.msk.bf16.mxu0 %vm3957_vm5, %v3939_v48  ;;  %5450 = vmatpush3.bf16.msra.mxu1 %v5510_v43 }
 0x6c5   : > { %v3411_v61 = vmax.f32 %v3364_v34, 0.0  ;;  %v3366_v41 = vadd.f32 %v3365_v57, %v6373_v62  ;;  %3829 = vmatprep.mubr.bf16.mxu1 %v3579_v58  ;;  %v3493_v63 = vadd.f32 %v3453_v25, %v3452_v53  ;;  %v3454_v12 = vmul.f32 %v6387_v51, %v3410_v1  ;;  %v5511_v53 = vld [vmem:[%s6908_s6 + $0x70] sm:$0xff]  }
 0x6c6   : > { %v3367_v5 = vpop.f32.mrf.mxu0  ;;  %3830 = vmatmul.mubr.bf16.gmra.mxu1 %v3578_v59  ;;  %v5512_v58 = vld [vmem:[%s6908_s6 + $0x30] sm:$0xff]   ;;  %5360 = vmatprep.subr.bf16.mxu0 %v5511_v53 }
 0x6c7   : > { %v3455_v0 = vmul.f32 %v6384_v11, %v3411_v61  ;;  %v3412_v8 = vmax.f32 %v3366_v41, 0.0  ;;  %v3368_v9 = vadd.f32 %v3367_v5, %v6376_v16  ;;  %3494 = vadd.xlane.f32.xlu0 %v3493_v63  ;;  %5361 = vmatpush3.bf16.msra.mxu0 %v5512_v58  ;;  %v5513_v41 = vld [vmem:[%s6908_s6 + $0x68] sm:$0xff]  }
 0x6c8   : > { %v3371_v2 = vpop.f32.mrf.mxu0  ;;  %v5514_v63 = vld [vmem:[%s6908_s6 + $0x28] sm:$0xff]   ;;  %5443 = vmatprep.subr.bf16.mxu1 %v5511_v53  ;;  %5362 = vmatprep.subr.bf16.mxu0 %v5513_v41 }
 0x6c9   : > { %v3413_v56 = vmax.f32 %v3368_v9, 0.0  ;;  %v3372_v15 = vadd.f32 %v3371_v2, %v6373_v62  ;;  %v3496_v27 = vadd.f32 %v3455_v0, %v3454_v12  ;;  %v3456_v32 = vmul.f32 %v6387_v51, %v3412_v8  ;;  %5451 = vmatpush3.bf16.msra.mxu1 %v5512_v58  ;;  %v3943_v12 = vpop.permute.xlu0 %3942  ;;  %v5515_v2 = vld [vmem:[%s6908_s6 + $0x60] sm:$0xff]  }
 0x6ca   : > { %v3373_v50 = vpop.f32.mrf.mxu0  ;;  %v3580_v40 = vpack.c.bf16 %v3412_v8, %v3410_v1  ;;  %v3941_v8 = vpop.permute.xlu1 %3940  ;;  %5444 = vmatprep.subr.bf16.mxu1 %v5513_v41 }
 0x6cb   : > { %v3457_v13 = vmul.f32 %v6384_v11, %v3413_v56  ;;  %v3581_v17 = vpack.c.bf16 %v3413_v56, %v3411_v61  ;;  %v3374_v60 = vadd.f32 %v3373_v50, %v6376_v16  ;;  %v3414_v7 = vmax.f32 %v3372_v15, 0.0  ;;  %3497 = vadd.xlane.f32.xlu1 %v3496_v27  ;;  %5363 = vmatpush3.bf16.msra.mxu0 %v5514_v63  ;;  %v5518_v56 = vld [vmem:[%s6908_s6 + $0x18] sm:$0xff]   ;;  %v5519_v50 = vld [vmem:[%s6908_s6 + $0x50] sm:$0xff]  }
 0x6cc   : > { %v3375_v23 = vpop.f32.mrf.mxu0  ;;  %5435 = vmatmul.mubr.msk.bf16.gmra.mxu0 %vm3957_vm5, %v3941_v8  ;;  %5364 = vmatprep.subr.bf16.mxu0 %v5515_v2  ;;  %v5520_v27 = vld [vmem:[%s6908_s6 + $0x10] sm:$0xff]  }
 0x6cd   : > { %v3415_v18 = vmax.f32 %v3374_v60, 0.0  ;;  %v3376_v10 = vadd.f32 %v3375_v23, %v6373_v62  ;;  %3839 = vmatprep.mubr.bf16.mxu1 %v3581_v17  ;;  %v3499_v54 = vadd.f32 %v3457_v13, %v3456_v32  ;;  %v3458_v20 = vmul.f32 %v6387_v51, %v3414_v7  ;;  %5438 = vmatprep.mubr.msk.bf16.mxu0 %vm3957_vm5, %v3943_v12  ;;  %v5521_v32 = vld [vmem:[%s6908_s6 + $0x48] sm:$0xff]   ;;  %v5523_v17 = vld [vmem:[%s6908_s6 + $0x40] sm:$0xff]  }
 0x6ce   : > { %v3377_v37 = vpop.f32.mrf.mxu0  ;;  %3840 = vmatmul.mubr.bf16.gmra.mxu1 %v3580_v40  ;;  %v3945_v15 = vpop.permute.xlu1 %3944  ;;  %v5522_v13 = vld [vmem:[%s6908_s6 + $0x8] sm:$0xff]   ;;  %v5524_v60 = vld [vmem:[%s6908_s6] sm:$0xff]  }
 0x6cf   : > { %v3459_v52 = vmul.f32 %v6384_v11, %v3415_v18  ;;  %v3416_v30 = vmax.f32 %v3376_v10, 0.0  ;;  %v3378_v19 = vadd.f32 %v3377_v37, %v6376_v16  ;;  %3500 = vadd.xlane.f32.xlu0 %v3499_v54  ;;  %5452 = vmatpush3.bf16.msra.mxu1 %v5514_v63 }
 0x6d0   : > { %v3381_v26 = vpop.f32.mrf.mxu0  ;;  %5445 = vmatprep.subr.bf16.mxu1 %v5515_v2 }
 0x6d1   : > { %v3417_v3 = vmax.f32 %v3378_v19, 0.0  ;;  %v3382_v22 = vadd.f32 %v3381_v26, %v6373_v62  ;;  %v3460_v31 = vmul.f32 %v6387_v51, %v3416_v30  ;;  %v3502_v55 = vadd.f32 %v3459_v52, %v3458_v20 }
 0x6d2   : > { %v3383_v4 = vpop.f32.mrf.mxu0  ;;  %v3582_v6 = vpack.c.bf16 %v3416_v30, %v3414_v7  ;;  %v3569_v30 = vld [vmem:[%s6905_s3 + $0x10] sm:$0x3] }
 0x6d3   : > { %v3461_v33 = vmul.f32 %v6384_v11, %v3417_v3  ;;  %v3583_v35 = vpack.c.bf16 %v3417_v3, %v3415_v18  ;;  %v3418_v24 = vmax.f32 %v3382_v22, 0.0  ;;  %v3384_v36 = vadd.f32 %v3383_v4, %v6376_v16  ;;  %3503 = vadd.xlane.f32.xlu1 %v3502_v55 }
 0x6d4   : > { %v3385_v38 = vpop.f32.mrf.mxu0  ;;  %5439 = vmatmul.mubr.msk.bf16.gmra.mxu0 %vm3957_vm5, %v3945_v15  ;;  %v6524_v20 = vrot.slane %v3569_v30, %v5952_v45  ;;  %v6527_v26 = vrot.slane %v3569_v30, %v5955_v46 }
 0x6d5   : > { %v3419_v39 = vmax.f32 %v3384_v36, 0.0  ;;  %v3386_v29 = vadd.f32 %v3385_v38, %v6373_v62  ;;  %3849 = vmatprep.mubr.bf16.mxu1 %v3583_v35  ;;  %v3505_v47 = vadd.f32 %v3461_v33, %v3460_v31  ;;  %v3462_v34 = vmul.f32 %v6387_v51, %v3418_v24 }
 0x6d6   : > { %v3387_v25 = vpop.f32.mrf.mxu0  ;;  %3850 = vmatmul.mubr.bf16.gmra.mxu1 %v3582_v6 }
 0x6d7   : > { %v3463_v62 = vmul.f32 %v6384_v11, %v3419_v39  ;;  %v3420_v59 = vmax.f32 %v3386_v29, 0.0  ;;  %v3388_v1 = vadd.f32 %v3387_v25, %v6376_v16  ;;  %3506 = vadd.xlane.f32.xlu0 %v3505_v47 }
 0x6d9   : > { %v3421_v57 = vmax.f32 %v3388_v1, 0.0  ;;  %v3508_v61 = vadd.f32 %v3463_v62, %v3462_v34  ;;  %v3464_v49 = vmul.f32 %v6387_v51, %v3420_v59  ;;  %v3584_v0 = vpack.c.bf16 %v3420_v59, %v3418_v24  ;;  %v5517_v51 = vld [vmem:[%s6908_s6 + $0x58] sm:$0xff]  }
 0x6db   : > { %v3465_v5 = vmul.f32 %v6384_v11, %v3421_v57  ;;  %v3585_v16 = vpack.c.bf16 %v3421_v57, %v3419_v39  ;;  %3509 = vadd.xlane.f32.xlu1 %v3508_v61  ;;  %v5516_v11 = vld [vmem:[%s6908_s6 + $0x20] sm:$0xff]  }
 0x6dc   : > { %5365 = vmatpush3.bf16.msra.mxu0 %v5516_v11  ;;  %5453 = vmatpush3.bf16.msra.mxu1 %v5516_v11 }
 0x6dd   : > { %3859 = vmatprep.mubr.bf16.mxu1 %v3585_v16  ;;  %v3511_v9 = vadd.f32 %v3465_v5, %v3464_v49  ;;  %5366 = vmatprep.subr.bf16.mxu0 %v5517_v51 }
 0x6de   : > { %3860 = vmatmul.mubr.bf16.gmra.mxu1 %v3584_v0  ;;  %5446 = vmatprep.subr.bf16.mxu1 %v5517_v51 }
 0x6df   : > { %3512 = vadd.xlane.f32.xlu0 %v3511_v9 }
 0x6e0   : > { %5367 = vmatpush3.bf16.msra.mxu0 %v5518_v56  ;;  %5454 = vmatpush3.bf16.msra.mxu1 %v5518_v56 }
 0x6e1   : > { %5368 = vmatprep.subr.bf16.mxu0 %v5519_v50  ;;  %5447 = vmatprep.subr.bf16.mxu1 %v5519_v50 }
 0x6e4   : > { %5369 = vmatpush3.bf16.msra.mxu0 %v5520_v27  ;;  %5455 = vmatpush3.bf16.msra.mxu1 %v5520_v27 }
 0x6e5   : > { %5370 = vmatprep.subr.bf16.mxu0 %v5521_v32  ;;  %5448 = vmatprep.subr.bf16.mxu1 %v5521_v32 }
 0x6e8   : > { %5371 = vmatpush3.bf16.msra.mxu0 %v5522_v13  ;;  %5456 = vmatpush3.bf16.msra.mxu1 %v5522_v13 }
 0x6e9   : > { %5372 = vmatprep.subr.bf16.mxu0 %v5523_v17  ;;  %5449 = vmatprep.subr.bf16.mxu1 %v5523_v17 }
 0x6ec   : > { %5373 = vmatpush3.bf16.msra.mxu0 %v5524_v60  ;;  %5457 = vmatpush3.bf16.msra.mxu1 %v5524_v60 }
 0x72c   : > { %v3468_v40 = vpop.xlane.xlu0 %3467 }
 0x72d   : > { %v3521_v7 = vadd.f32 %v6510_v14, %v3468_v40 }
 0x72f   : > { %4885 = vrot.lane.b32.xlu1 %v3521_v7, %s5761_s16 }
 0x730   : > { %v3471_v23 = vpop.xlane.xlu1 %3470 }
 0x731   : > { %v3522_v21 = vadd.f32 %v6510_v14, %v3471_v23 }
 0x733   : > { %4887 = vrot.lane.b32.xlu0 %v3522_v21, %s5761_s16 }
 0x734   : > { %v3474_v18 = vpop.xlane.xlu0 %3473 }
 0x735   : > { %v3523_v10 = vadd.f32 %v6510_v14, %v3474_v18 }
 0x737   : > { %4889 = vrot.lane.b32.xlu1 %v3523_v10, %s5761_s16 }
 0x738   : > { %v3477_v54 = vpop.xlane.xlu0 %3476 }
 0x739   : > { %v3524_v37 = vadd.f32 %v6510_v14, %v3477_v54 }
 0x73b   : > { %4891 = vrot.lane.b32.xlu1 %v3524_v37, %s5761_s16 }
 0x766   : > { %v3791_v52 = vpop.f32.mrf.mxu1 }
 0x767   : > { %v3792_v4 = vadd.f32 %v3791_v52, %v6527_v26 }
 0x768   : > { %v3793_v19 = vpop.f32.mrf.mxu1 }
 0x769   : > { %v3794_v43 = vadd.f32 %v3793_v19, %v6524_v20 }
 0x76a   : > { %v3795_v3 = vpop.f32.mrf.mxu1 }
 0x76b   : > { %v3796_v22 = vadd.f32 %v3795_v3, %v6527_v26 }
 0x76c   : > { %v3797_v28 = vpop.f32.mrf.mxu1 }
 0x76d   : > { %v3798_v31 = vadd.f32 %v3797_v28, %v6524_v20  ;;  %v3902_v35 = vpack.c.bf16 %v3796_v22, %v3792_v4 }
 0x76e   : > { %v3801_v55 = vpop.f32.mrf.mxu1 }
 0x76f   : > { %v3903_v33 = vpack.c.bf16 %v3798_v31, %v3794_v43  ;;  %v3802_v29 = vadd.f32 %v3801_v55, %v6527_v26 }
 0x770   : > { %v3803_v24 = vpop.f32.mrf.mxu1 }
 0x771   : > { %4214 = vmatprep.mubr.bf16.mxu0 %v3903_v33  ;;  %v3804_v42 = vadd.f32 %v3803_v24, %v6524_v20 }
 0x772   : > { %v3805_v36 = vpop.f32.mrf.mxu1  ;;  %4215 = vmatmul.mubr.bf16.vlgmr.msra.gmra.mxu0 %v3902_v35 }
 0x773   : > { %v3806_v6 = vadd.f32 %v3805_v36, %v6527_v26 }
 0x774   : > { %v3807_v38 = vpop.f32.mrf.mxu1 }
 0x775   : > { %v3808_v39 = vadd.f32 %v3807_v38, %v6524_v20  ;;  %v3904_v53 = vpack.c.bf16 %v3806_v6, %v3802_v29 }
 0x776   : > { %v3811_v47 = vpop.f32.mrf.mxu1 }
 0x777   : > { %v3905_v48 = vpack.c.bf16 %v3808_v39, %v3804_v42  ;;  %v3812_v57 = vadd.f32 %v3811_v47, %v6527_v26 }
 0x778   : > { %v3813_v25 = vpop.f32.mrf.mxu1 }
 0x779   : > { %4222 = vmatprep.mubr.bf16.mxu0 %v3905_v48  ;;  %v3814_v59 = vadd.f32 %v3813_v25, %v6524_v20 }
 0x77a   : > { %v3815_v58 = vpop.f32.mrf.mxu1  ;;  %4223 = vmatmul.mubr.bf16.gmra.mxu0 %v3904_v53 }
 0x77b   : > { %v3816_v34 = vadd.f32 %v3815_v58, %v6527_v26  ;;  %v5428_v58 = vpop.f32.mrf.mxu0 }
 0x77c   : > { %v3817_v62 = vpop.f32.mrf.mxu1 }
 0x77d   : > { %v3818_v1 = vadd.f32 %v3817_v62, %v6524_v20  ;;  %v3906_v63 = vpack.c.bf16 %v3816_v34, %v3812_v57  ;;  %v4023_v34 = vpop.f32.mrf.mxu0 }
 0x77e   : > { %v3821_v61 = vpop.f32.mrf.mxu1 }
 0x77f   : > { %v3907_v41 = vpack.c.bf16 %v3818_v1, %v3814_v59  ;;  %v3822_v12 = vadd.f32 %v3821_v61, %v6527_v26  ;;  %v5429_v62 = vpop.f32.mrf.mxu0 }
 0x780   : > { %v3823_v49 = vpop.f32.mrf.mxu1 }
 0x781   : > { %4230 = vmatprep.mubr.bf16.mxu0 %v3907_v41  ;;  %v3824_v8 = vadd.f32 %v3823_v49, %v6524_v20  ;;  %v4026_v59 = vpop.f32.mrf.mxu0 }
 0x782   : > { %v3825_v5 = vpop.f32.mrf.mxu1  ;;  %4231 = vmatmul.mubr.bf16.gmra.mxu0 %v3906_v63 }
 0x783   : > { %v3826_v16 = vadd.f32 %v3825_v5, %v6527_v26  ;;  %v6561_v1 = vpop.f32.mrf.mxu0 }
 0x784   : > { %v3827_v0 = vpop.f32.mrf.mxu1 }
 0x785   : > { %v3828_v9 = vadd.f32 %v3827_v0, %v6524_v20  ;;  %v3908_v51 = vpack.c.bf16 %v3826_v16, %v3822_v12  ;;  %v4039_v57 = vpop.f32.mrf.mxu0 }
 0x786   : > { %v3831_v2 = vpop.f32.mrf.mxu1 }
 0x787   : > { %v3909_v11 = vpack.c.bf16 %v3828_v9, %v3824_v8  ;;  %v3832_v17 = vadd.f32 %v3831_v2, %v6527_v26  ;;  %v6563_v61 = vpop.f32.mrf.mxu0 }
 0x788   : > { %v3833_v56 = vpop.f32.mrf.mxu1 }
 0x789   : > { %4238 = vmatprep.mubr.bf16.mxu0 %v3909_v11  ;;  %v3834_v32 = vadd.f32 %v3833_v56, %v6524_v20  ;;  %v6565_v41 = vpop.f32.mrf.mxu0  ;;  %v6586_v11 = vld [vmem:[%s6910_s8] ss:$0 sm:$0xff] }
 0x78a   : > { %v3835_v15 = vpop.f32.mrf.mxu1  ;;  %4239 = vmatmul.mubr.bf16.gmra.mxu0 %v3908_v51  ;;  %v4318_v56 = vld [vmem:[%s6911_s9] sm:$0x7] }
 0x78b   : > { %v3836_v50 = vadd.f32 %v3835_v15, %v6527_v26 }
 0x78c   : > { %v3837_v27 = vpop.f32.mrf.mxu1  ;;  %v6567_v63 = vpop.f32.mrf.mxu0 }
 0x78d   : > { %v3838_v13 = vadd.f32 %v3837_v27, %v6524_v20  ;;  %v3910_v7 = vpack.c.bf16 %v3836_v50, %v3832_v17 }
 0x78e   : > { %v3841_v60 = vpop.f32.mrf.mxu1 }
 0x78f   : > { %v3911_v40 = vpack.c.bf16 %v3838_v13, %v3834_v32  ;;  %v3842_v52 = vadd.f32 %v3841_v60, %v6527_v26  ;;  %v6593_v13 = vrot.slane %v4318_v56, %v5955_v46 }
 0x790   : > { %v3843_v23 = vpop.f32.mrf.mxu1 }
 0x791   : > { %4246 = vmatprep.mubr.bf16.mxu0 %v3911_v40  ;;  %v3844_v54 = vadd.f32 %v3843_v23, %v6524_v20  ;;  %v4690_v23 = vsub.s32 2, %v5949_v44 }
 0x792   : > { %v3845_v21 = vpop.f32.mrf.mxu1  ;;  %4247 = vmatmul.mubr.bf16.gmra.mxu0 %v3910_v7 }
 0x793   : > { %v3846_v18 = vadd.f32 %v3845_v21, %v6527_v26 }
 0x794   : > { %v3847_v10 = vpop.f32.mrf.mxu1 }
 0x795   : > { %v3848_v37 = vadd.f32 %v3847_v10, %v6524_v20  ;;  %v3912_v3 = vpack.c.bf16 %v3846_v18, %v3842_v52 }
 0x796   : > { %v3851_v30 = vpop.f32.mrf.mxu1 }
 0x797   : > { %v3913_v19 = vpack.c.bf16 %v3848_v37, %v3844_v54  ;;  %v3852_v33 = vadd.f32 %v3851_v30, %v6527_v26  ;;  %v6599_v54 = vrot.slane %v4318_v56, %v5952_v45 }
 0x798   : > { %v3853_v22 = vpop.f32.mrf.mxu1 }
 0x799   : > { %4254 = vmatprep.mubr.bf16.mxu1 %v3913_v19  ;;  %v3854_v4 = vadd.f32 %v3853_v22, %v6524_v20  ;;  %v6601_v19 = vrot.slane %v4318_v56, %v4690_v23 }
 0x79a   : > { %v3855_v28 = vpop.f32.mrf.mxu1  ;;  %4255 = vmatmul.mubr.bf16.vlgmr.msra.gmra.mxu1 %v3912_v3 }
 0x79b   : > { %v3856_v43 = vadd.f32 %v3855_v28, %v6527_v26 }
 0x79c   : > { %v3857_v31 = vpop.f32.mrf.mxu1 }
 0x79d   : > { %v3858_v55 = vadd.f32 %v3857_v31, %v6524_v20  ;;  %v3914_v36 = vpack.c.bf16 %v3856_v43, %v3852_v33 }
 0x79e   : > { %v3861_v35 = vpop.f32.mrf.mxu1 }
 0x79f   : > { %v3915_v24 = vpack.c.bf16 %v3858_v55, %v3854_v4  ;;  %v3862_v48 = vadd.f32 %v3861_v35, %v6527_v26 }
 0x7a0   : > { %v3863_v6 = vpop.f32.mrf.mxu1 }
 0x7a1   : > { %4262 = vmatprep.mubr.bf16.mxu1 %v3915_v24  ;;  %v3864_v29 = vadd.f32 %v3863_v6, %v6524_v20 }
 0x7a2   : > { %v3865_v38 = vpop.f32.mrf.mxu1  ;;  %4263 = vmatmul.mubr.bf16.gmra.mxu1 %v3914_v36 }
 0x7a3   : > { %v3866_v42 = vadd.f32 %v3865_v38, %v6527_v26 }
 0x7a4   : > { %v3867_v39 = vpop.f32.mrf.mxu1 }
 0x7a5   : > { %v3868_v47 = vadd.f32 %v3867_v39, %v6524_v20  ;;  %v3916_v25 = vpack.c.bf16 %v3866_v42, %v3862_v48  ;;  %v6569_v20 = vpop.f32.mrf.mxu0 }
 0x7a7   : > { %v3917_v53 = vpack.c.bf16 %v3868_v47, %v3864_v29  ;;  %v6571_v26 = vpop.f32.mrf.mxu0 }
 0x7a9   : > { %4270 = vmatprep.mubr.bf16.mxu1 %v3917_v53  ;;  %v6573_v49 = vpop.f32.mrf.mxu0 }
 0x7aa   : > { %4271 = vmatmul.mubr.bf16.gmra.mxu1 %v3916_v25 }
 0x7ab   : > { %v6575_v5 = vpop.f32.mrf.mxu0 }
 0x7ad   : > { %v6577_v16 = vpop.f32.mrf.mxu0 }
 0x7af   : > { %v6579_v0 = vpop.f32.mrf.mxu0 }
 0x7b1   : > { %v6581_v8 = vpop.f32.mrf.mxu0 }
 0x832   : > { %v5374_v9 = vpop.f32.mrf.mxu0 }
 0x834   : > { %v5375_v12 = vpop.f32.mrf.mxu0 }
 0x835   : > { %v5376_v2 = vadd.f32 %v5375_v12, %v5374_v9 }
 0x836   : > { %v5377_v51 = vpop.f32.mrf.mxu0 }
 0x837   : > { %v4217_v15 = vadd.f32 %v5376_v2, %v4023_v34 }
 0x838   : > { %v5378_v50 = vpop.f32.mrf.mxu0 }
 0x839   : > { %v4286_v27 = vadd.f32 %v6586_v11, %v4217_v15  ;;  %v5379_v32 = vadd.f32 %v5378_v50, %v5377_v51 }
 0x83a   : > { %v5380_v17 = vpop.f32.mrf.mxu0 }
 0x83b   : > { %v4302_v60 = vmax.f32 %v4286_v27, 0.0  ;;  %v4220_v40 = vadd.f32 %v5379_v32, %v4026_v59 }
 0x83c   : > { %v5381_v7 = vpop.f32.mrf.mxu0 }
 0x83d   : > { %v4287_v21 = vadd.f32 %v6586_v11, %v4220_v40  ;;  %v5382_v18 = vadd.f32 %v5381_v7, %v5380_v17  ;;  %v4324_v10 = vmul.f32 %v6593_v13, %v4302_v60  ;;  %v4511_v28 = vmul.f32 %v6599_v54, %v4302_v60 }
 0x83e   : > { %v5383_v37 = vpop.f32.mrf.mxu0  ;;  %v4692_v4 = vmul.f32 %v6601_v19, %v4302_v60 }
 0x83f   : > { %v4303_v52 = vmax.f32 %v4287_v21, 0.0  ;;  %v4225_v30 = vadd.f32 %v5428_v58, %v5382_v18  ;;  %4340 = vadd.xlane.f32.xlu1 %v4324_v10 }
 0x840   : > { %v5384_v46 = vpop.f32.mrf.mxu0 }
 0x841   : > { %v4288_v3 = vadd.f32 %v6586_v11, %v4225_v30  ;;  %v5385_v22 = vadd.f32 %v5384_v46, %v5383_v37  ;;  %v4325_v44 = vmul.f32 %v6593_v13, %v4303_v52  ;;  %v4512_v24 = vmul.f32 %v6599_v54, %v4303_v52 }
 0x842   : > { %v5386_v43 = vpop.f32.mrf.mxu0  ;;  %v4693_v38 = vmul.f32 %v6601_v19, %v4303_v52 }
 0x843   : > { %v4228_v31 = vadd.f32 %v5429_v62, %v5385_v22  ;;  %4342 = vadd.xlane.f32.xlu0 %v4325_v44  ;;  %4527 = vadd.xlane.f32.xlu1 %v4511_v28  ;;  %v4304_v55 = vmax.f32 %v4288_v3, 0.0 }
 0x844   : > { %v5387_v45 = vpop.f32.mrf.mxu0 }
 0x845   : > { %v4289_v33 = vadd.f32 %v6586_v11, %v4228_v31  ;;  %v5388_v35 = vadd.f32 %v5387_v45, %v5386_v43  ;;  %v4326_v47 = vmul.f32 %v6593_v13, %v4304_v55  ;;  %v4513_v62 = vmul.f32 %v6599_v54, %v4304_v55 }
 0x846   : > { %v5389_v36 = vpop.f32.mrf.mxu0 }
 0x847   : > { %4529 = vadd.xlane.f32.xlu0 %v4512_v24  ;;  %4708 = vadd.xlane.f32.xlu1 %v4692_v4  ;;  %v4305_v42 = vmax.f32 %v4289_v33, 0.0  ;;  %v4233_v39 = vadd.f32 %v5388_v35, %v4039_v57  ;;  %v4694_v57 = vmul.f32 %v6601_v19, %v4304_v55 }
 0x848   : > { %v5390_v6 = vpop.f32.mrf.mxu0 }
 0x849   : > { %v5391_v29 = vadd.f32 %v5390_v6, %v5389_v36  ;;  %v4290_v25 = vadd.f32 %v6586_v11, %v4233_v39  ;;  %v4327_v34 = vmul.f32 %v6593_v13, %v4305_v42  ;;  %v4514_v56 = vmul.f32 %v6599_v54, %v4305_v42 }
 0x84a   : > { %v5392_v48 = vpop.f32.mrf.mxu0 }
 0x84b   : > { %4710 = vadd.xlane.f32.xlu0 %v4693_v38  ;;  %4344 = vadd.xlane.f32.xlu1 %v4326_v47  ;;  %v4236_v58 = vadd.f32 %v5391_v29, %v6565_v41  ;;  %v4306_v12 = vmax.f32 %v4290_v25, 0.0  ;;  %v4695_v41 = vmul.f32 %v6601_v19, %v4305_v42 }
 0x84c   : > { %v5393_v53 = vpop.f32.mrf.mxu0 }
 0x84d   : > { %v4291_v2 = vadd.f32 %v6586_v11, %v4236_v58  ;;  %v5394_v51 = vadd.f32 %v5393_v53, %v5392_v48  ;;  %v4328_v60 = vmul.f32 %v6593_v13, %v4306_v12  ;;  %v4515_v18 = vmul.f32 %v6599_v54, %v4306_v12 }
 0x84e   : > { %v5395_v59 = vpop.f32.mrf.mxu0  ;;  %v4696_v22 = vmul.f32 %v6601_v19, %v4306_v12 }
 0x84f   : > { %4346 = vadd.xlane.f32.xlu0 %v4327_v34  ;;  %4531 = vadd.xlane.f32.xlu1 %v4513_v62  ;;  %v4307_v50 = vmax.f32 %v4291_v2, 0.0  ;;  %v4241_v27 = vadd.f32 %v6561_v1, %v5394_v51 }
 0x850   : > { %v5396_v9 = vpop.f32.mrf.mxu0 }
 0x851   : > { %v5397_v32 = vadd.f32 %v5396_v9, %v5395_v59  ;;  %v4292_v40 = vadd.f32 %v6586_v11, %v4241_v27  ;;  %v4329_v21 = vmul.f32 %v6593_v13, %v4307_v50  ;;  %v4516_v3 = vmul.f32 %v6599_v54, %v4307_v50 }
 0x852   : > { %v5398_v15 = vpop.f32.mrf.mxu0  ;;  %v4697_v4 = vmul.f32 %v6601_v19, %v4307_v50 }
 0x853   : > { %4533 = vadd.xlane.f32.xlu0 %v4514_v56  ;;  %4712 = vadd.xlane.f32.xlu1 %v4694_v57  ;;  %v4244_v7 = vadd.f32 %v6563_v61, %v5397_v32  ;;  %v4308_v52 = vmax.f32 %v4292_v40, 0.0 }
 0x854   : > { %v5399_v17 = vpop.f32.mrf.mxu0 }
 0x855   : > { %v5400_v37 = vadd.f32 %v5399_v17, %v5398_v15  ;;  %v4293_v30 = vadd.f32 %v6586_v11, %v4244_v7  ;;  %v4330_v55 = vmul.f32 %v6593_v13, %v4308_v52  ;;  %v4517_v39 = vmul.f32 %v6599_v54, %v4308_v52 }
 0x856   : > { %v5401_v23 = vpop.f32.mrf.mxu0 }
 0x857   : > { %4714 = vadd.xlane.f32.xlu0 %v4695_v41  ;;  %4348 = vadd.xlane.f32.xlu1 %v4328_v60  ;;  %v4249_v61 = vadd.f32 %v5400_v37, %v6569_v20  ;;  %v4309_v31 = vmax.f32 %v4293_v30, 0.0 }
 0x858   : > { %v5402_v46 = vpop.f32.mrf.mxu0 }
 0x859   : > { %v5403_v28 = vadd.f32 %v5402_v46, %v5401_v23  ;;  %v4294_v24 = vadd.f32 %v6586_v11, %v4249_v61  ;;  %v4331_v42 = vmul.f32 %v6593_v13, %v4309_v31  ;;  %v4518_v34 = vmul.f32 %v6599_v54, %v4309_v31 }
 0x85a   : > { %v5404_v10 = vpop.f32.mrf.mxu1  ;;  %v4699_v50 = vmul.f32 %v6601_v19, %v4309_v31 }
 0x85b   : > { %4350 = vadd.xlane.f32.xlu0 %v4329_v21  ;;  %4535 = vadd.xlane.f32.xlu1 %v4515_v18  ;;  %v4252_v36 = vadd.f32 %v5403_v28, %v6573_v49  ;;  %v4310_v53 = vmax.f32 %v4294_v24, 0.0 }
 0x85c   : > { %v5405_v1 = vpop.f32.mrf.mxu1 }
 0x85d   : > { %v4295_v25 = vadd.f32 %v6586_v11, %v4252_v36  ;;  %v5406_v49 = vadd.f32 %v5405_v1, %v5404_v10  ;;  %v4332_v27 = vmul.f32 %v6593_v13, %v4310_v53  ;;  %v4519_v37 = vmul.f32 %v6599_v54, %v4310_v53 }
 0x85e   : > { %v5407_v44 = vpop.f32.mrf.mxu1  ;;  %v4700_v28 = vmul.f32 %v6601_v19, %v4310_v53 }
 0x85f   : > { %4537 = vadd.xlane.f32.xlu0 %v4516_v3  ;;  %4716 = vadd.xlane.f32.xlu1 %v4696_v22  ;;  %v4311_v56 = vmax.f32 %v4295_v25, 0.0  ;;  %v4257_v15 = vadd.f32 %v6567_v63, %v5406_v49 }
 0x860   : > { %v5408_v43 = vpop.f32.mrf.mxu1 }
 0x861   : > { %v5409_v45 = vadd.f32 %v5408_v43, %v5407_v44  ;;  %v4296_v63 = vadd.f32 %v6586_v11, %v4257_v15  ;;  %v4333_v10 = vmul.f32 %v6593_v13, %v4311_v56  ;;  %v4520_v61 = vmul.f32 %v6599_v54, %v4311_v56 }
 0x862   : > { %v5410_v33 = vpop.f32.mrf.mxu1 }
 0x863   : > { %v4260_v35 = vadd.f32 %v6571_v26, %v5409_v45  ;;  %4718 = vadd.xlane.f32.xlu0 %v4697_v4  ;;  %4352 = vadd.xlane.f32.xlu1 %v4330_v55  ;;  %v4698_v26 = vmul.f32 %v6601_v19, %v4308_v52  ;;  %v4312_v44 = vmax.f32 %v4296_v63, 0.0 }
 0x864   : > { %v5411_v6 = vpop.f32.mrf.mxu1 }
 0x865   : > { %v4297_v20 = vadd.f32 %v6586_v11, %v4260_v35  ;;  %v5412_v38 = vadd.f32 %v5411_v6, %v5410_v33  ;;  %v4334_v33 = vmul.f32 %v6593_v13, %v4312_v44  ;;  %v4702_v6 = vmul.f32 %v6601_v19, %v4312_v44 }
 0x866   : > { %v5413_v29 = vpop.f32.mrf.mxu1 }
 0x867   : > { %v4313_v47 = vmax.f32 %v4297_v20, 0.0  ;;  %v4265_v48 = vadd.f32 %v5412_v38, %v6577_v16  ;;  %4354 = vadd.xlane.f32.xlu0 %v4331_v42  ;;  %4539 = vadd.xlane.f32.xlu1 %v4517_v39  ;;  %v3483_v20 = vpop.xlane.xlu0 %3482 }
 0x868   : > { %v5414_v58 = vpop.f32.mrf.mxu1 }
 0x869   : > { %v4298_v62 = vadd.f32 %v6586_v11, %v4265_v48  ;;  %v5415_v59 = vadd.f32 %v5414_v58, %v5413_v29  ;;  %v4335_v9 = vmul.f32 %v6593_v13, %v4313_v47  ;;  %v4522_v57 = vmul.f32 %v6599_v54, %v4313_v47 }
 0x86a   : > { %v5416_v12 = vpop.f32.mrf.mxu1  ;;  %v4703_v16 = vmul.f32 %v6601_v19, %v4313_v47 }
 0x86b   : > { %v4314_v2 = vmax.f32 %v4298_v62, 0.0  ;;  %v4268_v51 = vadd.f32 %v5415_v59, %v6581_v8  ;;  %4541 = vadd.xlane.f32.xlu0 %v4518_v34  ;;  %4720 = vadd.xlane.f32.xlu1 %v4698_v26  ;;  %v3489_v42 = vpop.xlane.xlu0 %3488 }
 0x86c   : > { %v5417_v41 = vpop.f32.mrf.mxu1  ;;  %v3528_v39 = vadd.f32 %v6510_v14, %v3489_v42 }
 0x86d   : > { %v4299_v32 = vadd.f32 %v6586_v11, %v4268_v51  ;;  %v5418_v17 = vadd.f32 %v5417_v41, %v5416_v12  ;;  %v4336_v60 = vmul.f32 %v6593_v13, %v4314_v2  ;;  %v4523_v40 = vmul.f32 %v6599_v54, %v4314_v2  ;;  %v6706_v41 = vld [vmem:[%s6912_s10] ss:$0 sm:$0xff] }
 0x86e   : > { %v5419_v7 = vpop.f32.mrf.mxu1  ;;  %v4704_v8 = vmul.f32 %v6601_v19, %v4314_v2 }
 0x86f   : > { %v4315_v23 = vmax.f32 %v4299_v32, 0.0  ;;  %v4273_v21 = vadd.f32 %v6575_v5, %v5418_v17  ;;  %4722 = vadd.xlane.f32.xlu0 %v4699_v50  ;;  %4356 = vadd.xlane.f32.xlu1 %v4332_v27  ;;  %v3495_v47 = vpop.xlane.xlu0 %3494 }
 0x870   : > { %v5420_v18 = vpop.f32.mrf.mxu1  ;;  %v3530_v48 = vadd.f32 %v6510_v14, %v3495_v47 }
 0x871   : > { %v4300_v1 = vadd.f32 %v6586_v11, %v4273_v21  ;;  %v5421_v52 = vadd.f32 %v5420_v18, %v5419_v7  ;;  %v4337_v30 = vmul.f32 %v6593_v13, %v4315_v23  ;;  %v4524_v46 = vmul.f32 %v6599_v54, %v4315_v23 }
 0x872   : > { %v4705_v3 = vmul.f32 %v6601_v19, %v4315_v23 }
 0x873   : > { %v4316_v22 = vmax.f32 %v4300_v1, 0.0  ;;  %v4276_v5 = vadd.f32 %v6579_v0, %v5421_v52  ;;  %4358 = vadd.xlane.f32.xlu0 %v4333_v10  ;;  %4543 = vadd.xlane.f32.xlu1 %v4519_v37  ;;  %v4701_v0 = vmul.f32 %v6601_v19, %v4311_v56  ;;  %v3501_v25 = vpop.xlane.xlu0 %3500 }
 0x874   : > { %v3532_v49 = vadd.f32 %v6510_v14, %v3501_v25 }
 0x875   : > { %v4301_v43 = vadd.f32 %v6586_v11, %v4276_v5  ;;  %v4338_v31 = vmul.f32 %v6593_v13, %v4316_v22  ;;  %v4525_v45 = vmul.f32 %v6599_v54, %v4316_v22  ;;  %v4706_v4 = vmul.f32 %v6601_v19, %v4316_v22 }
 0x876   : > { %v4521_v11 = vmul.f32 %v6599_v54, %v4312_v44 }
 0x877   : > { %v4317_v55 = vmax.f32 %v4301_v43, 0.0  ;;  %4545 = vadd.xlane.f32.xlu0 %v4520_v61  ;;  %4724 = vadd.xlane.f32.xlu1 %v4700_v28  ;;  %v3507_v62 = vpop.xlane.xlu0 %3506 }
 0x878   : > { %v3534_v59 = vadd.f32 %v6510_v14, %v3507_v62 }
 0x879   : > { %v4339_v35 = vmul.f32 %v6593_v13, %v4317_v55  ;;  %v4526_v24 = vmul.f32 %v6599_v54, %v4317_v55  ;;  %v4707_v36 = vmul.f32 %v6601_v19, %v4317_v55  ;;  %v3480_v13 = vpop.xlane.xlu1 %3479  ;;  %v3526_v19 = vadd.f32 %v6510_v14, %v3483_v20 }
 0x87a   : > { %v3525_v53 = vadd.f32 %v6510_v14, %v3480_v13 }
 0x87b   : > { %4726 = vadd.xlane.f32.xlu0 %v4701_v0  ;;  %4360 = vadd.xlane.f32.xlu1 %v4334_v33  ;;  %v3513_v12 = vpop.xlane.xlu0 %3512 }
 0x87d   : > { %v3486_v54 = vpop.xlane.xlu1 %3485 }
 0x87e   : > { %v3527_v34 = vadd.f32 %v6510_v14, %v3486_v54 }
 0x87f   : > { %4362 = vadd.xlane.f32.xlu0 %v4335_v9  ;;  %4547 = vadd.xlane.f32.xlu1 %v4521_v11  ;;  %v6709_v27 = vpop.permute.xlu0 %4887 }
 0x881   : > { %v3492_v38 = vpop.xlane.xlu1 %3491 }
 0x883   : > { %4549 = vadd.xlane.f32.xlu0 %v4522_v57  ;;  %4728 = vadd.xlane.f32.xlu1 %v4702_v6  ;;  %v3529_v57 = vadd.f32 %v6510_v14, %v3492_v38 }
 0x885   : > { %v3498_v29 = vpop.xlane.xlu1 %3497 }
 0x886   : > { %v3531_v51 = vadd.f32 %v6510_v14, %v3498_v29 }
 0x887   : > { %4730 = vadd.xlane.f32.xlu0 %v4703_v16  ;;  %4364 = vadd.xlane.f32.xlu1 %v4336_v60  ;;  %v3536_v16 = vadd.f32 %v6510_v14, %v3513_v12 }
 0x889   : > { %v3504_v26 = vpop.xlane.xlu1 %3503 }
 0x88a   : > { %v3533_v56 = vadd.f32 %v6510_v14, %v3504_v26 }
 0x88b   : > { %4366 = vadd.xlane.f32.xlu0 %v4337_v30  ;;  %4551 = vadd.xlane.f32.xlu1 %v4523_v40 }
 0x88d   : > { %v3510_v58 = vpop.xlane.xlu1 %3509 }
 0x88e   : > { %v3535_v50 = vadd.f32 %v6510_v14, %v3510_v58 }
 0x88f   : > { %4553 = vadd.xlane.f32.xlu0 %v4524_v46  ;;  %4732 = vadd.xlane.f32.xlu1 %v4704_v8 }
 0x891   : > { %v6688_v9 = vpop.permute.xlu1 %4885 }
 0x893   : > { %4734 = vadd.xlane.f32.xlu0 %v4705_v3  ;;  %4368 = vadd.xlane.f32.xlu1 %v4338_v31 }
 0x895   : > { %v6694_v2 = vpop.permute.xlu1 %4889 }
 0x897   : > { %4370 = vadd.xlane.f32.xlu0 %v4339_v35  ;;  %4555 = vadd.xlane.f32.xlu1 %v4525_v45 }
 0x899   : > { %v6700_v15 = vpop.permute.xlu1 %4891 }
 0x89b   : > { %4557 = vadd.xlane.f32.xlu0 %v4526_v24  ;;  %4736 = vadd.xlane.f32.xlu1 %v4706_v4 }
 0x89f   : > { %4738 = vadd.xlane.f32.xlu0 %v4707_v36 }
 0x8ac   : > { %4895 = vrot.lane.b32.xlu1 %v3526_v19, %s5761_s16 }
 0x8b0   : > { %4899 = vrot.lane.b32.xlu1 %v3528_v39, %s5761_s16 }
 0x8b4   : > { %4903 = vrot.lane.b32.xlu1 %v3530_v48, %s5761_s16 }
 0x8b5   : > { %4893 = vrot.lane.b32.xlu0 %v3525_v53, %s5761_s16 }
 0x8b8   : > { %4907 = vrot.lane.b32.xlu1 %v3532_v49, %s5761_s16 }
 0x8b9   : > { %4897 = vrot.lane.b32.xlu0 %v3527_v34, %s5761_s16 }
 0x8bc   : > { %4911 = vrot.lane.b32.xlu1 %v3534_v59, %s5761_s16 }
 0x8bd   : > { %4901 = vrot.lane.b32.xlu0 %v3529_v57, %s5761_s16 }
 0x8c0   : > { %4915 = vrot.lane.b32.xlu1 %v3536_v16, %s5761_s16 }
 0x8c1   : > { %4905 = vrot.lane.b32.xlu0 %v3531_v51, %s5761_s16 }
 0x8c5   : > { %4909 = vrot.lane.b32.xlu0 %v3533_v56, %s5761_s16 }
 0x8c8   : > { %v4341_v32 = vpop.xlane.xlu1 %4340 }
 0x8c9   : > { %v4378_v17 = vadd.f32 %v6706_v41, %v4341_v32  ;;  %4913 = vrot.lane.b32.xlu0 %v3535_v50, %s5761_s16 }
 0x8cb   : > { %v4394_v60 = vsub.f32 0.0, %v4378_v17 }
 0x8cc   : > { %v4343_v40 = vpop.xlane.xlu0 %4342  ;;  %v4528_v7 = vpop.xlane.xlu1 %4527 }
 0x8cd   : > { %v4410_v8 = vmul.f32 1.442695, %v4394_v60  ;;  %v4379_v23 = vadd.f32 %v6706_v41, %v4343_v40  ;;  %v4559_v21 = vadd.f32 %v6706_v41, %v4528_v7 }
 0x8cf   : > { %5525 = vpow2.f32 %v4410_v8  ;;  %v4395_v63 = vsub.f32 0.0, %v4379_v23  ;;  %v4575_v18 = vsub.f32 0.0, %v4559_v21 }
 0x8d0   : > { %v4530_v10 = vpop.xlane.xlu0 %4529  ;;  %v4709_v14 = vpop.xlane.xlu1 %4708 }
 0x8d1   : > { %v4412_v37 = vmul.f32 1.442695, %v4395_v63  ;;  %v4591_v1 = vmul.f32 1.442695, %v4575_v18  ;;  %v4560_v52 = vadd.f32 %v6706_v41, %v4530_v10  ;;  %v4740_v30 = vadd.f32 %v6706_v41, %v4709_v14 }
 0x8d3   : > { %5527 = vpow2.f32 %v4412_v37  ;;  %v4576_v46 = vsub.f32 0.0, %v4560_v52  ;;  %v4756_v3 = vsub.f32 0.0, %v4740_v30 }
 0x8d4   : > { %5529 = vpow2.f32 %v4591_v1  ;;  %v4711_v22 = vpop.xlane.xlu0 %4710  ;;  %v4345_v5 = vpop.xlane.xlu1 %4344 }
 0x8d5   : > { %v4593_v44 = vmul.f32 1.442695, %v4576_v46  ;;  %v4772_v61 = vmul.f32 1.442695, %v4756_v3  ;;  %v4741_v28 = vadd.f32 %v6706_v41, %v4711_v22  ;;  %v4380_v43 = vadd.f32 %v6706_v41, %v4345_v5 }
 0x8d7   : > { %5531 = vpow2.f32 %v4593_v44  ;;  %v4757_v31 = vsub.f32 0.0, %v4741_v28  ;;  %v4396_v45 = vsub.f32 0.0, %v4380_v43 }
 0x8d8   : > { %5533 = vpow2.f32 %v4772_v61  ;;  %v4347_v4 = vpop.xlane.xlu0 %4346  ;;  %v4532_v55 = vpop.xlane.xlu1 %4531 }
 0x8d9   : > { %v4774_v0 = vmul.f32 1.442695, %v4757_v31  ;;  %v4414_v33 = vmul.f32 1.442695, %v4396_v45  ;;  %v4381_v35 = vadd.f32 %v6706_v41, %v4347_v4  ;;  %v4561_v24 = vadd.f32 %v6706_v41, %v4532_v55 }
 0x8db   : > { %5535 = vpow2.f32 %v4774_v0  ;;  %v4397_v36 = vsub.f32 0.0, %v4381_v35  ;;  %v4577_v11 = vsub.f32 0.0, %v4561_v24 }
 0x8dc   : > { %v5526_v6 = vpop.eup %5525  ;;  %5537 = vpow2.f32 %v4414_v33  ;;  %v4534_v13 = vpop.xlane.xlu0 %4533 }
 0x8dd   : > { %v4713_v54 = vpop.xlane.xlu1 %4712  ;;  %v4442_v20 = vadd.f32 1.0, %v5526_v6  ;;  %v4416_v19 = vmul.f32 1.442695, %v4397_v36  ;;  %v4595_v38 = vmul.f32 1.442695, %v4577_v11  ;;  %v4562_v42 = vadd.f32 %v6706_v41, %v4534_v13 }
 0x8de   : > { %v4742_v39 = vadd.f32 %v6706_v41, %v4713_v54 }
 0x8df   : > { %5539 = vrcp.f32 %v4442_v20  ;;  %v4578_v29 = vsub.f32 0.0, %v4562_v42 }
 0x8e0   : > { %v5528_v47 = vpop.eup %5527  ;;  %5541 = vpow2.f32 %v4416_v19  ;;  %v4758_v48 = vsub.f32 0.0, %v4742_v39  ;;  %v4715_v26 = vpop.xlane.xlu0 %4714 }
 0x8e1   : > { %v4349_v53 = vpop.xlane.xlu1 %4348  ;;  %v5530_v25 = vpop.eup %5529  ;;  %v4443_v49 = vadd.f32 1.0, %v5528_v47  ;;  %5543 = vpow2.f32 %v4595_v38  ;;  %v4597_v58 = vmul.f32 1.442695, %v4578_v29  ;;  %v4743_v34 = vadd.f32 %v6706_v41, %v4715_v26 }
 0x8e2   : > { %v4623_v62 = vadd.f32 1.0, %v5530_v25  ;;  %v4776_v59 = vmul.f32 1.442695, %v4758_v48  ;;  %v4382_v57 = vadd.f32 %v6706_v41, %v4349_v53 }
 0x8e3   : > { %5545 = vrcp.f32 %v4443_v49  ;;  %v4759_v12 = vsub.f32 0.0, %v4743_v34 }
 0x8e4   : > { %v5532_v16 = vpop.eup %5531  ;;  %5547 = vrcp.f32 %v4623_v62  ;;  %v4398_v51 = vsub.f32 0.0, %v4382_v57  ;;  %v4351_v56 = vpop.xlane.xlu0 %4350 }
 0x8e5   : > { %v4536_v50 = vpop.xlane.xlu1 %4535  ;;  %v5534_v32 = vpop.eup %5533  ;;  %v4624_v17 = vadd.f32 1.0, %v5532_v16  ;;  %5549 = vpow2.f32 %v4597_v58  ;;  %v4778_v60 = vmul.f32 1.442695, %v4759_v12  ;;  %v4383_v40 = vadd.f32 %v6706_v41, %v4351_v56 }
 0x8e6   : > { %v4804_v7 = vadd.f32 1.0, %v5534_v32  ;;  %5551 = vpow2.f32 %v4776_v59  ;;  %v4418_v8 = vmul.f32 1.442695, %v4398_v51  ;;  %v4563_v23 = vadd.f32 %v6706_v41, %v4536_v50 }
 0x8e7   : > { %5553 = vrcp.f32 %v4624_v17  ;;  %v4399_v21 = vsub.f32 0.0, %v4383_v40 }
 0x8e8   : > { %v5536_v63 = vpop.eup %5535  ;;  %5555 = vrcp.f32 %v4804_v7  ;;  %v4579_v18 = vsub.f32 0.0, %v4563_v23  ;;  %v4538_v10 = vpop.xlane.xlu0 %4537 }
 0x8e9   : > { %v4717_v14 = vpop.xlane.xlu1 %4716  ;;  %v5538_v37 = vpop.eup %5537  ;;  %v4805_v1 = vadd.f32 1.0, %v5536_v63  ;;  %5557 = vpow2.f32 %v4778_v60  ;;  %v4420_v52 = vmul.f32 1.442695, %v4399_v21  ;;  %v4564_v30 = vadd.f32 %v6706_v41, %v4538_v10 }
 0x8ea   : > { %v4444_v46 = vadd.f32 1.0, %v5538_v37  ;;  %5559 = vpow2.f32 %v4418_v8  ;;  %v4599_v3 = vmul.f32 1.442695, %v4579_v18  ;;  %v4744_v22 = vadd.f32 %v6706_v41, %v4717_v14 }
 0x8eb   : > { %5561 = vrcp.f32 %v4805_v1  ;;  %v4580_v5 = vsub.f32 0.0, %v4564_v30 }
 0x8ec   : > { %v5540_v44 = vpop.eup %5539  ;;  %5563 = vrcp.f32 %v4444_v46  ;;  %v4760_v61 = vsub.f32 0.0, %v4744_v22  ;;  %v4719_v28 = vpop.xlane.xlu0 %4718 }
 0x8ed   : > { %v4353_v43 = vpop.xlane.xlu1 %4352  ;;  %v5542_v31 = vpop.eup %5541  ;;  %4491 = vst.msk [vmem:[%s6733_s28] sm:$0xff] %vm4490_vm6, %v5540_v44  ;;  %5565 = vpow2.f32 %v4420_v52  ;;  %v4601_v45 = vmul.f32 1.442695, %v4580_v5  ;;  %v4745_v4 = vadd.f32 %v6706_v41, %v4719_v28 }
 0x8ee   : > { %v4384_v55 = vadd.f32 %v6706_v41, %v4353_v43  ;;  %v5544_v0 = vpop.eup %5543  ;;  %v4445_v33 = vadd.f32 1.0, %v5542_v31  ;;  %5567 = vpow2.f32 %v4599_v3  ;;  %v4780_v35 = vmul.f32 1.442695, %v4760_v61 }
 0x8ef   : > { %v4625_v24 = vadd.f32 1.0, %v5544_v0  ;;  %5569 = vpow2.f32 %v4601_v45  ;;  %v4761_v36 = vsub.f32 0.0, %v4745_v4 }
 0x8f0   : > { %v4400_v11 = vsub.f32 0.0, %v4384_v55  ;;  %v5546_v6 = vpop.eup %5545  ;;  %5571 = vrcp.f32 %v4445_v33  ;;  %v4355_v13 = vpop.xlane.xlu0 %4354 }
 0x8f1   : > { %v4540_v54 = vpop.xlane.xlu1 %4539  ;;  %v5548_v20 = vpop.eup %5547  ;;  %4492 = vst.msk [vmem:[%s6733_s28 + $0x8] sm:$0xff] %vm4490_vm6, %v5546_v6  ;;  %5573 = vrcp.f32 %v4625_v24  ;;  %v4782_v19 = vmul.f32 1.442695, %v4761_v36  ;;  %v4385_v42 = vadd.f32 %v6706_v41, %v4355_v13 }
 0x8f2   : > { %v4422_v38 = vmul.f32 1.442695, %v4400_v11  ;;  %v5550_v39 = vpop.eup %5549  ;;  %5575 = vpow2.f32 %v4780_v35  ;;  %v4565_v29 = vadd.f32 %v6706_v41, %v4540_v54  ;;  %4672 = vst.msk [vmem:[%s6733_s28] sm:$0xff] %vm4671_vm7, %v5548_v20 }
 0x8f3   : > { %v5552_v47 = vpop.eup %5551  ;;  %v4626_v48 = vadd.f32 1.0, %v5550_v39  ;;  %5577 = vpow2.f32 %v4782_v19  ;;  %v4401_v26 = vsub.f32 0.0, %v4385_v42 }
 0x8f4   : > { %v5554_v53 = vpop.eup %5553  ;;  %v4806_v25 = vadd.f32 1.0, %v5552_v47  ;;  %5579 = vpow2.f32 %v4422_v38  ;;  %v4581_v49 = vsub.f32 0.0, %v4565_v29  ;;  %v4542_v58 = vpop.xlane.xlu0 %4541 }
 0x8f5   : > { %v4721_v34 = vpop.xlane.xlu1 %4720  ;;  %v5556_v62 = vpop.eup %5555  ;;  %5581 = vrcp.f32 %v4626_v48  ;;  %v4424_v59 = vmul.f32 1.442695, %v4401_v26  ;;  %v4566_v57 = vadd.f32 %v6706_v41, %v4542_v58  ;;  %4673 = vst.msk [vmem:[%s6733_s28 + $0x8] sm:$0xff] %vm4671_vm7, %v5554_v53 }
 0x8f6   : > { %v4746_v12 = vadd.f32 %v6706_v41, %v4721_v34  ;;  %v5558_v16 = vpop.eup %5557  ;;  %5583 = vrcp.f32 %v4806_v25  ;;  %v4603_v51 = vmul.f32 1.442695, %v4581_v49  ;;  %4853 = vst.msk [vmem:[%s6733_s28] sm:$0xff] %vm4852_vm8, %v5556_v62 }
 0x8f7   : > { %v5560_v56 = vpop.eup %5559  ;;  %v4807_v50 = vadd.f32 1.0, %v5558_v16  ;;  %5585 = vpow2.f32 %v4424_v59  ;;  %v4582_v32 = vsub.f32 0.0, %v4566_v57  ;;  %4934 = vst.msk [vmem:[%s6733_s28] sm:$0xff] %vm4933_vm9, %v6688_v9 }
 0x8f8   : > { %v4762_v17 = vsub.f32 0.0, %v4746_v12  ;;  %v5562_v60 = vpop.eup %5561  ;;  %v4446_v40 = vadd.f32 1.0, %v5560_v56  ;;  %5587 = vpow2.f32 %v4603_v51  ;;  %v4723_v7 = vpop.xlane.xlu0 %4722 }
 0x8f9   : > { %v4357_v8 = vpop.xlane.xlu1 %4356  ;;  %v5564_v23 = vpop.eup %5563  ;;  %5589 = vrcp.f32 %v4807_v50  ;;  %v4605_v21 = vmul.f32 1.442695, %v4582_v32  ;;  %v4747_v18 = vadd.f32 %v6706_v41, %v4723_v7  ;;  %4854 = vst.msk [vmem:[%s6733_s28 + $0x8] sm:$0xff] %vm4852_vm8, %v5562_v60 }
 0x8fa   : > { %v4784_v63 = vmul.f32 1.442695, %v4762_v17  ;;  %v5566_v10 = vpop.eup %5565  ;;  %4493 = vst.msk [vmem:[%s6733_s28 + $0x10] sm:$0xff] %vm4490_vm6, %v5564_v23  ;;  %5591 = vrcp.f32 %v4446_v40  ;;  %v4386_v9 = vadd.f32 %v6706_v41, %v4357_v8 }
 0x8fb   : > { %4935 = vst.msk [vmem:[%s6733_s28 + $0x8] sm:$0xff] %vm4933_vm9, %v6709_v27  ;;  %v5568_v14 = vpop.eup %5567  ;;  %v4447_v37 = vadd.f32 1.0, %v5566_v10  ;;  %5593 = vpow2.f32 %v4605_v21  ;;  %v4763_v1 = vsub.f32 0.0, %v4747_v18 }
 0x8fc   : > { %v5570_v52 = vpop.eup %5569  ;;  %v4627_v30 = vadd.f32 1.0, %v5568_v14  ;;  %5595 = vpow2.f32 %v4784_v63  ;;  %v4402_v46 = vsub.f32 0.0, %v4386_v9  ;;  %v4359_v3 = vpop.xlane.xlu0 %4358 }
 0x8fd   : > { %v4544_v22 = vpop.xlane.xlu1 %4543  ;;  %v5572_v5 = vpop.eup %5571  ;;  %5597 = vrcp.f32 %v4447_v37  ;;  %v4628_v44 = vadd.f32 1.0, %v5570_v52  ;;  %v4786_v61 = vmul.f32 1.442695, %v4763_v1  ;;  %v4387_v28 = vadd.f32 %v6706_v41, %v4359_v3 }
 0x8fe   : > { %v5574_v43 = vpop.eup %5573  ;;  %4494 = vst.msk [vmem:[%s6733_s28 + $0x18] sm:$0xff] %vm4490_vm6, %v5572_v5  ;;  %5599 = vrcp.f32 %v4627_v30  ;;  %v4426_v27 = vmul.f32 1.442695, %v4402_v46  ;;  %v4567_v31 = vadd.f32 %v6706_v41, %v4544_v22 }
 0x8ff   : > { %v5576_v45 = vpop.eup %5575  ;;  %5601 = vrcp.f32 %v4628_v44  ;;  %v4403_v4 = vsub.f32 0.0, %v4387_v28  ;;  %4674 = vst.msk [vmem:[%s6733_s28 + $0x10] sm:$0xff] %vm4671_vm7, %v5574_v43 }
 0x900   : > { %v5578_v55 = vpop.eup %5577  ;;  %v4808_v0 = vadd.f32 1.0, %v5576_v45  ;;  %5603 = vpow2.f32 %v4786_v61  ;;  %v4583_v33 = vsub.f32 0.0, %v4567_v31  ;;  %v4546_v35 = vpop.xlane.xlu0 %4545 }
 0x901   : > { %v4725_v24 = vpop.xlane.xlu1 %4724  ;;  %v5580_v36 = vpop.eup %5579  ;;  %v4809_v11 = vadd.f32 1.0, %v5578_v55  ;;  %5605 = vpow2.f32 %v4426_v27  ;;  %v4428_v6 = vmul.f32 1.442695, %v4403_v4  ;;  %v4568_v13 = vadd.f32 %v6706_v41, %v4546_v35 }
 0x902   : > { %v5582_v54 = vpop.eup %5581  ;;  %5607 = vrcp.f32 %v4808_v0  ;;  %v4448_v20 = vadd.f32 1.0, %v5580_v36  ;;  %v4607_v19 = vmul.f32 1.442695, %v4583_v33  ;;  %v4748_v38 = vadd.f32 %v6706_v41, %v4725_v24 }
 0x903   : > { %v5584_v42 = vpop.eup %5583  ;;  %5609 = vrcp.f32 %v4809_v11  ;;  %v4584_v39 = vsub.f32 0.0, %v4568_v13  ;;  %4675 = vst.msk [vmem:[%s6733_s28 + $0x18] sm:$0xff] %vm4671_vm7, %v5582_v54 }
 0x904   : > { %v5586_v29 = vpop.eup %5585  ;;  %5611 = vrcp.f32 %v4448_v20  ;;  %v4764_v47 = vsub.f32 0.0, %v4748_v38  ;;  %v4727_v48 = vpop.xlane.xlu0 %4726  ;;  %4855 = vst.msk [vmem:[%s6733_s28 + $0x10] sm:$0xff] %vm4852_vm8, %v5584_v42 }
 0x905   : > { %v4361_v26 = vpop.xlane.xlu1 %4360  ;;  %v5588_v53 = vpop.eup %5587  ;;  %v4449_v25 = vadd.f32 1.0, %v5586_v29  ;;  %5613 = vpow2.f32 %v4428_v6  ;;  %v4609_v49 = vmul.f32 1.442695, %v4584_v39  ;;  %v4749_v58 = vadd.f32 %v6706_v41, %v4727_v48  ;;  %4936 = vst.msk [vmem:[%s6733_s28 + $0x10] sm:$0xff] %vm4933_vm9, %v6694_v2 }
 0x906   : > { %v5590_v34 = vpop.eup %5589  ;;  %v4629_v62 = vadd.f32 1.0, %v5588_v53  ;;  %5615 = vpow2.f32 %v4607_v19  ;;  %v4788_v59 = vmul.f32 1.442695, %v4764_v47  ;;  %v4388_v57 = vadd.f32 %v6706_v41, %v4361_v26 }
 0x907   : > { %v5592_v12 = vpop.eup %5591  ;;  %5617 = vrcp.f32 %v4449_v25  ;;  %v4765_v16 = vsub.f32 0.0, %v4749_v58  ;;  %4856 = vst.msk [vmem:[%s6733_s28 + $0x18] sm:$0xff] %vm4852_vm8, %v5590_v34 }
 0x908   : > { %v5594_v51 = vpop.eup %5593  ;;  %4495 = vst.msk [vmem:[%s6733_s28 + $0x20] sm:$0xff] %vm4490_vm6, %v5592_v12  ;;  %5619 = vrcp.f32 %v4629_v62  ;;  %v4404_v56 = vsub.f32 0.0, %v4388_v57  ;;  %v4363_v50 = vpop.xlane.xlu0 %4362 }
 0x909   : > { %v4548_v2 = vpop.xlane.xlu1 %4547  ;;  %4937 = vst.msk [vmem:[%s6733_s28 + $0x18] sm:$0xff] %vm4933_vm9, %v6700_v15  ;;  %v5596_v32 = vpop.eup %5595  ;;  %v4630_v17 = vadd.f32 1.0, %v5594_v51  ;;  %5621 = vpow2.f32 %v4609_v49  ;;  %v4790_v60 = vmul.f32 1.442695, %v4765_v16  ;;  %v4389_v40 = vadd.f32 %v6706_v41, %v4363_v50 }
 0x90a   : > { %v5598_v7 = vpop.eup %5597  ;;  %v4810_v8 = vadd.f32 1.0, %v5596_v32  ;;  %5623 = vpow2.f32 %v4788_v59  ;;  %v4430_v23 = vmul.f32 1.442695, %v4404_v56  ;;  %v4569_v21 = vadd.f32 %v6706_v41, %v4548_v2 }
 0x90b   : > { %v5600_v63 = vpop.eup %5599  ;;  %4496 = vst.msk [vmem:[%s6733_s28 + $0x28] sm:$0xff] %vm4490_vm6, %v5598_v7  ;;  %5625 = vrcp.f32 %v4630_v17  ;;  %v4405_v18 = vsub.f32 0.0, %v4389_v40 }
 0x90c   : > { %v5602_v15 = vpop.eup %5601  ;;  %5627 = vrcp.f32 %v4810_v8  ;;  %v4585_v10 = vsub.f32 0.0, %v4569_v21  ;;  %v4550_v9 = vpop.xlane.xlu0 %4549  ;;  %4676 = vst.msk [vmem:[%s6733_s28 + $0x20] sm:$0xff] %vm4671_vm7, %v5600_v63 }
 0x90d   : > { %v4729_v14 = vpop.xlane.xlu1 %4728  ;;  %v5604_v37 = vpop.eup %5603  ;;  %5629 = vpow2.f32 %v4790_v60  ;;  %v4432_v1 = vmul.f32 1.442695, %v4405_v18  ;;  %v4570_v52 = vadd.f32 %v6706_v41, %v4550_v9  ;;  %4677 = vst.msk [vmem:[%s6733_s28 + $0x28] sm:$0xff] %vm4671_vm7, %v5602_v15 }
 0x90e   : > { %v4750_v30 = vadd.f32 %v6706_v41, %v4729_v14  ;;  %v5606_v46 = vpop.eup %5605  ;;  %v4811_v3 = vadd.f32 1.0, %v5604_v37  ;;  %5631 = vpow2.f32 %v4430_v23  ;;  %v4611_v22 = vmul.f32 1.442695, %v4585_v10 }
 0x90f   : > { %v5608_v5 = vpop.eup %5607  ;;  %v4450_v44 = vadd.f32 1.0, %v5606_v46  ;;  %5633 = vpow2.f32 %v4432_v1  ;;  %v4586_v61 = vsub.f32 0.0, %v4570_v52 }
 0x910   : > { %v4766_v28 = vsub.f32 0.0, %v4750_v30  ;;  %v5610_v43 = vpop.eup %5609  ;;  %5635 = vrcp.f32 %v4811_v3  ;;  %v4731_v27 = vpop.xlane.xlu0 %4730  ;;  %4857 = vst.msk [vmem:[%s6733_s28 + $0x20] sm:$0xff] %vm4852_vm8, %v5608_v5 }
 0x911   : > { %v4365_v31 = vpop.xlane.xlu1 %4364  ;;  %v5612_v45 = vpop.eup %5611  ;;  %5637 = vrcp.f32 %v4450_v44  ;;  %v4613_v4 = vmul.f32 1.442695, %v4586_v61  ;;  %v4751_v0 = vadd.f32 %v6706_v41, %v4731_v27  ;;  %4858 = vst.msk [vmem:[%s6733_s28 + $0x28] sm:$0xff] %vm4852_vm8, %v5610_v43 }
 0x912   : > { %v4792_v55 = vmul.f32 1.442695, %v4766_v28  ;;  %v5614_v33 = vpop.eup %5613  ;;  %4497 = vst.msk [vmem:[%s6733_s28 + $0x30] sm:$0xff] %vm4490_vm6, %v5612_v45  ;;  %5639 = vpow2.f32 %v4611_v22  ;;  %v4390_v35 = vadd.f32 %v6706_v41, %v4365_v31 }
 0x913   : > { %v5616_v24 = vpop.eup %5615  ;;  %v4451_v36 = vadd.f32 1.0, %v5614_v33  ;;  %5641 = vpow2.f32 %v4613_v4  ;;  %v4767_v11 = vsub.f32 0.0, %v4751_v0 }
 0x914   : > { %v5618_v6 = vpop.eup %5617  ;;  %v4631_v13 = vadd.f32 1.0, %v5616_v24  ;;  %5643 = vpow2.f32 %v4792_v55  ;;  %v4406_v54 = vsub.f32 0.0, %v4390_v35  ;;  %v4367_v20 = vpop.xlane.xlu0 %4366 }
 0x915   : > { %v4552_v19 = vpop.xlane.xlu1 %4551  ;;  %v5620_v38 = vpop.eup %5619  ;;  %4498 = vst.msk [vmem:[%s6733_s28 + $0x38] sm:$0xff] %vm4490_vm6, %v5618_v6  ;;  %5645 = vrcp.f32 %v4451_v36  ;;  %v4794_v42 = vmul.f32 1.442695, %v4767_v11  ;;  %v4391_v39 = vadd.f32 %v6706_v41, %v4367_v20 }
 0x916   : > { %v4571_v29 = vadd.f32 %v6706_v41, %v4552_v19  ;;  %v5622_v47 = vpop.eup %5621  ;;  %5647 = vrcp.f32 %v4631_v13  ;;  %v4434_v48 = vmul.f32 1.442695, %v4406_v54  ;;  %4678 = vst.msk [vmem:[%s6733_s28 + $0x30] sm:$0xff] %vm4671_vm7, %v5620_v38 }
 0x917   : > { %v5624_v26 = vpop.eup %5623  ;;  %v4632_v53 = vadd.f32 1.0, %v5622_v47  ;;  %5649 = vpow2.f32 %v4794_v42  ;;  %v4407_v25 = vsub.f32 0.0, %v4391_v39 }
 0x918   : > { %v4587_v49 = vsub.f32 0.0, %v4571_v29  ;;  %v5626_v58 = vpop.eup %5625  ;;  %v4812_v34 = vadd.f32 1.0, %v5624_v26  ;;  %5651 = vpow2.f32 %v4434_v48  ;;  %v4554_v62 = vpop.xlane.xlu0 %4553 }
 0x919   : > { %v4733_v59 = vpop.xlane.xlu1 %4732  ;;  %v5628_v57 = vpop.eup %5627  ;;  %5653 = vrcp.f32 %v4632_v53  ;;  %v4436_v12 = vmul.f32 1.442695, %v4407_v25  ;;  %v4572_v51 = vadd.f32 %v6706_v41, %v4554_v62  ;;  %4679 = vst.msk [vmem:[%s6733_s28 + $0x38] sm:$0xff] %vm4671_vm7, %v5626_v58 }
 0x91a   : > { %v4615_v16 = vmul.f32 1.442695, %v4587_v49  ;;  %v5630_v56 = vpop.eup %5629  ;;  %5655 = vrcp.f32 %v4812_v34  ;;  %v4752_v50 = vadd.f32 %v6706_v41, %v4733_v59  ;;  %4859 = vst.msk [vmem:[%s6733_s28 + $0x30] sm:$0xff] %vm4852_vm8, %v5628_v57 }
 0x91b   : > { %v5632_v2 = vpop.eup %5631  ;;  %v4813_v32 = vadd.f32 1.0, %v5630_v56  ;;  %5657 = vpow2.f32 %v4436_v12  ;;  %v4588_v17 = vsub.f32 0.0, %v4572_v51 }
 0x91c   : > { %v5634_v60 = vpop.eup %5633  ;;  %v4452_v40 = vadd.f32 1.0, %v5632_v2  ;;  %5659 = vpow2.f32 %v4615_v16  ;;  %v4768_v7 = vsub.f32 0.0, %v4752_v50  ;;  %v4735_v8 = vpop.xlane.xlu0 %4734 }
 0x91d   : > { %v4369_v23 = vpop.xlane.xlu1 %4368  ;;  %v5636_v21 = vpop.eup %5635  ;;  %5661 = vrcp.f32 %v4813_v32  ;;  %v4453_v63 = vadd.f32 1.0, %v5634_v60  ;;  %v4617_v18 = vmul.f32 1.442695, %v4588_v17  ;;  %v4753_v15 = vadd.f32 %v6706_v41, %v4735_v8 }
 0x91e   : > { %v5638_v10 = vpop.eup %5637  ;;  %5663 = vrcp.f32 %v4452_v40  ;;  %v4796_v9 = vmul.f32 1.442695, %v4768_v7  ;;  %v4392_v14 = vadd.f32 %v6706_v41, %v4369_v23  ;;  %4860 = vst.msk [vmem:[%s6733_s28 + $0x38] sm:$0xff] %vm4852_vm8, %v5636_v21 }
 0x91f   : > { %v5640_v37 = vpop.eup %5639  ;;  %4499 = vst.msk [vmem:[%s6733_s28 + $0x40] sm:$0xff] %vm4490_vm6, %v5638_v10  ;;  %5665 = vrcp.f32 %v4453_v63  ;;  %v4769_v1 = vsub.f32 0.0, %v4753_v15 }
 0x920   : > { %v5642_v52 = vpop.eup %5641  ;;  %v4633_v30 = vadd.f32 1.0, %v5640_v37  ;;  %5667 = vpow2.f32 %v4617_v18  ;;  %v4408_v46 = vsub.f32 0.0, %v4392_v14  ;;  %v4371_v3 = vpop.xlane.xlu0 %4370 }
 0x921   : > { %v4556_v22 = vpop.xlane.xlu1 %4555  ;;  %v5644_v5 = vpop.eup %5643  ;;  %v4634_v44 = vadd.f32 1.0, %v5642_v52  ;;  %5669 = vpow2.f32 %v4796_v9  ;;  %v4798_v61 = vmul.f32 1.442695, %v4769_v1  ;;  %v4393_v28 = vadd.f32 %v6706_v41, %v4371_v3 }
 0x922   : > { %v5646_v43 = vpop.eup %5645  ;;  %5671 = vrcp.f32 %v4633_v30  ;;  %v4814_v27 = vadd.f32 1.0, %v5644_v5  ;;  %v4438_v31 = vmul.f32 1.442695, %v4408_v46  ;;  %v4573_v45 = vadd.f32 %v6706_v41, %v4556_v22 }
 0x923   : > { %v5648_v4 = vpop.eup %5647  ;;  %4500 = vst.msk [vmem:[%s6733_s28 + $0x48] sm:$0xff] %vm4490_vm6, %v5646_v43  ;;  %5673 = vrcp.f32 %v4634_v44  ;;  %v4409_v55 = vsub.f32 0.0, %v4393_v28 }
 0x924   : > { %v5650_v0 = vpop.eup %5649  ;;  %5675 = vrcp.f32 %v4814_v27  ;;  %v4589_v33 = vsub.f32 0.0, %v4573_v45  ;;  %v4558_v35 = vpop.xlane.xlu0 %4557  ;;  %4680 = vst.msk [vmem:[%s6733_s28 + $0x40] sm:$0xff] %vm4671_vm7, %v5648_v4 }
 0x925   : > { %v4737_v24 = vpop.xlane.xlu1 %4736  ;;  %v5652_v36 = vpop.eup %5651  ;;  %v4815_v11 = vadd.f32 1.0, %v5650_v0  ;;  %5677 = vpow2.f32 %v4798_v61  ;;  %v4440_v6 = vmul.f32 1.442695, %v4409_v55  ;;  %v4574_v13 = vadd.f32 %v6706_v41, %v4558_v35 }
 0x926   : > { %v5654_v54 = vpop.eup %5653  ;;  %v4454_v20 = vadd.f32 1.0, %v5652_v36  ;;  %5679 = vpow2.f32 %v4438_v31  ;;  %v4619_v19 = vmul.f32 1.442695, %v4589_v33  ;;  %v4754_v38 = vadd.f32 %v6706_v41, %v4737_v24 }
 0x927   : > { %v5656_v42 = vpop.eup %5655  ;;  %5681 = vrcp.f32 %v4815_v11  ;;  %v4590_v39 = vsub.f32 0.0, %v4574_v13  ;;  %4681 = vst.msk [vmem:[%s6733_s28 + $0x48] sm:$0xff] %vm4671_vm7, %v5654_v54 }
 0x928   : > { %v5658_v29 = vpop.eup %5657  ;;  %5683 = vrcp.f32 %v4454_v20  ;;  %v4770_v47 = vsub.f32 0.0, %v4754_v38  ;;  %v4739_v48 = vpop.xlane.xlu0 %4738  ;;  %4861 = vst.msk [vmem:[%s6733_s28 + $0x40] sm:$0xff] %vm4852_vm8, %v5656_v42 }
 0x929   : > { %v4896_v26 = vpop.permute.xlu1 %4895  ;;  %v5660_v53 = vpop.eup %5659  ;;  %v4455_v25 = vadd.f32 1.0, %v5658_v29  ;;  %5685 = vpow2.f32 %v4440_v6  ;;  %v4621_v49 = vmul.f32 1.442695, %v4590_v39  ;;  %v4755_v58 = vadd.f32 %v6706_v41, %v4739_v48 }
 0x92a   : > { %4939 = vst.msk [vmem:[%s6733_s28 + $0x28] sm:$0xff] %vm4933_vm9, %v4896_v26  ;;  %v5662_v34 = vpop.eup %5661  ;;  %v4635_v62 = vadd.f32 1.0, %v5660_v53  ;;  %5687 = vpow2.f32 %v4619_v19  ;;  %v4800_v59 = vmul.f32 1.442695, %v4770_v47 }
 0x92b   : > { %v5664_v57 = vpop.eup %5663  ;;  %5689 = vrcp.f32 %v4455_v25  ;;  %v4771_v12 = vsub.f32 0.0, %v4755_v58  ;;  %4862 = vst.msk [vmem:[%s6733_s28 + $0x48] sm:$0xff] %vm4852_vm8, %v5662_v34 }
 0x92c   : > { %v5666_v16 = vpop.eup %5665  ;;  %4501 = vst.msk [vmem:[%s6733_s28 + $0x50] sm:$0xff] %vm4490_vm6, %v5664_v57  ;;  %5691 = vrcp.f32 %v4635_v62  ;;  %v4894_v51 = vpop.permute.xlu0 %4893 }
 0x92d   : > { %v4900_v41 = vpop.permute.xlu1 %4899  ;;  %v5668_v56 = vpop.eup %5667  ;;  %4502 = vst.msk [vmem:[%s6733_s28 + $0x58] sm:$0xff] %vm4490_vm6, %v5666_v16  ;;  %5693 = vpow2.f32 %v4621_v49  ;;  %v4802_v50 = vmul.f32 1.442695, %v4771_v12 }
 0x92e   : > { %4938 = vst.msk [vmem:[%s6733_s28 + $0x20] sm:$0xff] %vm4933_vm9, %v4894_v51  ;;  %4941 = vst.msk [vmem:[%s6733_s28 + $0x38] sm:$0xff] %vm4933_vm9, %v4900_v41  ;;  %v5670_v2 = vpop.eup %5669  ;;  %v4636_v32 = vadd.f32 1.0, %v5668_v56  ;;  %5695 = vpow2.f32 %v4800_v59 }
 0x92f   : > { %v5672_v17 = vpop.eup %5671  ;;  %v4816_v60 = vadd.f32 1.0, %v5670_v2  ;;  %5697 = vpow2.f32 %v4802_v50 }
 0x930   : > { %v5674_v40 = vpop.eup %5673  ;;  %5699 = vrcp.f32 %v4636_v32  ;;  %4682 = vst.msk [vmem:[%s6733_s28 + $0x50] sm:$0xff] %vm4671_vm7, %v5672_v17  ;;  %v4898_v7 = vpop.permute.xlu0 %4897 }
 0x931   : > { %v4904_v8 = vpop.permute.xlu1 %4903  ;;  %v5676_v23 = vpop.eup %5675  ;;  %5701 = vrcp.f32 %v4816_v60  ;;  %4683 = vst.msk [vmem:[%s6733_s28 + $0x58] sm:$0xff] %vm4671_vm7, %v5674_v40 }
 0x932   : > { %4940 = vst.msk [vmem:[%s6733_s28 + $0x30] sm:$0xff] %vm4933_vm9, %v4898_v7  ;;  %4943 = vst.msk [vmem:[%s6733_s28 + $0x48] sm:$0xff] %vm4933_vm9, %v4904_v8  ;;  %v5678_v21 = vpop.eup %5677 }
 0x933   : > { %4863 = vst.msk [vmem:[%s6733_s28 + $0x50] sm:$0xff] %vm4852_vm8, %v5676_v23  ;;  %v5680_v63 = vpop.eup %5679  ;;  %v4817_v18 = vadd.f32 1.0, %v5678_v21 }
 0x934   : > { %v5682_v15 = vpop.eup %5681  ;;  %v4456_v10 = vadd.f32 1.0, %v5680_v63  ;;  %v4902_v9 = vpop.permute.xlu0 %4901 }
 0x935   : > { %v4908_v14 = vpop.permute.xlu1 %4907  ;;  %v5684_v37 = vpop.eup %5683  ;;  %5703 = vrcp.f32 %v4817_v18  ;;  %4864 = vst.msk [vmem:[%s6733_s28 + $0x58] sm:$0xff] %vm4852_vm8, %v5682_v15 }
 0x936   : > { %4942 = vst.msk [vmem:[%s6733_s28 + $0x40] sm:$0xff] %vm4933_vm9, %v4902_v9  ;;  %v5686_v1 = vpop.eup %5685  ;;  %5705 = vrcp.f32 %v4456_v10  ;;  %4945 = vst.msk [vmem:[%s6733_s28 + $0x58] sm:$0xff] %vm4933_vm9, %v4908_v14 }
 0x937   : > { %4503 = vst.msk [vmem:[%s6733_s28 + $0x60] sm:$0xff] %vm4490_vm6, %v5684_v37  ;;  %v5688_v52 = vpop.eup %5687  ;;  %v4457_v30 = vadd.f32 1.0, %v5686_v1 }
 0x938   : > { %v5690_v46 = vpop.eup %5689  ;;  %v4637_v3 = vadd.f32 1.0, %v5688_v52  ;;  %v4906_v22 = vpop.permute.xlu0 %4905 }
 0x939   : > { %v5692_v5 = vpop.eup %5691  ;;  %4504 = vst.msk [vmem:[%s6733_s28 + $0x68] sm:$0xff] %vm4490_vm6, %v5690_v46  ;;  %5707 = vrcp.f32 %v4457_v30  ;;  %v4912_v35 = vpop.permute.xlu1 %4911 }
 0x93a   : > { %4944 = vst.msk [vmem:[%s6733_s28 + $0x50] sm:$0xff] %vm4933_vm9, %v4906_v22  ;;  %v5694_v44 = vpop.eup %5693  ;;  %5709 = vrcp.f32 %v4637_v3 }
 0x93b   : > { %4684 = vst.msk [vmem:[%s6733_s28 + $0x60] sm:$0xff] %vm4671_vm7, %v5692_v5  ;;  %v5696_v61 = vpop.eup %5695  ;;  %v4638_v28 = vadd.f32 1.0, %v5694_v44 }
 0x93c   : > { %v5698_v43 = vpop.eup %5697  ;;  %v4818_v27 = vadd.f32 1.0, %v5696_v61  ;;  %v4910_v4 = vpop.permute.xlu0 %4909 }
 0x93d   : > { %v5700_v31 = vpop.eup %5699  ;;  %5711 = vrcp.f32 %v4638_v28  ;;  %v4819_v45 = vadd.f32 1.0, %v5698_v43  ;;  %v4916_v20 = vpop.permute.xlu1 %4915 }
 0x93e   : > { %v5702_v55 = vpop.eup %5701  ;;  %5713 = vrcp.f32 %v4818_v27  ;;  %4685 = vst.msk [vmem:[%s6733_s28 + $0x68] sm:$0xff] %vm4671_vm7, %v5700_v31 }
 0x93f   : > { %5715 = vrcp.f32 %v4819_v45  ;;  %4865 = vst.msk [vmem:[%s6733_s28 + $0x60] sm:$0xff] %vm4852_vm8, %v5702_v55 }
 0x940   : > { %4946 = vst.msk [vmem:[%s6733_s28 + $0x60] sm:$0xff] %vm4933_vm9, %v4910_v4  ;;  %v4914_v54 = vpop.permute.xlu0 %4913 }
 0x942   : > { %v5704_v0 = vpop.eup %5703 }
 0x943   : > { %v5706_v33 = vpop.eup %5705  ;;  %4866 = vst.msk [vmem:[%s6733_s28 + $0x68] sm:$0xff] %vm4852_vm8, %v5704_v0 }
 0x944   : > { %4505 = vst.msk [vmem:[%s6733_s28 + $0x70] sm:$0xff] %vm4490_vm6, %v5706_v33 }
 0x945   : > { %4947 = vst.msk [vmem:[%s6733_s28 + $0x68] sm:$0xff] %vm4933_vm9, %v4912_v35 }
 0x946   : > { %v5708_v24 = vpop.eup %5707 }
 0x947   : > { %v5710_v36 = vpop.eup %5709  ;;  %4506 = vst.msk [vmem:[%s6733_s28 + $0x78] sm:$0xff] %vm4490_vm6, %v5708_v24 }
 0x948   : > { %4686 = vst.msk [vmem:[%s6733_s28 + $0x70] sm:$0xff] %vm4671_vm7, %v5710_v36 }
 0x94a   : > { %v5712_v11 = vpop.eup %5711 }
 0x94b   : > { %v5714_v6 = vpop.eup %5713  ;;  %4687 = vst.msk [vmem:[%s6733_s28 + $0x78] sm:$0xff] %vm4671_vm7, %v5712_v11 }
 0x94c   : > { %v5716_v13 = vpop.eup %5715  ;;  %4867 = vst.msk [vmem:[%s6733_s28 + $0x70] sm:$0xff] %vm4852_vm8, %v5714_v6 }
 0x94d   : > { %4868 = vst.msk [vmem:[%s6733_s28 + $0x78] sm:$0xff] %vm4852_vm8, %v5716_v13 }
 0x94e   : > { %4948 = vst.msk [vmem:[%s6733_s28 + $0x70] sm:$0xff] %vm4933_vm9, %v4914_v54  ;;  %4949 = vst.msk [vmem:[%s6733_s28 + $0x78] sm:$0xff] %vm4933_vm9, %v4916_v20 }
 0x94f PF: > { %s24_s19 = sadd.s32 1, %s5753_s19  }
 0x950   : > { %p21_p1 = scmp.ge.s32.totalorder %s24_s19, 4  }
 0x952   :  { %23 = sbr.rel (!%p21_p1) target bundleno = 4 (0x4), region = 99 }
 0x957   :  { %4972 = vsyncpa [#allocation4], 1 }
 0x958   :  { %4974 = vsyncpa [#allocation4 + $0x1], 1 }

</bundles_post_ra>
